<compile_context>
chip_gen: v7x
topology: tpu7x:2x2x1
jax: 0.10.0
libtpu: 0.0.40
codegen_flags: <defaults>
</compile_context>

<pallas_src>
import functools

import jax
import jax.numpy as jnp
import numpy as np
from jax import lax
from jax.experimental import pallas as pl
from jax.experimental.pallas import tpu as pltpu


# ----------------------------- fused whole-stage kernel -----------------------------

def _fused_stage_kernel(layer_cfg, out_T, num_pool, dot_dtype, *refs):
    """layer_cfg: static tuple of (d1, d2, T_in, pool: bool) per layer."""
    (x_ref, w_in_ref, b_in_ref, wc_ref, w1l_ref, w1r_ref, w2l_ref, w2r_ref,
     bf_ref, w_out_t_ref, b_out_ref) = refs[:11]
    s_refs = refs[11:11 + num_pool]
    o_ref, fbuf_ref, acc_ref = refs[11 + num_pool:]

    def mm(a, b):
        return jnp.dot(a.astype(dot_dtype), b.astype(dot_dtype),
                       preferred_element_type=jnp.float32)

    T0 = layer_cfg[0][2] if layer_cfg else out_T

    # conv_1x1_in: contract the native [C_in, T] input over C_in (transposed-LHS matmul on
    # the MXU). The feature map lives channels-last (T, F) in VMEM for the rest of the stage.
    f0 = lax.dot_general(x_ref[...].astype(dot_dtype), w_in_ref[...].astype(dot_dtype),
                         dimension_numbers=(((0,), (0,)), ((), ())),
                         preferred_element_type=jnp.float32)          # (T0, F)
    fbuf_ref[:T0, :] = f0 + b_in_ref[...]

    s_idx = 0
    for i, (d1, d2, T, pool) in enumerate(layer_cfg):
        f = fbuf_ref[:T, :]

        # Dual dilated k=3 convs with conv_fusion pre-folded into the tap weights.
        # Centre taps of both branches are merged; off-centre taps are shifted matmuls whose
        # "same" zero padding is realized purely by static slice bounds (no padded copies).
        acc_ref[:T, :] = mm(f, wc_ref[i]) + bf_ref[i]
        for d, wl_ref, wr_ref in ((d1, w1l_ref, w1r_ref), (d2, w2l_ref, w2r_ref)):
            if T > d:
                # tap at t - d contributes to outputs t in [d, T)
                acc_ref[d:T, :] += mm(fbuf_ref[:T - d, :], wl_ref[i])
                # tap at t + d contributes to outputs t in [0, T - d)
                acc_ref[:T - d, :] += mm(fbuf_ref[d:T, :], wr_ref[i])

        # ReLU + dropout (identity in eval) + residual.
        fbuf_ref[:T, :] = jnp.maximum(acc_ref[:T, :], 0.0) + f

        if pool:
            # F.max_pool1d(kernel_size=2): pooled[j] = max(f[2j], f[2j+1]) (odd tail dropped).
            To = T // 2
            m = jnp.maximum(fbuf_ref[:T - 1, :], fbuf_ref[1:T, :])     # m[t]=max(f[t],f[t+1])
            fbuf_ref[:To, :] = mm(s_refs[s_idx][...], m)               # gather even rows (MXU)
            s_idx += 1

    # conv_out, written lane-dense as (Cout, T_out): no output transpose in the wrapper.
    out = lax.dot_general(w_out_t_ref[...].astype(dot_dtype),
                          fbuf_ref[:out_T, :].astype(dot_dtype),
                          dimension_numbers=(((1,), (1,)), ((), ())),
                          preferred_element_type=jnp.float32)          # (Cout, T_out)
    o_ref[...] = out + b_out_ref[...]


# ----------------------------------- wrapper -----------------------------------------

def _schedule(num_layers, pooling_layers, T0):
    cfg, T = [], T0
    for i in range(num_layers):
        d1 = 2 ** (num_layers - 1 - i)
        d2 = 2 ** i
        pool = (i in pooling_layers) and T >= 2
        cfg.append((d1, d2, T, pool))
        if pool:
            T //= 2
    return tuple(cfg), T


def mstcnpp_first_stage(x_bct, params, num_layers, pooling_layers=(1, 2, 4, 8),
                        dot_dtype=jnp.float32):
    """x_bct: [B, in_channels, T] -> [B, output_dim, T_out] (PyTorch Conv1d layout)."""
    B, C_in, T0 = x_bct.shape
    Fm = params["w_in"].shape[1]
    Cout = params["w_out"].shape[1]
    L = num_layers

    layer_cfg, out_T = _schedule(num_layers, pooling_layers, T0)

    # ---- fold conv_fusion into the dilated convs (pure weight algebra, done once) ----
    wc, w1l, w1r, w2l, w2r, bfold = [], [], [], [], [], []
    for (w1, b1, w2, b2, wf1, wf2, bf) in params["layers"]:
        w1f = jnp.einsum("kab,bc->kac", w1, wf1)        # (3, F, F)
        w2f = jnp.einsum("kab,bc->kac", w2, wf2)
        wc.append(w1f[1] + w2f[1])                      # merged centre taps
        w1l.append(w1f[0]); w1r.append(w1f[2])
        w2l.append(w2f[0]); w2r.append(w2f[2])
        bfold.append(b1 @ wf1 + b2 @ wf2 + bf)
    wc = jnp.stack(wc); w1l = jnp.stack(w1l); w1r = jnp.stack(w1r)
    w2l = jnp.stack(w2l); w2r = jnp.stack(w2r)
    bfold = jnp.stack(bfold)[:, None, :]                # (L, 1, F)

    # ---- even-row selection matrices, one per max_pool event (constant, tiny) ----
    s_mats = []
    for (_, _, Tl, pool) in layer_cfg:
        if pool:
            To = Tl // 2
            s = np.zeros((To, Tl - 1), np.float32)
            s[np.arange(To), 2 * np.arange(To)] = 1.0
            s_mats.append(jnp.asarray(s))

    b_in = params["b_in"].reshape(1, Fm)
    w_out_t = params["w_out"].T                          # (Cout, F)
    b_out = params["b_out"].reshape(Cout, 1)

    def const_spec(shape):
        zeros = (0,) * len(shape)
        return pl.BlockSpec(shape, lambda b: zeros)

    in_specs = [
        pl.BlockSpec((None, C_in, T0), lambda b: (b, 0, 0)),   # x, per-batch block
        const_spec((C_in, Fm)), const_spec((1, Fm)),           # conv_1x1_in
        const_spec((L, Fm, Fm)),                               # folded centre taps
        const_spec((L, Fm, Fm)), const_spec((L, Fm, Fm)),      # branch-1 left / right taps
        const_spec((L, Fm, Fm)), const_spec((L, Fm, Fm)),      # branch-2 left / right taps
        const_spec((L, 1, Fm)),                                # folded biases
        const_spec((Cout, Fm)), const_spec((Cout, 1)),         # conv_out (pre-transposed)
    ] + [const_spec(tuple(s.shape)) for s in s_mats]

    kernel = functools.partial(_fused_stage_kernel, layer_cfg, out_T, len(s_mats), dot_dtype)

    return pl.pallas_call(
        kernel,
        grid=(B,),
        out_shape=jax.ShapeDtypeStruct((B, Cout, out_T), jnp.float32),
        in_specs=in_specs,
        out_specs=pl.BlockSpec((None, Cout, out_T), lambda b: (b, 0, 0)),
        scratch_shapes=[pltpu.VMEM((T0, Fm), jnp.float32),     # resident feature map
                        pltpu.VMEM((T0, Fm), jnp.float32)],    # per-layer accumulator
        compiler_params=pltpu.CompilerParams(
            dimension_semantics=("parallel",)),                # batch across TCs (v7x)
    )(x_bct.astype(jnp.float32), params["w_in"], b_in,
      wc, w1l, w1r, w2l, w2r, bfold, w_out_t, b_out, *s_mats)


# ----------------------------------- parameters --------------------------------------

def init_params(key, num_layers, num_f_maps, input_dim, output_dim):
    keys = iter(jax.random.split(key, 4 + 7 * num_layers))

    def w(shape, fan_in):
        return jax.random.normal(next(keys), shape, jnp.float32) * (1.0 / np.sqrt(fan_in))

    Fm = num_f_maps
    params = {
        "w_in": w((input_dim, Fm), input_dim),     # conv_1x1_in weight (Cin, F)
        "b_in": w((Fm,), input_dim),
        "w_out": w((Fm, output_dim), Fm),          # conv_out weight (F, Cout)
        "b_out": w((output_dim,), Fm),
        "layers": [],
    }
    for _ in range(num_layers):
        w1 = w((3, Fm, Fm), 3 * Fm)                # dilated conv 1: (tap, Cin, Cout)
        b1 = w((Fm,), 3 * Fm)
        w2 = w((3, Fm, Fm), 3 * Fm)                # dilated conv 2
        b2 = w((Fm,), 3 * Fm)
        wf1 = w((Fm, Fm), 2 * Fm)                  # conv_fusion rows acting on branch 1
        wf2 = w((Fm, Fm), 2 * Fm)                  # conv_fusion rows acting on branch 2
        bf = w((Fm,), 2 * Fm)
        params["layers"].append((w1, b1, w2, b2, wf1, wf2, bf))
    return params


# ------------------------------- pure-jnp reference ----------------------------------

def reference_forward(x_bct, params, num_layers, pooling_layers=(1, 2, 4, 8)):
    """Unfused, un-folded math identical to the PyTorch module (f32, no Pallas)."""
    x = jnp.transpose(x_bct, (0, 2, 1)).astype(jnp.float32)   # (B, T, C)
    f = jnp.einsum("btc,cf->btf", x, params["w_in"]) + params["b_in"]
    for i in range(num_layers):
        d1 = 2 ** (num_layers - 1 - i)
        d2 = 2 ** i
        w1, b1, w2, b2, wf1, wf2, bf = params["layers"][i]
        T = f.shape[1]
        xp1 = jnp.pad(f, ((0, 0), (d1, d1), (0, 0)))
        xp2 = jnp.pad(f, ((0, 0), (d2, d2), (0, 0)))
        d1o = b1 + sum(jnp.einsum("btc,cf->btf", xp1[:, k * d1:k * d1 + T, :], w1[k])
                       for k in range(3))
        d2o = b2 + sum(jnp.einsum("btc,cf->btf", xp2[:, k * d2:k * d2 + T, :], w2[k])
                       for k in range(3))
        fused = (jnp.einsum("btc,cf->btf", d1o, wf1)
                 + jnp.einsum("btc,cf->btf", d2o, wf2) + bf)
        f = jnp.maximum(fused, 0.0) + f
        if i in pooling_layers:
            To = T // 2
            f = jnp.maximum(f[:, 0:2 * To:2, :], f[:, 1:2 * To:2, :])
    out = jnp.einsum("btf,fo->bto", f, params["w_out"]) + params["b_out"]
    return jnp.transpose(out, (0, 2, 1))


if __name__ == "__main__":
    B, C_IN, T = 2, 16, 64
    NUM_LAYERS, NUM_F_MAPS, OUT_DIM = 5, 32, 8
    POOLING = (1, 2, 4, 8)   # pools fire at i = 1, 2, 4 -> T: 64 -> 32 -> 16 -> 8

    key = jax.random.PRNGKey(0)
    kx, kp = jax.random.split(key)
    x = jax.random.normal(kx, (B, C_IN, T), jnp.float32)
    params = init_params(kp, NUM_LAYERS, NUM_F_MAPS, C_IN, OUT_DIM)

    out = jax.block_until_ready(mstcnpp_first_stage(x, params, NUM_LAYERS, POOLING))
    ref = jax.block_until_ready(reference_forward(x, params, NUM_LAYERS, POOLING))

    assert out.shape == (B, OUT_DIM, T // 8), out.shape
    np.testing.assert_allclose(np.asarray(out), np.asarray(ref), rtol=1e-2, atol=1e-2)
    print("KERNEL_OK")
</pallas_src>

<mosaic_0001>
module attributes {stable_mosaic.version = 11 : i64} {
  func.func @_fused_stage_kernel(%arg0: i32, %arg1: memref<1x16x64xf32, #tpu.memory_space<vmem>>, %arg2: memref<16x32xf32, #tpu.memory_space<vmem>>, %arg3: memref<1x32xf32, #tpu.memory_space<vmem>>, %arg4: memref<5x32x32xf32, #tpu.memory_space<vmem>>, %arg5: memref<5x32x32xf32, #tpu.memory_space<vmem>>, %arg6: memref<5x32x32xf32, #tpu.memory_space<vmem>>, %arg7: memref<5x32x32xf32, #tpu.memory_space<vmem>>, %arg8: memref<5x32x32xf32, #tpu.memory_space<vmem>>, %arg9: memref<5x1x32xf32, #tpu.memory_space<vmem>>, %arg10: memref<8x32xf32, #tpu.memory_space<vmem>>, %arg11: memref<8x1xf32, #tpu.memory_space<vmem>>, %arg12: memref<32x63xf32, #tpu.memory_space<vmem>>, %arg13: memref<16x31xf32, #tpu.memory_space<vmem>>, %arg14: memref<8x15xf32, #tpu.memory_space<vmem>>, %arg15: memref<1x8x8xf32, #tpu.memory_space<vmem>>, %arg16: memref<64x32xf32, #tpu.memory_space<vmem>>, %arg17: memref<64x32xf32, #tpu.memory_space<vmem>>) attributes {dimension_semantics = [#tpu.dimension_semantics<parallel>], iteration_bounds = array<i64: 2>, scalar_prefetch = 0 : i64, scratch_operands = 2 : i64, tpu.core_type = #tpu.core_type<tc>, window_params = [{transform_indices = @transform_0, window_bounds = array<i64: 1, 16, 64>}, {pipeline_mode = #tpu.pipeline_mode<synchronous>, transform_indices = @transform_1, window_bounds = array<i64: 16, 32>}, {pipeline_mode = #tpu.pipeline_mode<synchronous>, transform_indices = @transform_2, window_bounds = array<i64: 1, 32>}, {pipeline_mode = #tpu.pipeline_mode<synchronous>, transform_indices = @transform_3, window_bounds = array<i64: 5, 32, 32>}, {pipeline_mode = #tpu.pipeline_mode<synchronous>, transform_indices = @transform_4, window_bounds = array<i64: 5, 32, 32>}, {pipeline_mode = #tpu.pipeline_mode<synchronous>, transform_indices = @transform_5, window_bounds = array<i64: 5, 32, 32>}, {pipeline_mode = #tpu.pipeline_mode<synchronous>, transform_indices = @transform_6, window_bounds = array<i64: 5, 32, 32>}, {pipeline_mode = #tpu.pipeline_mode<synchronous>, transform_indices = @transform_7, window_bounds = array<i64: 5, 32, 32>}, {pipeline_mode = #tpu.pipeline_mode<synchronous>, transform_indices = @transform_8, window_bounds = array<i64: 5, 1, 32>}, {pipeline_mode = #tpu.pipeline_mode<synchronous>, transform_indices = @transform_9, window_bounds = array<i64: 8, 32>}, {pipeline_mode = #tpu.pipeline_mode<synchronous>, transform_indices = @transform_10, window_bounds = array<i64: 8, 1>}, {pipeline_mode = #tpu.pipeline_mode<synchronous>, transform_indices = @transform_11, window_bounds = array<i64: 32, 63>}, {pipeline_mode = #tpu.pipeline_mode<synchronous>, transform_indices = @transform_12, window_bounds = array<i64: 16, 31>}, {pipeline_mode = #tpu.pipeline_mode<synchronous>, transform_indices = @transform_13, window_bounds = array<i64: 8, 15>}, {transform_indices = @transform_14, window_bounds = array<i64: 1, 8, 8>}]} {
    %c0 = arith.constant 0 : index
    %c0_0 = arith.constant 0 : index
    %c0_1 = arith.constant 0 : index
    %0 = vector.load %arg1[%c0, %c0_0, %c0_1] : memref<1x16x64xf32, #tpu.memory_space<vmem>>, vector<1x16x64xf32>
    %1 = vector.shape_cast %0 : vector<1x16x64xf32> to vector<16x64xf32>
    %c0_2 = arith.constant 0 : index
    %c0_3 = arith.constant 0 : index
    %2 = vector.load %arg2[%c0_2, %c0_3] : memref<16x32xf32, #tpu.memory_space<vmem>>, vector<16x32xf32>
    %cst = arith.constant dense<0.000000e+00> : vector<64x32xf32>
    %3 = tpu.matmul %1, %2, %cst {dimension_numbers = #tpu.dot_dimension_numbers<[0], [0], [1], [1], [0, 1, 1, 1], [], []>} : vector<16x64xf32>, vector<16x32xf32>, vector<64x32xf32> -> vector<64x32xf32>
    %c0_4 = arith.constant 0 : index
    %c0_5 = arith.constant 0 : index
    %4 = vector.load %arg3[%c0_4, %c0_5] : memref<1x32xf32, #tpu.memory_space<vmem>>, vector<1x32xf32>
    %5 = vector.broadcast %4 : vector<1x32xf32> to vector<64x32xf32>
    %6 = arith.addf %3, %5 : vector<64x32xf32>
    %c0_6 = arith.constant 0 : index
    %c0_7 = arith.constant 0 : index
    %7 = vector.load %arg16[%c0_6, %c0_7] : memref<64x32xf32, #tpu.memory_space<vmem>>, vector<64x32xf32>
    tpu.vector_store %arg16[%c0_6, %c0_7], %6 {strides = array<i32>} : memref<64x32xf32, #tpu.memory_space<vmem>>, vector<64x32xf32>,
    %c0_8 = arith.constant 0 : index
    %c0_9 = arith.constant 0 : index
    %8 = vector.load %arg16[%c0_8, %c0_9] : memref<64x32xf32, #tpu.memory_space<vmem>>, vector<64x32xf32>
    %c0_10 = arith.constant 0 : index
    %c0_11 = arith.constant 0 : index
    %c0_12 = arith.constant 0 : index
    %9 = vector.load %arg4[%c0_10, %c0_11, %c0_12] : memref<5x32x32xf32, #tpu.memory_space<vmem>>, vector<1x32x32xf32>
    %10 = vector.shape_cast %9 : vector<1x32x32xf32> to vector<32x32xf32>
    %cst_13 = arith.constant dense<0.000000e+00> : vector<64x32xf32>
    %11 = tpu.matmul %8, %10, %cst_13 {dimension_numbers = #tpu.dot_dimension_numbers<[1], [0], [0], [1], [0, 0, 1, 1], [], []>} : vector<64x32xf32>, vector<32x32xf32>, vector<64x32xf32> -> vector<64x32xf32>
    %c0_14 = arith.constant 0 : index
    %c0_15 = arith.constant 0 : index
    %c0_16 = arith.constant 0 : index
    %12 = vector.load %arg9[%c0_14, %c0_15, %c0_16] : memref<5x1x32xf32, #tpu.memory_space<vmem>>, vector<1x1x32xf32>
    %13 = vector.shape_cast %12 : vector<1x1x32xf32> to vector<1x32xf32>
    %14 = vector.broadcast %13 : vector<1x32xf32> to vector<64x32xf32>
    %15 = arith.addf %11, %14 : vector<64x32xf32>
    %c0_17 = arith.constant 0 : index
    %c0_18 = arith.constant 0 : index
    %16 = vector.load %arg17[%c0_17, %c0_18] : memref<64x32xf32, #tpu.memory_space<vmem>>, vector<64x32xf32>
    tpu.vector_store %arg17[%c0_17, %c0_18], %15 {strides = array<i32>} : memref<64x32xf32, #tpu.memory_space<vmem>>, vector<64x32xf32>,
    %c16 = arith.constant 16 : index
    %c0_19 = arith.constant 0 : index
    %17 = vector.load %arg17[%c16, %c0_19] : memref<64x32xf32, #tpu.memory_space<vmem>>, vector<48x32xf32>
    %c0_20 = arith.constant 0 : index
    %c0_21 = arith.constant 0 : index
    %18 = vector.load %arg16[%c0_20, %c0_21] : memref<64x32xf32, #tpu.memory_space<vmem>>, vector<48x32xf32>
    %c0_22 = arith.constant 0 : index
    %c0_23 = arith.constant 0 : index
    %c0_24 = arith.constant 0 : index
    %19 = vector.load %arg5[%c0_22, %c0_23, %c0_24] : memref<5x32x32xf32, #tpu.memory_space<vmem>>, vector<1x32x32xf32>
    %20 = vector.shape_cast %19 : vector<1x32x32xf32> to vector<32x32xf32>
    %cst_25 = arith.constant dense<0.000000e+00> : vector<48x32xf32>
    %21 = tpu.matmul %18, %20, %cst_25 {dimension_numbers = #tpu.dot_dimension_numbers<[1], [0], [0], [1], [0, 0, 1, 1], [], []>} : vector<48x32xf32>, vector<32x32xf32>, vector<48x32xf32> -> vector<48x32xf32>
    %22 = arith.addf %17, %21 : vector<48x32xf32>
    %c16_26 = arith.constant 16 : index
    %c0_27 = arith.constant 0 : index
    %23 = vector.load %arg17[%c16_26, %c0_27] : memref<64x32xf32, #tpu.memory_space<vmem>>, vector<48x32xf32>
    tpu.vector_store %arg17[%c16_26, %c0_27], %22 {strides = array<i32>} : memref<64x32xf32, #tpu.memory_space<vmem>>, vector<48x32xf32>,
    %c0_28 = arith.constant 0 : index
    %c0_29 = arith.constant 0 : index
    %24 = vector.load %arg17[%c0_28, %c0_29] : memref<64x32xf32, #tpu.memory_space<vmem>>, vector<48x32xf32>
    %c16_30 = arith.constant 16 : index
    %c0_31 = arith.constant 0 : index
    %25 = vector.load %arg16[%c16_30, %c0_31] : memref<64x32xf32, #tpu.memory_space<vmem>>, vector<48x32xf32>
    %c0_32 = arith.constant 0 : index
    %c0_33 = arith.constant 0 : index
    %c0_34 = arith.constant 0 : index
    %26 = vector.load %arg6[%c0_32, %c0_33, %c0_34] : memref<5x32x32xf32, #tpu.memory_space<vmem>>, vector<1x32x32xf32>
    %27 = vector.shape_cast %26 : vector<1x32x32xf32> to vector<32x32xf32>
    %cst_35 = arith.constant dense<0.000000e+00> : vector<48x32xf32>
    %28 = tpu.matmul %25, %27, %cst_35 {dimension_numbers = #tpu.dot_dimension_numbers<[1], [0], [0], [1], [0, 0, 1, 1], [], []>} : vector<48x32xf32>, vector<32x32xf32>, vector<48x32xf32> -> vector<48x32xf32>
    %29 = arith.addf %24, %28 : vector<48x32xf32>
    %c0_36 = arith.constant 0 : index
    %c0_37 = arith.constant 0 : index
    %30 = vector.load %arg17[%c0_36, %c0_37] : memref<64x32xf32, #tpu.memory_space<vmem>>, vector<48x32xf32>
    tpu.vector_store %arg17[%c0_36, %c0_37], %29 {strides = array<i32>} : memref<64x32xf32, #tpu.memory_space<vmem>>, vector<48x32xf32>,
    %c1 = arith.constant 1 : index
    %c0_38 = arith.constant 0 : index
    %31 = vector.load %arg17[%c1, %c0_38] : memref<64x32xf32, #tpu.memory_space<vmem>>, vector<63x32xf32>
    %c0_39 = arith.constant 0 : index
    %c0_40 = arith.constant 0 : index
    %32 = vector.load %arg16[%c0_39, %c0_40] : memref<64x32xf32, #tpu.memory_space<vmem>>, vector<63x32xf32>
    %c0_41 = arith.constant 0 : index
    %c0_42 = arith.constant 0 : index
    %c0_43 = arith.constant 0 : index
    %33 = vector.load %arg7[%c0_41, %c0_42, %c0_43] : memref<5x32x32xf32, #tpu.memory_space<vmem>>, vector<1x32x32xf32>
    %34 = vector.shape_cast %33 : vector<1x32x32xf32> to vector<32x32xf32>
    %cst_44 = arith.constant dense<0.000000e+00> : vector<63x32xf32>
    %35 = tpu.matmul %32, %34, %cst_44 {dimension_numbers = #tpu.dot_dimension_numbers<[1], [0], [0], [1], [0, 0, 1, 1], [], []>} : vector<63x32xf32>, vector<32x32xf32>, vector<63x32xf32> -> vector<63x32xf32>
    %36 = arith.addf %31, %35 : vector<63x32xf32>
    %c1_45 = arith.constant 1 : index
    %c0_46 = arith.constant 0 : index
    %37 = vector.load %arg17[%c1_45, %c0_46] : memref<64x32xf32, #tpu.memory_space<vmem>>, vector<63x32xf32>
    tpu.vector_store %arg17[%c1_45, %c0_46], %36 {strides = array<i32>} : memref<64x32xf32, #tpu.memory_space<vmem>>, vector<63x32xf32>,
    %c0_47 = arith.constant 0 : index
    %c0_48 = arith.constant 0 : index
    %38 = vector.load %arg17[%c0_47, %c0_48] : memref<64x32xf32, #tpu.memory_space<vmem>>, vector<63x32xf32>
    %c1_49 = arith.constant 1 : index
    %c0_50 = arith.constant 0 : index
    %39 = vector.load %arg16[%c1_49, %c0_50] : memref<64x32xf32, #tpu.memory_space<vmem>>, vector<63x32xf32>
    %c0_51 = arith.constant 0 : index
    %c0_52 = arith.constant 0 : index
    %c0_53 = arith.constant 0 : index
    %40 = vector.load %arg8[%c0_51, %c0_52, %c0_53] : memref<5x32x32xf32, #tpu.memory_space<vmem>>, vector<1x32x32xf32>
    %41 = vector.shape_cast %40 : vector<1x32x32xf32> to vector<32x32xf32>
    %cst_54 = arith.constant dense<0.000000e+00> : vector<63x32xf32>
    %42 = tpu.matmul %39, %41, %cst_54 {dimension_numbers = #tpu.dot_dimension_numbers<[1], [0], [0], [1], [0, 0, 1, 1], [], []>} : vector<63x32xf32>, vector<32x32xf32>, vector<63x32xf32> -> vector<63x32xf32>
    %43 = arith.addf %38, %42 : vector<63x32xf32>
    %c0_55 = arith.constant 0 : index
    %c0_56 = arith.constant 0 : index
    %44 = vector.load %arg17[%c0_55, %c0_56] : memref<64x32xf32, #tpu.memory_space<vmem>>, vector<63x32xf32>
    tpu.vector_store %arg17[%c0_55, %c0_56], %43 {strides = array<i32>} : memref<64x32xf32, #tpu.memory_space<vmem>>, vector<63x32xf32>,
    %c0_57 = arith.constant 0 : index
    %c0_58 = arith.constant 0 : index
    %45 = vector.load %arg17[%c0_57, %c0_58] : memref<64x32xf32, #tpu.memory_space<vmem>>, vector<64x32xf32>
    %cst_59 = arith.constant 0.000000e+00 : f32
    %46 = vector.broadcast %cst_59 : f32 to vector<64x32xf32>
    %47 = arith.maximumf %45, %46 : vector<64x32xf32>
    %48 = arith.addf %47, %8 : vector<64x32xf32>
    %c0_60 = arith.constant 0 : index
    %c0_61 = arith.constant 0 : index
    %49 = vector.load %arg16[%c0_60, %c0_61] : memref<64x32xf32, #tpu.memory_space<vmem>>, vector<64x32xf32>
    tpu.vector_store %arg16[%c0_60, %c0_61], %48 {strides = array<i32>} : memref<64x32xf32, #tpu.memory_space<vmem>>, vector<64x32xf32>,
    %c0_62 = arith.constant 0 : index
    %c0_63 = arith.constant 0 : index
    %50 = vector.load %arg16[%c0_62, %c0_63] : memref<64x32xf32, #tpu.memory_space<vmem>>, vector<64x32xf32>
    %c1_64 = arith.constant 1 : index
    %c0_65 = arith.constant 0 : index
    %c0_66 = arith.constant 0 : index
    %51 = vector.load %arg4[%c1_64, %c0_65, %c0_66] : memref<5x32x32xf32, #tpu.memory_space<vmem>>, vector<1x32x32xf32>
    %52 = vector.shape_cast %51 : vector<1x32x32xf32> to vector<32x32xf32>
    %cst_67 = arith.constant dense<0.000000e+00> : vector<64x32xf32>
    %53 = tpu.matmul %50, %52, %cst_67 {dimension_numbers = #tpu.dot_dimension_numbers<[1], [0], [0], [1], [0, 0, 1, 1], [], []>} : vector<64x32xf32>, vector<32x32xf32>, vector<64x32xf32> -> vector<64x32xf32>
    %c1_68 = arith.constant 1 : index
    %c0_69 = arith.constant 0 : index
    %c0_70 = arith.constant 0 : index
    %54 = vector.load %arg9[%c1_68, %c0_69, %c0_70] : memref<5x1x32xf32, #tpu.memory_space<vmem>>, vector<1x1x32xf32>
    %55 = vector.shape_cast %54 : vector<1x1x32xf32> to vector<1x32xf32>
    %56 = vector.broadcast %55 : vector<1x32xf32> to vector<64x32xf32>
    %57 = arith.addf %53, %56 : vector<64x32xf32>
    %c0_71 = arith.constant 0 : index
    %c0_72 = arith.constant 0 : index
    %58 = vector.load %arg17[%c0_71, %c0_72] : memref<64x32xf32, #tpu.memory_space<vmem>>, vector<64x32xf32>
    tpu.vector_store %arg17[%c0_71, %c0_72], %57 {strides = array<i32>} : memref<64x32xf32, #tpu.memory_space<vmem>>, vector<64x32xf32>,
    %c8 = arith.constant 8 : index
    %c0_73 = arith.constant 0 : index
    %59 = vector.load %arg17[%c8, %c0_73] : memref<64x32xf32, #tpu.memory_space<vmem>>, vector<56x32xf32>
    %c0_74 = arith.constant 0 : index
    %c0_75 = arith.constant 0 : index
    %60 = vector.load %arg16[%c0_74, %c0_75] : memref<64x32xf32, #tpu.memory_space<vmem>>, vector<56x32xf32>
    %c1_76 = arith.constant 1 : index
    %c0_77 = arith.constant 0 : index
    %c0_78 = arith.constant 0 : index
    %61 = vector.load %arg5[%c1_76, %c0_77, %c0_78] : memref<5x32x32xf32, #tpu.memory_space<vmem>>, vector<1x32x32xf32>
    %62 = vector.shape_cast %61 : vector<1x32x32xf32> to vector<32x32xf32>
    %cst_79 = arith.constant dense<0.000000e+00> : vector<56x32xf32>
    %63 = tpu.matmul %60, %62, %cst_79 {dimension_numbers = #tpu.dot_dimension_numbers<[1], [0], [0], [1], [0, 0, 1, 1], [], []>} : vector<56x32xf32>, vector<32x32xf32>, vector<56x32xf32> -> vector<56x32xf32>
    %64 = arith.addf %59, %63 : vector<56x32xf32>
    %c8_80 = arith.constant 8 : index
    %c0_81 = arith.constant 0 : index
    %65 = vector.load %arg17[%c8_80, %c0_81] : memref<64x32xf32, #tpu.memory_space<vmem>>, vector<56x32xf32>
    tpu.vector_store %arg17[%c8_80, %c0_81], %64 {strides = array<i32>} : memref<64x32xf32, #tpu.memory_space<vmem>>, vector<56x32xf32>,
    %c0_82 = arith.constant 0 : index
    %c0_83 = arith.constant 0 : index
    %66 = vector.load %arg17[%c0_82, %c0_83] : memref<64x32xf32, #tpu.memory_space<vmem>>, vector<56x32xf32>
    %c8_84 = arith.constant 8 : index
    %c0_85 = arith.constant 0 : index
    %67 = vector.load %arg16[%c8_84, %c0_85] : memref<64x32xf32, #tpu.memory_space<vmem>>, vector<56x32xf32>
    %c1_86 = arith.constant 1 : index
    %c0_87 = arith.constant 0 : index
    %c0_88 = arith.constant 0 : index
    %68 = vector.load %arg6[%c1_86, %c0_87, %c0_88] : memref<5x32x32xf32, #tpu.memory_space<vmem>>, vector<1x32x32xf32>
    %69 = vector.shape_cast %68 : vector<1x32x32xf32> to vector<32x32xf32>
    %cst_89 = arith.constant dense<0.000000e+00> : vector<56x32xf32>
    %70 = tpu.matmul %67, %69, %cst_89 {dimension_numbers = #tpu.dot_dimension_numbers<[1], [0], [0], [1], [0, 0, 1, 1], [], []>} : vector<56x32xf32>, vector<32x32xf32>, vector<56x32xf32> -> vector<56x32xf32>
    %71 = arith.addf %66, %70 : vector<56x32xf32>
    %c0_90 = arith.constant 0 : index
    %c0_91 = arith.constant 0 : index
    %72 = vector.load %arg17[%c0_90, %c0_91] : memref<64x32xf32, #tpu.memory_space<vmem>>, vector<56x32xf32>
    tpu.vector_store %arg17[%c0_90, %c0_91], %71 {strides = array<i32>} : memref<64x32xf32, #tpu.memory_space<vmem>>, vector<56x32xf32>,
    %c2 = arith.constant 2 : index
    %c0_92 = arith.constant 0 : index
    %73 = vector.load %arg17[%c2, %c0_92] : memref<64x32xf32, #tpu.memory_space<vmem>>, vector<62x32xf32>
    %c0_93 = arith.constant 0 : index
    %c0_94 = arith.constant 0 : index
    %74 = vector.load %arg16[%c0_93, %c0_94] : memref<64x32xf32, #tpu.memory_space<vmem>>, vector<62x32xf32>
    %c1_95 = arith.constant 1 : index
    %c0_96 = arith.constant 0 : index
    %c0_97 = arith.constant 0 : index
    %75 = vector.load %arg7[%c1_95, %c0_96, %c0_97] : memref<5x32x32xf32, #tpu.memory_space<vmem>>, vector<1x32x32xf32>
    %76 = vector.shape_cast %75 : vector<1x32x32xf32> to vector<32x32xf32>
    %cst_98 = arith.constant dense<0.000000e+00> : vector<62x32xf32>
    %77 = tpu.matmul %74, %76, %cst_98 {dimension_numbers = #tpu.dot_dimension_numbers<[1], [0], [0], [1], [0, 0, 1, 1], [], []>} : vector<62x32xf32>, vector<32x32xf32>, vector<62x32xf32> -> vector<62x32xf32>
    %78 = arith.addf %73, %77 : vector<62x32xf32>
    %c2_99 = arith.constant 2 : index
    %c0_100 = arith.constant 0 : index
    %79 = vector.load %arg17[%c2_99, %c0_100] : memref<64x32xf32, #tpu.memory_space<vmem>>, vector<62x32xf32>
    tpu.vector_store %arg17[%c2_99, %c0_100], %78 {strides = array<i32>} : memref<64x32xf32, #tpu.memory_space<vmem>>, vector<62x32xf32>,
    %c0_101 = arith.constant 0 : index
    %c0_102 = arith.constant 0 : index
    %80 = vector.load %arg17[%c0_101, %c0_102] : memref<64x32xf32, #tpu.memory_space<vmem>>, vector<62x32xf32>
    %c2_103 = arith.constant 2 : index
    %c0_104 = arith.constant 0 : index
    %81 = vector.load %arg16[%c2_103, %c0_104] : memref<64x32xf32, #tpu.memory_space<vmem>>, vector<62x32xf32>
    %c1_105 = arith.constant 1 : index
    %c0_106 = arith.constant 0 : index
    %c0_107 = arith.constant 0 : index
    %82 = vector.load %arg8[%c1_105, %c0_106, %c0_107] : memref<5x32x32xf32, #tpu.memory_space<vmem>>, vector<1x32x32xf32>
    %83 = vector.shape_cast %82 : vector<1x32x32xf32> to vector<32x32xf32>
    %cst_108 = arith.constant dense<0.000000e+00> : vector<62x32xf32>
    %84 = tpu.matmul %81, %83, %cst_108 {dimension_numbers = #tpu.dot_dimension_numbers<[1], [0], [0], [1], [0, 0, 1, 1], [], []>} : vector<62x32xf32>, vector<32x32xf32>, vector<62x32xf32> -> vector<62x32xf32>
    %85 = arith.addf %80, %84 : vector<62x32xf32>
    %c0_109 = arith.constant 0 : index
    %c0_110 = arith.constant 0 : index
    %86 = vector.load %arg17[%c0_109, %c0_110] : memref<64x32xf32, #tpu.memory_space<vmem>>, vector<62x32xf32>
    tpu.vector_store %arg17[%c0_109, %c0_110], %85 {strides = array<i32>} : memref<64x32xf32, #tpu.memory_space<vmem>>, vector<62x32xf32>,
    %c0_111 = arith.constant 0 : index
    %c0_112 = arith.constant 0 : index
    %87 = vector.load %arg17[%c0_111, %c0_112] : memref<64x32xf32, #tpu.memory_space<vmem>>, vector<64x32xf32>
    %cst_113 = arith.constant 0.000000e+00 : f32
    %88 = vector.broadcast %cst_113 : f32 to vector<64x32xf32>
    %89 = arith.maximumf %87, %88 : vector<64x32xf32>
    %90 = arith.addf %89, %50 : vector<64x32xf32>
    %c0_114 = arith.constant 0 : index
    %c0_115 = arith.constant 0 : index
    %91 = vector.load %arg16[%c0_114, %c0_115] : memref<64x32xf32, #tpu.memory_space<vmem>>, vector<64x32xf32>
    tpu.vector_store %arg16[%c0_114, %c0_115], %90 {strides = array<i32>} : memref<64x32xf32, #tpu.memory_space<vmem>>, vector<64x32xf32>,
    %c0_116 = arith.constant 0 : index
    %c0_117 = arith.constant 0 : index
    %92 = vector.load %arg16[%c0_116, %c0_117] : memref<64x32xf32, #tpu.memory_space<vmem>>, vector<63x32xf32>
    %c1_118 = arith.constant 1 : index
    %c0_119 = arith.constant 0 : index
    %93 = vector.load %arg16[%c1_118, %c0_119] : memref<64x32xf32, #tpu.memory_space<vmem>>, vector<63x32xf32>
    %94 = arith.maximumf %92, %93 : vector<63x32xf32>
    %c0_120 = arith.constant 0 : index
    %c0_121 = arith.constant 0 : index
    %95 = vector.load %arg12[%c0_120, %c0_121] : memref<32x63xf32, #tpu.memory_space<vmem>>, vector<32x63xf32>
    %cst_122 = arith.constant dense<0.000000e+00> : vector<32x32xf32>
    %96 = tpu.matmul %95, %94, %cst_122 {dimension_numbers = #tpu.dot_dimension_numbers<[1], [0], [0], [1], [0, 0, 1, 1], [], []>} : vector<32x63xf32>, vector<63x32xf32>, vector<32x32xf32> -> vector<32x32xf32>
    %c0_123 = arith.constant 0 : index
    %c0_124 = arith.constant 0 : index
    %97 = vector.load %arg16[%c0_123, %c0_124] : memref<64x32xf32, #tpu.memory_space<vmem>>, vector<32x32xf32>
    tpu.vector_store %arg16[%c0_123, %c0_124], %96 {strides = array<i32>} : memref<64x32xf32, #tpu.memory_space<vmem>>, vector<32x32xf32>,
    %c0_125 = arith.constant 0 : index
    %c0_126 = arith.constant 0 : index
    %98 = vector.load %arg16[%c0_125, %c0_126] : memref<64x32xf32, #tpu.memory_space<vmem>>, vector<32x32xf32>
    %c2_127 = arith.constant 2 : index
    %c0_128 = arith.constant 0 : index
    %c0_129 = arith.constant 0 : index
    %99 = vector.load %arg4[%c2_127, %c0_128, %c0_129] : memref<5x32x32xf32, #tpu.memory_space<vmem>>, vector<1x32x32xf32>
    %100 = vector.shape_cast %99 : vector<1x32x32xf32> to vector<32x32xf32>
    %cst_130 = arith.constant dense<0.000000e+00> : vector<32x32xf32>
    %101 = tpu.matmul %98, %100, %cst_130 {dimension_numbers = #tpu.dot_dimension_numbers<[1], [0], [0], [1], [0, 0, 1, 1], [], []>} : vector<32x32xf32>, vector<32x32xf32>, vector<32x32xf32> -> vector<32x32xf32>
    %c2_131 = arith.constant 2 : index
    %c0_132 = arith.constant 0 : index
    %c0_133 = arith.constant 0 : index
    %102 = vector.load %arg9[%c2_131, %c0_132, %c0_133] : memref<5x1x32xf32, #tpu.memory_space<vmem>>, vector<1x1x32xf32>
    %103 = vector.shape_cast %102 : vector<1x1x32xf32> to vector<1x32xf32>
    %104 = vector.broadcast %103 : vector<1x32xf32> to vector<32x32xf32>
    %105 = arith.addf %101, %104 : vector<32x32xf32>
    %c0_134 = arith.constant 0 : index
    %c0_135 = arith.constant 0 : index
    %106 = vector.load %arg17[%c0_134, %c0_135] : memref<64x32xf32, #tpu.memory_space<vmem>>, vector<32x32xf32>
    tpu.vector_store %arg17[%c0_134, %c0_135], %105 {strides = array<i32>} : memref<64x32xf32, #tpu.memory_space<vmem>>, vector<32x32xf32>,
    %c4 = arith.constant 4 : index
    %c0_136 = arith.constant 0 : index
    %107 = vector.load %arg17[%c4, %c0_136] : memref<64x32xf32, #tpu.memory_space<vmem>>, vector<28x32xf32>
    %c0_137 = arith.constant 0 : index
    %c0_138 = arith.constant 0 : index
    %108 = vector.load %arg16[%c0_137, %c0_138] : memref<64x32xf32, #tpu.memory_space<vmem>>, vector<28x32xf32>
    %c2_139 = arith.constant 2 : index
    %c0_140 = arith.constant 0 : index
    %c0_141 = arith.constant 0 : index
    %109 = vector.load %arg5[%c2_139, %c0_140, %c0_141] : memref<5x32x32xf32, #tpu.memory_space<vmem>>, vector<1x32x32xf32>
    %110 = vector.shape_cast %109 : vector<1x32x32xf32> to vector<32x32xf32>
    %cst_142 = arith.constant dense<0.000000e+00> : vector<28x32xf32>
    %111 = tpu.matmul %108, %110, %cst_142 {dimension_numbers = #tpu.dot_dimension_numbers<[1], [0], [0], [1], [0, 0, 1, 1], [], []>} : vector<28x32xf32>, vector<32x32xf32>, vector<28x32xf32> -> vector<28x32xf32>
    %112 = arith.addf %107, %111 : vector<28x32xf32>
    %c4_143 = arith.constant 4 : index
    %c0_144 = arith.constant 0 : index
    %113 = vector.load %arg17[%c4_143, %c0_144] : memref<64x32xf32, #tpu.memory_space<vmem>>, vector<28x32xf32>
    tpu.vector_store %arg17[%c4_143, %c0_144], %112 {strides = array<i32>} : memref<64x32xf32, #tpu.memory_space<vmem>>, vector<28x32xf32>,
    %c0_145 = arith.constant 0 : index
    %c0_146 = arith.constant 0 : index
    %114 = vector.load %arg17[%c0_145, %c0_146] : memref<64x32xf32, #tpu.memory_space<vmem>>, vector<28x32xf32>
    %c4_147 = arith.constant 4 : index
    %c0_148 = arith.constant 0 : index
    %115 = vector.load %arg16[%c4_147, %c0_148] : memref<64x32xf32, #tpu.memory_space<vmem>>, vector<28x32xf32>
    %c2_149 = arith.constant 2 : index
    %c0_150 = arith.constant 0 : index
    %c0_151 = arith.constant 0 : index
    %116 = vector.load %arg6[%c2_149, %c0_150, %c0_151] : memref<5x32x32xf32, #tpu.memory_space<vmem>>, vector<1x32x32xf32>
    %117 = vector.shape_cast %116 : vector<1x32x32xf32> to vector<32x32xf32>
    %cst_152 = arith.constant dense<0.000000e+00> : vector<28x32xf32>
    %118 = tpu.matmul %115, %117, %cst_152 {dimension_numbers = #tpu.dot_dimension_numbers<[1], [0], [0], [1], [0, 0, 1, 1], [], []>} : vector<28x32xf32>, vector<32x32xf32>, vector<28x32xf32> -> vector<28x32xf32>
    %119 = arith.addf %114, %118 : vector<28x32xf32>
    %c0_153 = arith.constant 0 : index
    %c0_154 = arith.constant 0 : index
    %120 = vector.load %arg17[%c0_153, %c0_154] : memref<64x32xf32, #tpu.memory_space<vmem>>, vector<28x32xf32>
    tpu.vector_store %arg17[%c0_153, %c0_154], %119 {strides = array<i32>} : memref<64x32xf32, #tpu.memory_space<vmem>>, vector<28x32xf32>,
    %c4_155 = arith.constant 4 : index
    %c0_156 = arith.constant 0 : index
    %121 = vector.load %arg17[%c4_155, %c0_156] : memref<64x32xf32, #tpu.memory_space<vmem>>, vector<28x32xf32>
    %c0_157 = arith.constant 0 : index
    %c0_158 = arith.constant 0 : index
    %122 = vector.load %arg16[%c0_157, %c0_158] : memref<64x32xf32, #tpu.memory_space<vmem>>, vector<28x32xf32>
    %c2_159 = arith.constant 2 : index
    %c0_160 = arith.constant 0 : index
    %c0_161 = arith.constant 0 : index
    %123 = vector.load %arg7[%c2_159, %c0_160, %c0_161] : memref<5x32x32xf32, #tpu.memory_space<vmem>>, vector<1x32x32xf32>
    %124 = vector.shape_cast %123 : vector<1x32x32xf32> to vector<32x32xf32>
    %cst_162 = arith.constant dense<0.000000e+00> : vector<28x32xf32>
    %125 = tpu.matmul %122, %124, %cst_162 {dimension_numbers = #tpu.dot_dimension_numbers<[1], [0], [0], [1], [0, 0, 1, 1], [], []>} : vector<28x32xf32>, vector<32x32xf32>, vector<28x32xf32> -> vector<28x32xf32>
    %126 = arith.addf %121, %125 : vector<28x32xf32>
    %c4_163 = arith.constant 4 : index
    %c0_164 = arith.constant 0 : index
    %127 = vector.load %arg17[%c4_163, %c0_164] : memref<64x32xf32, #tpu.memory_space<vmem>>, vector<28x32xf32>
    tpu.vector_store %arg17[%c4_163, %c0_164], %126 {strides = array<i32>} : memref<64x32xf32, #tpu.memory_space<vmem>>, vector<28x32xf32>,
    %c0_165 = arith.constant 0 : index
    %c0_166 = arith.constant 0 : index
    %128 = vector.load %arg17[%c0_165, %c0_166] : memref<64x32xf32, #tpu.memory_space<vmem>>, vector<28x32xf32>
    %c4_167 = arith.constant 4 : index
    %c0_168 = arith.constant 0 : index
    %129 = vector.load %arg16[%c4_167, %c0_168] : memref<64x32xf32, #tpu.memory_space<vmem>>, vector<28x32xf32>
    %c2_169 = arith.constant 2 : index
    %c0_170 = arith.constant 0 : index
    %c0_171 = arith.constant 0 : index
    %130 = vector.load %arg8[%c2_169, %c0_170, %c0_171] : memref<5x32x32xf32, #tpu.memory_space<vmem>>, vector<1x32x32xf32>
    %131 = vector.shape_cast %130 : vector<1x32x32xf32> to vector<32x32xf32>
    %cst_172 = arith.constant dense<0.000000e+00> : vector<28x32xf32>
    %132 = tpu.matmul %129, %131, %cst_172 {dimension_numbers = #tpu.dot_dimension_numbers<[1], [0], [0], [1], [0, 0, 1, 1], [], []>} : vector<28x32xf32>, vector<32x32xf32>, vector<28x32xf32> -> vector<28x32xf32>
    %133 = arith.addf %128, %132 : vector<28x32xf32>
    %c0_173 = arith.constant 0 : index
    %c0_174 = arith.constant 0 : index
    %134 = vector.load %arg17[%c0_173, %c0_174] : memref<64x32xf32, #tpu.memory_space<vmem>>, vector<28x32xf32>
    tpu.vector_store %arg17[%c0_173, %c0_174], %133 {strides = array<i32>} : memref<64x32xf32, #tpu.memory_space<vmem>>, vector<28x32xf32>,
    %c0_175 = arith.constant 0 : index
    %c0_176 = arith.constant 0 : index
    %135 = vector.load %arg17[%c0_175, %c0_176] : memref<64x32xf32, #tpu.memory_space<vmem>>, vector<32x32xf32>
    %cst_177 = arith.constant 0.000000e+00 : f32
    %136 = vector.broadcast %cst_177 : f32 to vector<32x32xf32>
    %137 = arith.maximumf %135, %136 : vector<32x32xf32>
    %138 = arith.addf %137, %98 : vector<32x32xf32>
    %c0_178 = arith.constant 0 : index
    %c0_179 = arith.constant 0 : index
    %139 = vector.load %arg16[%c0_178, %c0_179] : memref<64x32xf32, #tpu.memory_space<vmem>>, vector<32x32xf32>
    tpu.vector_store %arg16[%c0_178, %c0_179], %138 {strides = array<i32>} : memref<64x32xf32, #tpu.memory_space<vmem>>, vector<32x32xf32>,
    %c0_180 = arith.constant 0 : index
    %c0_181 = arith.constant 0 : index
    %140 = vector.load %arg16[%c0_180, %c0_181] : memref<64x32xf32, #tpu.memory_space<vmem>>, vector<31x32xf32>
    %c1_182 = arith.constant 1 : index
    %c0_183 = arith.constant 0 : index
    %141 = vector.load %arg16[%c1_182, %c0_183] : memref<64x32xf32, #tpu.memory_space<vmem>>, vector<31x32xf32>
    %142 = arith.maximumf %140, %141 : vector<31x32xf32>
    %c0_184 = arith.constant 0 : index
    %c0_185 = arith.constant 0 : index
    %143 = vector.load %arg13[%c0_184, %c0_185] : memref<16x31xf32, #tpu.memory_space<vmem>>, vector<16x31xf32>
    %cst_186 = arith.constant dense<0.000000e+00> : vector<16x32xf32>
    %144 = tpu.matmul %143, %142, %cst_186 {dimension_numbers = #tpu.dot_dimension_numbers<[1], [0], [0], [1], [0, 0, 1, 1], [], []>} : vector<16x31xf32>, vector<31x32xf32>, vector<16x32xf32> -> vector<16x32xf32>
    %c0_187 = arith.constant 0 : index
    %c0_188 = arith.constant 0 : index
    %145 = vector.load %arg16[%c0_187, %c0_188] : memref<64x32xf32, #tpu.memory_space<vmem>>, vector<16x32xf32>
    tpu.vector_store %arg16[%c0_187, %c0_188], %144 {strides = array<i32>} : memref<64x32xf32, #tpu.memory_space<vmem>>, vector<16x32xf32>,
    %c0_189 = arith.constant 0 : index
    %c0_190 = arith.constant 0 : index
    %146 = vector.load %arg16[%c0_189, %c0_190] : memref<64x32xf32, #tpu.memory_space<vmem>>, vector<16x32xf32>
    %c3 = arith.constant 3 : index
    %c0_191 = arith.constant 0 : index
    %c0_192 = arith.constant 0 : index
    %147 = vector.load %arg4[%c3, %c0_191, %c0_192] : memref<5x32x32xf32, #tpu.memory_space<vmem>>, vector<1x32x32xf32>
    %148 = vector.shape_cast %147 : vector<1x32x32xf32> to vector<32x32xf32>
    %cst_193 = arith.constant dense<0.000000e+00> : vector<16x32xf32>
    %149 = tpu.matmul %146, %148, %cst_193 {dimension_numbers = #tpu.dot_dimension_numbers<[1], [0], [0], [1], [0, 0, 1, 1], [], []>} : vector<16x32xf32>, vector<32x32xf32>, vector<16x32xf32> -> vector<16x32xf32>
    %c3_194 = arith.constant 3 : index
    %c0_195 = arith.constant 0 : index
    %c0_196 = arith.constant 0 : index
    %150 = vector.load %arg9[%c3_194, %c0_195, %c0_196] : memref<5x1x32xf32, #tpu.memory_space<vmem>>, vector<1x1x32xf32>
    %151 = vector.shape_cast %150 : vector<1x1x32xf32> to vector<1x32xf32>
    %152 = vector.broadcast %151 : vector<1x32xf32> to vector<16x32xf32>
    %153 = arith.addf %149, %152 : vector<16x32xf32>
    %c0_197 = arith.constant 0 : index
    %c0_198 = arith.constant 0 : index
    %154 = vector.load %arg17[%c0_197, %c0_198] : memref<64x32xf32, #tpu.memory_space<vmem>>, vector<16x32xf32>
    tpu.vector_store %arg17[%c0_197, %c0_198], %153 {strides = array<i32>} : memref<64x32xf32, #tpu.memory_space<vmem>>, vector<16x32xf32>,
    %c2_199 = arith.constant 2 : index
    %c0_200 = arith.constant 0 : index
    %155 = vector.load %arg17[%c2_199, %c0_200] : memref<64x32xf32, #tpu.memory_space<vmem>>, vector<14x32xf32>
    %c0_201 = arith.constant 0 : index
    %c0_202 = arith.constant 0 : index
    %156 = vector.load %arg16[%c0_201, %c0_202] : memref<64x32xf32, #tpu.memory_space<vmem>>, vector<14x32xf32>
    %c3_203 = arith.constant 3 : index
    %c0_204 = arith.constant 0 : index
    %c0_205 = arith.constant 0 : index
    %157 = vector.load %arg5[%c3_203, %c0_204, %c0_205] : memref<5x32x32xf32, #tpu.memory_space<vmem>>, vector<1x32x32xf32>
    %158 = vector.shape_cast %157 : vector<1x32x32xf32> to vector<32x32xf32>
    %cst_206 = arith.constant dense<0.000000e+00> : vector<14x32xf32>
    %159 = tpu.matmul %156, %158, %cst_206 {dimension_numbers = #tpu.dot_dimension_numbers<[1], [0], [0], [1], [0, 0, 1, 1], [], []>} : vector<14x32xf32>, vector<32x32xf32>, vector<14x32xf32> -> vector<14x32xf32>
    %160 = arith.addf %155, %159 : vector<14x32xf32>
    %c2_207 = arith.constant 2 : index
    %c0_208 = arith.constant 0 : index
    %161 = vector.load %arg17[%c2_207, %c0_208] : memref<64x32xf32, #tpu.memory_space<vmem>>, vector<14x32xf32>
    tpu.vector_store %arg17[%c2_207, %c0_208], %160 {strides = array<i32>} : memref<64x32xf32, #tpu.memory_space<vmem>>, vector<14x32xf32>,
    %c0_209 = arith.constant 0 : index
    %c0_210 = arith.constant 0 : index
    %162 = vector.load %arg17[%c0_209, %c0_210] : memref<64x32xf32, #tpu.memory_space<vmem>>, vector<14x32xf32>
    %c2_211 = arith.constant 2 : index
    %c0_212 = arith.constant 0 : index
    %163 = vector.load %arg16[%c2_211, %c0_212] : memref<64x32xf32, #tpu.memory_space<vmem>>, vector<14x32xf32>
    %c3_213 = arith.constant 3 : index
    %c0_214 = arith.constant 0 : index
    %c0_215 = arith.constant 0 : index
    %164 = vector.load %arg6[%c3_213, %c0_214, %c0_215] : memref<5x32x32xf32, #tpu.memory_space<vmem>>, vector<1x32x32xf32>
    %165 = vector.shape_cast %164 : vector<1x32x32xf32> to vector<32x32xf32>
    %cst_216 = arith.constant dense<0.000000e+00> : vector<14x32xf32>
    %166 = tpu.matmul %163, %165, %cst_216 {dimension_numbers = #tpu.dot_dimension_numbers<[1], [0], [0], [1], [0, 0, 1, 1], [], []>} : vector<14x32xf32>, vector<32x32xf32>, vector<14x32xf32> -> vector<14x32xf32>
    %167 = arith.addf %162, %166 : vector<14x32xf32>
    %c0_217 = arith.constant 0 : index
    %c0_218 = arith.constant 0 : index
    %168 = vector.load %arg17[%c0_217, %c0_218] : memref<64x32xf32, #tpu.memory_space<vmem>>, vector<14x32xf32>
    tpu.vector_store %arg17[%c0_217, %c0_218], %167 {strides = array<i32>} : memref<64x32xf32, #tpu.memory_space<vmem>>, vector<14x32xf32>,
    %c8_219 = arith.constant 8 : index
    %c0_220 = arith.constant 0 : index
    %169 = vector.load %arg17[%c8_219, %c0_220] : memref<64x32xf32, #tpu.memory_space<vmem>>, vector<8x32xf32>
    %c0_221 = arith.constant 0 : index
    %c0_222 = arith.constant 0 : index
    %170 = vector.load %arg16[%c0_221, %c0_222] : memref<64x32xf32, #tpu.memory_space<vmem>>, vector<8x32xf32>
    %c3_223 = arith.constant 3 : index
    %c0_224 = arith.constant 0 : index
    %c0_225 = arith.constant 0 : index
    %171 = vector.load %arg7[%c3_223, %c0_224, %c0_225] : memref<5x32x32xf32, #tpu.memory_space<vmem>>, vector<1x32x32xf32>
    %172 = vector.shape_cast %171 : vector<1x32x32xf32> to vector<32x32xf32>
    %cst_226 = arith.constant dense<0.000000e+00> : vector<8x32xf32>
    %173 = tpu.matmul %170, %172, %cst_226 {dimension_numbers = #tpu.dot_dimension_numbers<[1], [0], [0], [1], [0, 0, 1, 1], [], []>} : vector<8x32xf32>, vector<32x32xf32>, vector<8x32xf32> -> vector<8x32xf32>
    %174 = arith.addf %169, %173 : vector<8x32xf32>
    %c8_227 = arith.constant 8 : index
    %c0_228 = arith.constant 0 : index
    %175 = vector.load %arg17[%c8_227, %c0_228] : memref<64x32xf32, #tpu.memory_space<vmem>>, vector<8x32xf32>
    tpu.vector_store %arg17[%c8_227, %c0_228], %174 {strides = array<i32>} : memref<64x32xf32, #tpu.memory_space<vmem>>, vector<8x32xf32>,
    %c0_229 = arith.constant 0 : index
    %c0_230 = arith.constant 0 : index
    %176 = vector.load %arg17[%c0_229, %c0_230] : memref<64x32xf32, #tpu.memory_space<vmem>>, vector<8x32xf32>
    %c8_231 = arith.constant 8 : index
    %c0_232 = arith.constant 0 : index
    %177 = vector.load %arg16[%c8_231, %c0_232] : memref<64x32xf32, #tpu.memory_space<vmem>>, vector<8x32xf32>
    %c3_233 = arith.constant 3 : index
    %c0_234 = arith.constant 0 : index
    %c0_235 = arith.constant 0 : index
    %178 = vector.load %arg8[%c3_233, %c0_234, %c0_235] : memref<5x32x32xf32, #tpu.memory_space<vmem>>, vector<1x32x32xf32>
    %179 = vector.shape_cast %178 : vector<1x32x32xf32> to vector<32x32xf32>
    %cst_236 = arith.constant dense<0.000000e+00> : vector<8x32xf32>
    %180 = tpu.matmul %177, %179, %cst_236 {dimension_numbers = #tpu.dot_dimension_numbers<[1], [0], [0], [1], [0, 0, 1, 1], [], []>} : vector<8x32xf32>, vector<32x32xf32>, vector<8x32xf32> -> vector<8x32xf32>
    %181 = arith.addf %176, %180 : vector<8x32xf32>
    %c0_237 = arith.constant 0 : index
    %c0_238 = arith.constant 0 : index
    %182 = vector.load %arg17[%c0_237, %c0_238] : memref<64x32xf32, #tpu.memory_space<vmem>>, vector<8x32xf32>
    tpu.vector_store %arg17[%c0_237, %c0_238], %181 {strides = array<i32>} : memref<64x32xf32, #tpu.memory_space<vmem>>, vector<8x32xf32>,
    %c0_239 = arith.constant 0 : index
    %c0_240 = arith.constant 0 : index
    %183 = vector.load %arg17[%c0_239, %c0_240] : memref<64x32xf32, #tpu.memory_space<vmem>>, vector<16x32xf32>
    %cst_241 = arith.constant 0.000000e+00 : f32
    %184 = vector.broadcast %cst_241 : f32 to vector<16x32xf32>
    %185 = arith.maximumf %183, %184 : vector<16x32xf32>
    %186 = arith.addf %185, %146 : vector<16x32xf32>
    %c0_242 = arith.constant 0 : index
    %c0_243 = arith.constant 0 : index
    %187 = vector.load %arg16[%c0_242, %c0_243] : memref<64x32xf32, #tpu.memory_space<vmem>>, vector<16x32xf32>
    tpu.vector_store %arg16[%c0_242, %c0_243], %186 {strides = array<i32>} : memref<64x32xf32, #tpu.memory_space<vmem>>, vector<16x32xf32>,
    %c0_244 = arith.constant 0 : index
    %c0_245 = arith.constant 0 : index
    %188 = vector.load %arg16[%c0_244, %c0_245] : memref<64x32xf32, #tpu.memory_space<vmem>>, vector<16x32xf32>
    %c4_246 = arith.constant 4 : index
    %c0_247 = arith.constant 0 : index
    %c0_248 = arith.constant 0 : index
    %189 = vector.load %arg4[%c4_246, %c0_247, %c0_248] : memref<5x32x32xf32, #tpu.memory_space<vmem>>, vector<1x32x32xf32>
    %190 = vector.shape_cast %189 : vector<1x32x32xf32> to vector<32x32xf32>
    %cst_249 = arith.constant dense<0.000000e+00> : vector<16x32xf32>
    %191 = tpu.matmul %188, %190, %cst_249 {dimension_numbers = #tpu.dot_dimension_numbers<[1], [0], [0], [1], [0, 0, 1, 1], [], []>} : vector<16x32xf32>, vector<32x32xf32>, vector<16x32xf32> -> vector<16x32xf32>
    %c4_250 = arith.constant 4 : index
    %c0_251 = arith.constant 0 : index
    %c0_252 = arith.constant 0 : index
    %192 = vector.load %arg9[%c4_250, %c0_251, %c0_252] : memref<5x1x32xf32, #tpu.memory_space<vmem>>, vector<1x1x32xf32>
    %193 = vector.shape_cast %192 : vector<1x1x32xf32> to vector<1x32xf32>
    %194 = vector.broadcast %193 : vector<1x32xf32> to vector<16x32xf32>
    %195 = arith.addf %191, %194 : vector<16x32xf32>
    %c0_253 = arith.constant 0 : index
    %c0_254 = arith.constant 0 : index
    %196 = vector.load %arg17[%c0_253, %c0_254] : memref<64x32xf32, #tpu.memory_space<vmem>>, vector<16x32xf32>
    tpu.vector_store %arg17[%c0_253, %c0_254], %195 {strides = array<i32>} : memref<64x32xf32, #tpu.memory_space<vmem>>, vector<16x32xf32>,
    %c1_255 = arith.constant 1 : index
    %c0_256 = arith.constant 0 : index
    %197 = vector.load %arg17[%c1_255, %c0_256] : memref<64x32xf32, #tpu.memory_space<vmem>>, vector<15x32xf32>
    %c0_257 = arith.constant 0 : index
    %c0_258 = arith.constant 0 : index
    %198 = vector.load %arg16[%c0_257, %c0_258] : memref<64x32xf32, #tpu.memory_space<vmem>>, vector<15x32xf32>
    %c4_259 = arith.constant 4 : index
    %c0_260 = arith.constant 0 : index
    %c0_261 = arith.constant 0 : index
    %199 = vector.load %arg5[%c4_259, %c0_260, %c0_261] : memref<5x32x32xf32, #tpu.memory_space<vmem>>, vector<1x32x32xf32>
    %200 = vector.shape_cast %199 : vector<1x32x32xf32> to vector<32x32xf32>
    %cst_262 = arith.constant dense<0.000000e+00> : vector<15x32xf32>
    %201 = tpu.matmul %198, %200, %cst_262 {dimension_numbers = #tpu.dot_dimension_numbers<[1], [0], [0], [1], [0, 0, 1, 1], [], []>} : vector<15x32xf32>, vector<32x32xf32>, vector<15x32xf32> -> vector<15x32xf32>
    %202 = arith.addf %197, %201 : vector<15x32xf32>
    %c1_263 = arith.constant 1 : index
    %c0_264 = arith.constant 0 : index
    %203 = vector.load %arg17[%c1_263, %c0_264] : memref<64x32xf32, #tpu.memory_space<vmem>>, vector<15x32xf32>
    tpu.vector_store %arg17[%c1_263, %c0_264], %202 {strides = array<i32>} : memref<64x32xf32, #tpu.memory_space<vmem>>, vector<15x32xf32>,
    %c0_265 = arith.constant 0 : index
    %c0_266 = arith.constant 0 : index
    %204 = vector.load %arg17[%c0_265, %c0_266] : memref<64x32xf32, #tpu.memory_space<vmem>>, vector<15x32xf32>
    %c1_267 = arith.constant 1 : index
    %c0_268 = arith.constant 0 : index
    %205 = vector.load %arg16[%c1_267, %c0_268] : memref<64x32xf32, #tpu.memory_space<vmem>>, vector<15x32xf32>
    %c4_269 = arith.constant 4 : index
    %c0_270 = arith.constant 0 : index
    %c0_271 = arith.constant 0 : index
    %206 = vector.load %arg6[%c4_269, %c0_270, %c0_271] : memref<5x32x32xf32, #tpu.memory_space<vmem>>, vector<1x32x32xf32>
    %207 = vector.shape_cast %206 : vector<1x32x32xf32> to vector<32x32xf32>
    %cst_272 = arith.constant dense<0.000000e+00> : vector<15x32xf32>
    %208 = tpu.matmul %205, %207, %cst_272 {dimension_numbers = #tpu.dot_dimension_numbers<[1], [0], [0], [1], [0, 0, 1, 1], [], []>} : vector<15x32xf32>, vector<32x32xf32>, vector<15x32xf32> -> vector<15x32xf32>
    %209 = arith.addf %204, %208 : vector<15x32xf32>
    %c0_273 = arith.constant 0 : index
    %c0_274 = arith.constant 0 : index
    %210 = vector.load %arg17[%c0_273, %c0_274] : memref<64x32xf32, #tpu.memory_space<vmem>>, vector<15x32xf32>
    tpu.vector_store %arg17[%c0_273, %c0_274], %209 {strides = array<i32>} : memref<64x32xf32, #tpu.memory_space<vmem>>, vector<15x32xf32>,
    %c0_275 = arith.constant 0 : index
    %c0_276 = arith.constant 0 : index
    %211 = vector.load %arg17[%c0_275, %c0_276] : memref<64x32xf32, #tpu.memory_space<vmem>>, vector<16x32xf32>
    %cst_277 = arith.constant 0.000000e+00 : f32
    %212 = vector.broadcast %cst_277 : f32 to vector<16x32xf32>
    %213 = arith.maximumf %211, %212 : vector<16x32xf32>
    %214 = arith.addf %213, %188 : vector<16x32xf32>
    %c0_278 = arith.constant 0 : index
    %c0_279 = arith.constant 0 : index
    %215 = vector.load %arg16[%c0_278, %c0_279] : memref<64x32xf32, #tpu.memory_space<vmem>>, vector<16x32xf32>
    tpu.vector_store %arg16[%c0_278, %c0_279], %214 {strides = array<i32>} : memref<64x32xf32, #tpu.memory_space<vmem>>, vector<16x32xf32>,
    %c0_280 = arith.constant 0 : index
    %c0_281 = arith.constant 0 : index
    %216 = vector.load %arg16[%c0_280, %c0_281] : memref<64x32xf32, #tpu.memory_space<vmem>>, vector<15x32xf32>
    %c1_282 = arith.constant 1 : index
    %c0_283 = arith.constant 0 : index
    %217 = vector.load %arg16[%c1_282, %c0_283] : memref<64x32xf32, #tpu.memory_space<vmem>>, vector<15x32xf32>
    %218 = arith.maximumf %216, %217 : vector<15x32xf32>
    %c0_284 = arith.constant 0 : index
    %c0_285 = arith.constant 0 : index
    %219 = vector.load %arg14[%c0_284, %c0_285] : memref<8x15xf32, #tpu.memory_space<vmem>>, vector<8x15xf32>
    %cst_286 = arith.constant dense<0.000000e+00> : vector<8x32xf32>
    %220 = tpu.matmul %219, %218, %cst_286 {dimension_numbers = #tpu.dot_dimension_numbers<[1], [0], [0], [1], [0, 0, 1, 1], [], []>} : vector<8x15xf32>, vector<15x32xf32>, vector<8x32xf32> -> vector<8x32xf32>
    %c0_287 = arith.constant 0 : index
    %c0_288 = arith.constant 0 : index
    %221 = vector.load %arg16[%c0_287, %c0_288] : memref<64x32xf32, #tpu.memory_space<vmem>>, vector<8x32xf32>
    tpu.vector_store %arg16[%c0_287, %c0_288], %220 {strides = array<i32>} : memref<64x32xf32, #tpu.memory_space<vmem>>, vector<8x32xf32>,
    %c0_289 = arith.constant 0 : index
    %c0_290 = arith.constant 0 : index
    %222 = vector.load %arg10[%c0_289, %c0_290] : memref<8x32xf32, #tpu.memory_space<vmem>>, vector<8x32xf32>
    %c0_291 = arith.constant 0 : index
    %c0_292 = arith.constant 0 : index
    %223 = vector.load %arg16[%c0_291, %c0_292] : memref<64x32xf32, #tpu.memory_space<vmem>>, vector<8x32xf32>
    %cst_293 = arith.constant dense<0.000000e+00> : vector<8x8xf32>
    %224 = tpu.matmul %222, %223, %cst_293 {dimension_numbers = #tpu.dot_dimension_numbers<[1], [1], [0], [0], [0, 0, 1, 0], [], []>} : vector<8x32xf32>, vector<8x32xf32>, vector<8x8xf32> -> vector<8x8xf32>
    %c0_294 = arith.constant 0 : index
    %c0_295 = arith.constant 0 : index
    %225 = vector.load %arg11[%c0_294, %c0_295] : memref<8x1xf32, #tpu.memory_space<vmem>>, vector<8x1xf32>
    %226 = vector.broadcast %225 : vector<8x1xf32> to vector<8x8xf32>
    %227 = arith.addf %224, %226 : vector<8x8xf32>
    %c0_296 = arith.constant 0 : index
    %c0_297 = arith.constant 0 : index
    %c0_298 = arith.constant 0 : index
    %228 = vector.load %arg15[%c0_296, %c0_297, %c0_298] : memref<1x8x8xf32, #tpu.memory_space<vmem>>, vector<1x8x8xf32>
    %229 = vector.shape_cast %228 : vector<1x8x8xf32> to vector<8x8xf32>
    %230 = vector.shape_cast %227 : vector<8x8xf32> to vector<1x8x8xf32>
    tpu.vector_store %arg15[%c0_296, %c0_297, %c0_298], %230 {strides = array<i32>} : memref<1x8x8xf32, #tpu.memory_space<vmem>>, vector<1x8x8xf32>,
    return
  }
  func.func @transform_0(%arg0: i32) -> (i32, i32, i32) {
    %c0_i32 = arith.constant 0 : i32
    %c0_i32_0 = arith.constant 0 : i32
    %c0_i32_1 = arith.constant 0 : i32
    return %arg0, %c0_i32, %c0_i32_0 : i32, i32, i32
  }
  func.func @transform_1(%arg0: i32) -> (i32, i32) {
    %c0_i32 = arith.constant 0 : i32
    %c0_i32_0 = arith.constant 0 : i32
    %c0_i32_1 = arith.constant 0 : i32
    return %c0_i32, %c0_i32_0 : i32, i32
  }
  func.func @transform_2(%arg0: i32) -> (i32, i32) {
    %c0_i32 = arith.constant 0 : i32
    %c0_i32_0 = arith.constant 0 : i32
    %c0_i32_1 = arith.constant 0 : i32
    return %c0_i32, %c0_i32_0 : i32, i32
  }
  func.func @transform_3(%arg0: i32) -> (i32, i32, i32) {
    %c0_i32 = arith.constant 0 : i32
    %c0_i32_0 = arith.constant 0 : i32
    %c0_i32_1 = arith.constant 0 : i32
    %c0_i32_2 = arith.constant 0 : i32
    return %c0_i32, %c0_i32_0, %c0_i32_1 : i32, i32, i32
  }
  func.func @transform_4(%arg0: i32) -> (i32, i32, i32) {
    %c0_i32 = arith.constant 0 : i32
    %c0_i32_0 = arith.constant 0 : i32
    %c0_i32_1 = arith.constant 0 : i32
    %c0_i32_2 = arith.constant 0 : i32
    return %c0_i32, %c0_i32_0, %c0_i32_1 : i32, i32, i32
  }
  func.func @transform_5(%arg0: i32) -> (i32, i32, i32) {
    %c0_i32 = arith.constant 0 : i32
    %c0_i32_0 = arith.constant 0 : i32
    %c0_i32_1 = arith.constant 0 : i32
    %c0_i32_2 = arith.constant 0 : i32
    return %c0_i32, %c0_i32_0, %c0_i32_1 : i32, i32, i32
  }
  func.func @transform_6(%arg0: i32) -> (i32, i32, i32) {
    %c0_i32 = arith.constant 0 : i32
    %c0_i32_0 = arith.constant 0 : i32
    %c0_i32_1 = arith.constant 0 : i32
    %c0_i32_2 = arith.constant 0 : i32
    return %c0_i32, %c0_i32_0, %c0_i32_1 : i32, i32, i32
  }
  func.func @transform_7(%arg0: i32) -> (i32, i32, i32) {
    %c0_i32 = arith.constant 0 : i32
    %c0_i32_0 = arith.constant 0 : i32
    %c0_i32_1 = arith.constant 0 : i32
    %c0_i32_2 = arith.constant 0 : i32
    return %c0_i32, %c0_i32_0, %c0_i32_1 : i32, i32, i32
  }
  func.func @transform_8(%arg0: i32) -> (i32, i32, i32) {
    %c0_i32 = arith.constant 0 : i32
    %c0_i32_0 = arith.constant 0 : i32
    %c0_i32_1 = arith.constant 0 : i32
    %c0_i32_2 = arith.constant 0 : i32
    return %c0_i32, %c0_i32_0, %c0_i32_1 : i32, i32, i32
  }
  func.func @transform_9(%arg0: i32) -> (i32, i32) {
    %c0_i32 = arith.constant 0 : i32
    %c0_i32_0 = arith.constant 0 : i32
    %c0_i32_1 = arith.constant 0 : i32
    return %c0_i32, %c0_i32_0 : i32, i32
  }
  func.func @transform_10(%arg0: i32) -> (i32, i32) {
    %c0_i32 = arith.constant 0 : i32
    %c0_i32_0 = arith.constant 0 : i32
    %c0_i32_1 = arith.constant 0 : i32
    return %c0_i32, %c0_i32_0 : i32, i32
  }
  func.func @transform_11(%arg0: i32) -> (i32, i32) {
    %c0_i32 = arith.constant 0 : i32
    %c0_i32_0 = arith.constant 0 : i32
    %c0_i32_1 = arith.constant 0 : i32
    return %c0_i32, %c0_i32_0 : i32, i32
  }
  func.func @transform_12(%arg0: i32) -> (i32, i32) {
    %c0_i32 = arith.constant 0 : i32
    %c0_i32_0 = arith.constant 0 : i32
    %c0_i32_1 = arith.constant 0 : i32
    return %c0_i32, %c0_i32_0 : i32, i32
  }
  func.func @transform_13(%arg0: i32) -> (i32, i32) {
    %c0_i32 = arith.constant 0 : i32
    %c0_i32_0 = arith.constant 0 : i32
    %c0_i32_1 = arith.constant 0 : i32
    return %c0_i32, %c0_i32_0 : i32, i32
  }
  func.func @transform_14(%arg0: i32) -> (i32, i32, i32) {
    %c0_i32 = arith.constant 0 : i32
    %c0_i32_0 = arith.constant 0 : i32
    %c0_i32_1 = arith.constant 0 : i32
    return %arg0, %c0_i32, %c0_i32_0 : i32, i32, i32
  }
}

</mosaic_0001>

<bundles_post_ra>
// kernel: tpu_custom_call.1
= control target key start
LH: loop header
LB: loop body
LE: loop exit
PB: predicated region body
PF: predicated region fallthrough
CT: control target
= control target key end

     0   :  { %s6850_s0 = inlined_call_operand.hbm [shape: f32[2,16,64], index: 0, kind: input, shape index: {}]   ;;  %s6851_s1 = inlined_call_operand.hbm [shape: f32[16,32], index: 1, kind: input, shape index: {}]   ;;  %s6852_s2 = inlined_call_operand.vmem [shape: f32[1,32], index: 2, kind: input, shape index: {}]   ;;  %s6853_s3 = inlined_call_operand.hbm [shape: f32[5,32,32], index: 3, kind: input, shape index: {}]   ;;  %s6854_s4 = inlined_call_operand.hbm [shape: f32[5,32,32], index: 4, kind: input, shape index: {}]   ;;  %s6855_s5 = inlined_call_operand.hbm [shape: f32[5,32,32], index: 5, kind: input, shape index: {}]   ;;  %s6856_s6 = inlined_call_operand.hbm [shape: f32[5,32,32], index: 6, kind: input, shape index: {}]   ;;  %s6857_s7 = inlined_call_operand.hbm [shape: f32[5,32,32], index: 7, kind: input, shape index: {}]   ;;  %s6858_s8 = inlined_call_operand.hbm [shape: f32[5,1,32], index: 8, kind: input, shape index: {}]   ;;  %s6859_s9 = inlined_call_operand.hbm [shape: f32[8,32], index: 9, kind: input, shape index: {}]   ;;  %s6860_s10 = inlined_call_operand.vmem [shape: f32[8,1], index: 10, kind: input, shape index: {}]   ;;  %s6861_s11 = inlined_call_operand.vmem [shape: f32[32,63], index: 11, kind: input, shape index: {}]   ;;  %s6862_s12 = inlined_call_operand.vmem [shape: f32[16,31], index: 12, kind: input, shape index: {}]   ;;  %s6863_s13 = inlined_call_operand.vmem [shape: f32[8,15], index: 13, kind: input, shape index: {}]   ;;  %s6864_s14 = inlined_call_operand.hbm [shape: f32[2,8,8], index: 14, kind: output, shape index: {}]  }
   0x1   :  { %6875 = sst [smem:[#allocation26_spill]] %s6851_s1 }
   0x2   :  { %6876 = sst [smem:[#allocation27_spill]] %s6852_s2 }
   0x3   :  { %6877 = sst [smem:[#allocation28_spill]] %s6853_s3 }
   0x4   :  { %6878 = sst [smem:[#allocation29_spill]] %s6860_s10 }
   0x5   :  { %6879 = sst [smem:[#allocation30_spill]] %s6861_s11 }
   0x6   :  { %6880 = sst [smem:[#allocation31_spill]] %s6862_s12 }
   0x7   :  { %6881 = sst [smem:[#allocation32_spill]] %s6863_s13 }
   0x8   :  { %6882 = sst [smem:[#allocation33_spill]] %s6864_s14 }
   0x9   :  { %19 = vsyncpa [#allocation5], 0 }
   0xa   :  { %21 = vsyncpa [#allocation5 + $0x1], 0 }
   0xb   :  { %22 = vsyncpa [#allocation8], 0 }
   0xc   :  { %23 = vsyncpa [#allocation11], 0 }
   0xd   :  { %24 = vsyncpa [#allocation14], 0 }
   0xe   :  { %25 = vsyncpa [#allocation17], 0 }
   0xf   :  { %26 = vsyncpa [#allocation6], 0 }
  0x10   :  { %28 = vsyncpa [#allocation6 + $0x1], 0  ;;  %s5949_s29 = smov 0   ;;  %s5951_s30 = smov 0  }
  0x11   :  { %s5953_s15 = smov 0   ;;  %s5955_s16 = smov 0  }
  0x12 LB: > { %s5855_s17 = smov [#allocation7]   ;;  %s5970_s19 = sadd.s32 4294967295, %s5853_s16   ;;  %s5853_s16 = sphi %s5955_s16, %s6919_s16   ;;  %s5849_s15 = sphi %s5953_s15, %s6918_s15   ;;  %s5845_s30 = sphi %s5951_s30, %s6917_s30   ;;  %s5841_s29 = sphi %s5949_s29, %s6916_s29  }
  0x13   : > { %s376_s18 = sshll.u32 %s5855_s17, 4  ;;  %p4340_p0 = scmp.ge.s32.totalorder %s5853_s16, 1  ;;  %s5975_s18 = int_to_ptr.vmem [resolvable:$true] %s376_s18 }
  0x14   : > { %p6868_p1 = scmp.eq.s32.totalorder %s5970_s19, 0  ;;  %p364_p2 = scmp.lt.s32.totalorder %s5853_s16, 3 }
  0x15   : > { %s5856_s21 = smov [#allocation10]   ;;  %s5857_s24 = smov [#allocation13]  }
  0x16   : > { %p5977_p3 = pnand %p4340_p0, %p364_p2  ;;  %s405_s22 = sshll.u32 %s5856_s21, 4  ;;  %s5990_s22 = int_to_ptr.vmem [resolvable:$true] %s405_s22 }
  0x17   : > { %s431_s25 = sshll.u32 %s5857_s24, 4  ;;  %s6885_s1 = sld [smem:[#allocation26_spill]]  ;;  %s5992_s25 = int_to_ptr.vmem [resolvable:$true] %s431_s25 }
  0x18   : > { %s6883_s20 = scalar_select %p5977_p3, 1, 0 }
  0x19   : > { %p5415_p5 = pneg %p5977_p3 }
  0x1b   : > { %p5986_p6 = pnand %p5415_p5, %p6868_p1 }
  0x1d   : > { %s5517_s28 = scalar_lea.hbm %s6885_s1, 256  ;;  %p6002_p8 = pneg %p5986_p6 }
  0x1e   : > { %p5518_p7 = scmp.ne.s32.totalorder %s6885_s1, %s5517_s28  ;;  %p5524_p11 = scmp.lt.u32.totalorder %s5517_s28, %s6885_s1 }
  0x20   : > { %p5520_p9 = pnand %p6002_p8, %p5518_p7 }
  0x22   : > { %p5521_p10 = pneg %p5520_p9 }
  0x24   : > { %p5526_p12 = pnand %p5524_p11, %p5521_p10 }
  0x26   : > { %5529 = shalt.err (!%p5526_p12)
}
  0x27   : > { %s5530_s14 = scalar_lea.vmem %s5975_s18, 256  ;;  %p5538_p5 = scmp.lt.s32.totalorder %s5975_s18, %s5975_s18 }
  0x28   : > { %p5531_p13 = scmp.ne.s32.totalorder %s5975_s18, %s5530_s14  ;;  %p5539_p4 = scmp.lt.s32.totalorder %s5530_s14, %s5530_s14 }
  0x2a   : > { %p5533_p0 = pnand %p5531_p13, %p6002_p8  ;;  %p5540_p7 = por %p5539_p4, %p5538_p5 }
  0x2c   : > { %p5534_p2 = pneg %p5533_p0 }
  0x2e   : > { %p5541_p9 = pnand %p5540_p7, %p5534_p2 }
  0x30   : > { %5544 = shalt.err (!%p5541_p9)
}
  0x31   : > { %s6870_s26 = smov 128   ;;  %s6872_s10 = smov 8  }
  0x32   : > { %5418 = dma.hbm_to_vmem [thread:$0]  (!%p5986_p6), %s6885_s1, 256, %s5975_s18, [#allocation8], %s6870_s26, %s6870_s26, %s6872_s10  }
  0x33   : > { %s5545_s14 = scalar_lea.hbm %s6854_s4, 2560 }
  0x34   : > { %p5546_p4 = scmp.ne.s32.totalorder %s6854_s4, %s5545_s14  ;;  %p5552_p12 = scmp.lt.u32.totalorder %s5545_s14, %s6854_s4 }
  0x36   : > { %p5548_p10 = pnand %p5546_p4, %p6002_p8 }
  0x38   : > { %p5549_p11 = pneg %p5548_p10 }
  0x3a   : > { %p5554_p13 = pnand %p5552_p12, %p5549_p11 }
  0x3c   : > { %5557 = shalt.err (!%p5554_p13)
}
  0x3d   : > { %s5558_s18 = scalar_lea.vmem %s5990_s22, 2560  ;;  %p5566_p7 = scmp.lt.s32.totalorder %s5990_s22, %s5990_s22 }
  0x3e   : > { %p5559_p0 = scmp.ne.s32.totalorder %s5990_s22, %s5558_s18  ;;  %p5567_p9 = scmp.lt.s32.totalorder %s5558_s18, %s5558_s18 }
  0x40   : > { %p5561_p2 = pnand %p5559_p0, %p6002_p8  ;;  %p5568_p4 = por %p5567_p9, %p5566_p7 }
  0x42   : > { %p5562_p5 = pneg %p5561_p2 }
  0x44   : > { %p5569_p10 = pnand %p5568_p4, %p5562_p5 }
  0x46   : > { %5572 = shalt.err (!%p5569_p10)
}
  0x47   : > { %5424 = dma.hbm_to_vmem [thread:$0]  (!%p5986_p6), %s6854_s4, 2560, %s5990_s22, [#allocation11], %s6870_s26, %s6870_s26, %s6872_s10  }
  0x48   : > { %s5573_s27 = scalar_lea.hbm %s6856_s6, 2560 }
  0x49   : > { %p5574_p11 = scmp.ne.s32.totalorder %s6856_s6, %s5573_s27  ;;  %p5580_p0 = scmp.lt.u32.totalorder %s5573_s27, %s6856_s6 }
  0x4b   : > { %p5576_p12 = pnand %p5574_p11, %p6002_p8 }
  0x4d   : > { %p5577_p13 = pneg %p5576_p12 }
  0x4f   : > { %p5582_p2 = pnand %p5580_p0, %p5577_p13 }
  0x51   : > { %5585 = shalt.err (!%p5582_p2)
}
  0x52   : > { %s5586_s22 = scalar_lea.vmem %s5992_s25, 2560  ;;  %p5594_p4 = scmp.lt.s32.totalorder %s5992_s25, %s5992_s25 }
  0x53   : > { %p5587_p5 = scmp.ne.s32.totalorder %s5992_s25, %s5586_s22  ;;  %p5595_p10 = scmp.lt.s32.totalorder %s5586_s22, %s5586_s22 }
  0x55   : > { %p5589_p7 = pnand %p5587_p5, %p6002_p8  ;;  %p5596_p11 = por %p5595_p10, %p5594_p4 }
  0x57   : > { %p5590_p9 = pneg %p5589_p7 }
  0x59   : > { %p5597_p12 = pnand %p5596_p11, %p5590_p9 }
  0x5b   : > { %5600 = shalt.err (!%p5597_p12)
}
  0x5c   : > { %5430 = dma.hbm_to_vmem [thread:$0]  (!%p5986_p6), %s6856_s6, 2560, %s5992_s25, [#allocation14], %s6870_s26, %s6870_s26, %s6872_s10  }
  0x5d   : > { %s5860_s11 = smov [#allocation16]   ;;  %s5601_s28 = scalar_lea.hbm %s6858_s8, 80 }
  0x5e   : > { %s457_s12 = sshll.u32 %s5860_s11, 4  ;;  %p5602_p13 = scmp.ne.s32.totalorder %s6858_s8, %s5601_s28  ;;  %s458_s12 = int_to_ptr.vmem [resolvable:$true] %s457_s12 }
  0x5f   : > { %p5608_p5 = scmp.lt.u32.totalorder %s5601_s28, %s6858_s8 }
  0x60   : > { %p5604_p0 = pnand %p5602_p13, %p6002_p8 }
  0x62   : > { %p5605_p2 = pneg %p5604_p0 }
  0x64   : > { %p5610_p7 = pnand %p5608_p5, %p5605_p2 }
  0x66   : > { %5613 = shalt.err (!%p5610_p7)
}
  0x67   : > { %s5614_s25 = scalar_lea.vmem %s458_s12, 80  ;;  %s5621_s18 = scalar_lea.vmem %s458_s12, 96 }
  0x68   : > { %p5615_p9 = scmp.ne.s32.totalorder %s458_s12, %s5614_s25  ;;  %p5622_p11 = scmp.lt.s32.totalorder %s458_s12, %s458_s12 }
  0x69   : > { %p5623_p12 = scmp.lt.s32.totalorder %s5621_s18, %s5614_s25 }
  0x6a   : > { %p5617_p4 = pnand %p5615_p9, %p6002_p8 }
  0x6b   : > { %p5624_p1 = por %p5623_p12, %p5622_p11 }
  0x6c   : > { %p5618_p10 = pneg %p5617_p4 }
  0x6e   : > { %p5625_p3 = pnand %p5624_p1, %p5618_p10 }
  0x70   : > { %5628 = shalt.err (!%p5625_p3)
}
  0x71   : > { %s5861_s2 = smov 16   ;;  %s5862_s11 = smov 1  }
  0x72   : > { %5436 = dma.hbm_to_vmem [thread:$0]  (!%p5986_p6), %s6858_s8, 80, %s458_s12, [#allocation17], %s5861_s2, %s5861_s2, %s5862_s11  }
  0x73   : > { %s5863_s28 = smov [#allocation9]   ;;  %s5864_s24 = smov [#allocation12]  }
  0x74   : > { %s392_s17 = sshll.u32 %s5863_s28, 4  ;;  %s418_s14 = sshll.u32 %s5864_s24, 4  ;;  %s393_s17 = int_to_ptr.vmem [resolvable:$true] %s392_s17  ;;  %s6096_s14 = int_to_ptr.vmem [resolvable:$true] %s418_s14 }
  0x75   : > { %s6887_s3 = sld [smem:[#allocation28_spill]] }
  0x7b   : > { %s5629_s18 = scalar_lea.hbm %s6887_s3, 2560 }
  0x7c   : > { %p5630_p1 = scmp.ne.s32.totalorder %s6887_s3, %s5629_s18  ;;  %p5636_p0 = scmp.lt.u32.totalorder %s5629_s18, %s6887_s3 }
  0x7e   : > { %p5632_p3 = pnand %p5630_p1, %p6002_p8 }
  0x80   : > { %p5633_p13 = pneg %p5632_p3 }
  0x82   : > { %p5638_p2 = pnand %p5636_p0, %p5633_p13 }
  0x84   : > { %5641 = shalt.err (!%p5638_p2)
}
  0x85   : > { %s5642_s2 = scalar_lea.vmem %s393_s17, 2560  ;;  %p5650_p4 = scmp.lt.s32.totalorder %s393_s17, %s393_s17 }
  0x86   : > { %p5643_p5 = scmp.ne.s32.totalorder %s393_s17, %s5642_s2  ;;  %p5651_p10 = scmp.lt.s32.totalorder %s5642_s2, %s5642_s2 }
  0x88   : > { %p5645_p7 = pnand %p5643_p5, %p6002_p8  ;;  %p5652_p11 = por %p5651_p10, %p5650_p4 }
  0x8a   : > { %p5646_p9 = pneg %p5645_p7 }
  0x8c   : > { %p5653_p12 = pnand %p5652_p11, %p5646_p9 }
  0x8e   : > { %5656 = shalt.err (!%p5653_p12)
}
  0x8f   : > { %s6888_s26 = smov 8   ;;  %s6889_s10 = smov 128  }
  0x90   : > { %5421 = dma.hbm_to_vmem [thread:$0]  (!%p5986_p6), %s6887_s3, 2560, %s393_s17, [#allocation8], %s6889_s10, %s6889_s10, %s6888_s26  }
  0x91   : > { %s5657_s22 = scalar_lea.hbm %s6855_s5, 2560 }
  0x92   : > { %p5658_p1 = scmp.ne.s32.totalorder %s6855_s5, %s5657_s22  ;;  %p5664_p0 = scmp.lt.u32.totalorder %s5657_s22, %s6855_s5 }
  0x94   : > { %p5660_p3 = pnand %p5658_p1, %p6002_p8 }
  0x96   : > { %p5661_p13 = pneg %p5660_p3 }
  0x98   : > { %p5666_p2 = pnand %p5664_p0, %p5661_p13 }
  0x9a   : > { %5669 = shalt.err (!%p5666_p2)
}
  0x9b   : > { %s5670_s17 = scalar_lea.vmem %s6096_s14, 2560  ;;  %p5678_p4 = scmp.lt.s32.totalorder %s6096_s14, %s6096_s14 }
  0x9c   : > { %p5671_p5 = scmp.ne.s32.totalorder %s6096_s14, %s5670_s17  ;;  %p5679_p10 = scmp.lt.s32.totalorder %s5670_s17, %s5670_s17 }
  0x9e   : > { %p5673_p7 = pnand %p5671_p5, %p6002_p8  ;;  %p5680_p11 = por %p5679_p10, %p5678_p4 }
  0xa0   : > { %p5674_p9 = pneg %p5673_p7 }
  0xa2   : > { %p5681_p12 = pnand %p5680_p11, %p5674_p9 }
  0xa4   : > { %5684 = shalt.err (!%p5681_p12)
}
  0xa5   : > { %5427 = dma.hbm_to_vmem [thread:$0]  (!%p5986_p6), %s6855_s5, 2560, %s6096_s14, [#allocation11], %s6889_s10, %s6889_s10, %s6888_s26  }
  0xa6   : > { %s5865_s27 = smov [#allocation15]   ;;  %s5866_s24 = smov [#allocation18]  }
  0xa7   : > { %s444_s28 = sshll.u32 %s5865_s27, 4  ;;  %s471_s22 = sshll.u32 %s5866_s24, 4  ;;  %s445_s28 = int_to_ptr.vmem [resolvable:$true] %s444_s28  ;;  %s6145_s22 = int_to_ptr.vmem [resolvable:$true] %s471_s22 }
  0xa8   : > { %s5685_s13 = scalar_lea.hbm %s6857_s7, 2560 }
  0xa9   : > { %p5686_p1 = scmp.ne.s32.totalorder %s6857_s7, %s5685_s13  ;;  %p5692_p0 = scmp.lt.u32.totalorder %s5685_s13, %s6857_s7 }
  0xab   : > { %p5688_p3 = pnand %p5686_p1, %p6002_p8 }
  0xad   : > { %p5689_p13 = pneg %p5688_p3 }
  0xaf   : > { %p5694_p2 = pnand %p5692_p0, %p5689_p13 }
  0xb1   : > { %5697 = shalt.err (!%p5694_p2)
}
  0xb2   : > { %s5698_s11 = scalar_lea.vmem %s445_s28, 2560  ;;  %p5706_p4 = scmp.lt.s32.totalorder %s445_s28, %s445_s28 }
  0xb3   : > { %p5699_p5 = scmp.ne.s32.totalorder %s445_s28, %s5698_s11  ;;  %p5707_p10 = scmp.lt.s32.totalorder %s5698_s11, %s5698_s11 }
  0xb5   : > { %p5701_p7 = pnand %p5699_p5, %p6002_p8  ;;  %p5708_p11 = por %p5707_p10, %p5706_p4 }
  0xb7   : > { %p5702_p9 = pneg %p5701_p7 }
  0xb9   : > { %p5709_p12 = pnand %p5708_p11, %p5702_p9 }
  0xbb   : > { %5712 = shalt.err (!%p5709_p12)
}
  0xbc   : > { %5433 = dma.hbm_to_vmem [thread:$0]  (!%p5986_p6), %s6857_s7, 2560, %s445_s28, [#allocation14], %s6889_s10, %s6889_s10, %s6888_s26  }
  0xbd   : > { %s5713_s13 = scalar_lea.hbm %s6859_s9, 128 }
  0xbe   : > { %p5714_p1 = scmp.ne.s32.totalorder %s6859_s9, %s5713_s13  ;;  %p5720_p0 = scmp.lt.u32.totalorder %s5713_s13, %s6859_s9 }
  0xc0   : > { %p5716_p3 = pnand %p5714_p1, %p6002_p8 }
  0xc2   : > { %p5717_p13 = pneg %p5716_p3 }
  0xc4   : > { %p5722_p2 = pnand %p5720_p0, %p5717_p13 }
  0xc6   : > { %5725 = shalt.err (!%p5722_p2)
}
  0xc7   : > { %s5726_s28 = scalar_lea.vmem %s6145_s22, 128  ;;  %p5734_p4 = scmp.lt.s32.totalorder %s6145_s22, %s6145_s22 }
  0xc8   : > { %p5727_p5 = scmp.ne.s32.totalorder %s6145_s22, %s5726_s28  ;;  %p5735_p10 = scmp.lt.s32.totalorder %s5726_s28, %s5726_s28 }
  0xca   : > { %p5729_p7 = pnand %p5727_p5, %p6002_p8  ;;  %p5736_p11 = por %p5735_p10, %p5734_p4 }
  0xcc   : > { %p5730_p9 = pneg %p5729_p7 }
  0xce   : > { %p5737_p12 = pnand %p5736_p11, %p5730_p9 }
  0xd0   : > { %5740 = shalt.err (!%p5737_p12)
}
  0xd1   : > { %5439 = dma.hbm_to_vmem [thread:$0]  (!%p5986_p6), %s6859_s9, 128, %s6145_s22, [#allocation17]  }
  0xd2   : > { %s4339_s23 = sadd.s32 4294967294, %s5853_s16   ;;  %s6193_s21 = sadd.s32 1, %s5853_s16  }
  0xd3   : > { %s38_s24 = ssub.s32 %s5853_s16, %s6193_s21  ;;  %s41_s25 = sadd.s32 1, %s5849_s15 }
  0xd4   : > { %p39_p8 = scmp.eq.s32.totalorder %s38_s24, 0  ;;  %p48_p1 = scmp.ne.s32.totalorder %s5849_s15, %s5845_s30 }
  0xd5   : > { %p49_p3 = scmp.eq.s32.totalorder %s5853_s16, 0  ;;  %p54_p13 = scmp.ne.s32.totalorder %s5845_s30, %s5841_s29 }
  0xd6   : > { %s6204_s18 = scalar_select %p39_p8, %s5849_s15, %s41_s25  }
  0xd7   : > { %p6206_p0 = por %p49_p3, %p48_p1  ;;  %p6891_p2 = scmp.eq.s32.totalorder %s5970_s19, 0 }
  0xd8   : > { %p351_p5 = scmp.eq.s32.totalorder %s5970_s19, 1  ;;  %p357_p7 = scmp.eq.s32.totalorder %s4339_s23, 1 }
  0xd9   : > { %p6212_p6 = por %p6891_p2, %p54_p13  ;;  %p5456_p9 = scmp.lt.s32.totalorder %s5853_s16, 2 }
  0xda   : > { %s494_s12 = sand.u32 1, %s5849_s15   ;;  %p6219_p4 = por %p351_p5, %p48_p1 }
  0xdb   : > { %p6223_p10 = por %p357_p7, %p54_p13  ;;  %s4350_s14 = sshll.u32 %s494_s12, 4 }
  0xdc   : > { %s6893_s17 = scalar_select %p6219_p4, 1, 0 }
  0xdd   : > { %s6894_s2 = scalar_select %p6223_p10, 1, 0 }
  0xde   : > { %s4502_s28 = sshll.u32 %s5853_s16, 8  ;;  %s498_s23 = scalar_lea.vmem [#allocation4], %s4350_s14 }
  0xdf   : > { %s6231_s24 = scalar_lea.hbm %s6850_s0, %s4502_s28  ;;  %s505_s25 = sshll.u32 %s498_s23, 4  ;;  %s6233_s25 = int_to_ptr.vmem [resolvable:$true] %s505_s25 }
  0xe0   : > { %p6237_p11 = pnand %p5456_p9, %p6206_p0  ;;  %s6241_s3 = scalar_lea.sflag [#allocation5], %s494_s12 }
  0xe1   : > { %s5741_s11 = scalar_lea.hbm %s6231_s24, 256  ;;  %s5746_s13 = scalar_lea.hbm %s6850_s0, 512 }
  0xe2   : > { %p5742_p12 = scmp.ne.s32.totalorder %s6231_s24, %s5741_s11  ;;  %p5743_p8 = pneg %p6237_p11 }
  0xe3   : > { %p5747_p13 = scmp.lt.u32.totalorder %s6231_s24, %s6850_s0  ;;  %p5748_p0 = scmp.lt.u32.totalorder %s5746_s13, %s5741_s11 }
  0xe4   : > { %p5744_p1 = pnand %p5743_p8, %p5742_p12  ;;  %p5750_p5 = scmp.lt.u32.totalorder %s5741_s11, %s6231_s24 }
  0xe5   : > { %p5749_p2 = por %p5748_p0, %p5747_p13 }
  0xe6   : > { %p5745_p3 = pneg %p5744_p1 }
  0xe7   : > { %p5751_p7 = por %p5750_p5, %p5749_p2 }
  0xe9   : > { %p5752_p9 = pnand %p5751_p7, %p5745_p3 }
  0xeb   : > { %5755 = shalt.err (!%p5752_p9)
}
  0xec   : > { %s5756_s12 = scalar_lea.vmem %s6233_s25, 256  ;;  %s5867_s14 = smov [#allocation4]  }
  0xed   : > { %p5757_p12 = scmp.ne.s32.totalorder %s6233_s25, %s5756_s12  ;;  %s5761_s28 = sshll.u32 %s5867_s14, 4  ;;  %s5762_s28 = int_to_ptr.vmem [resolvable:$false] %s5761_s28 }
  0xee   : > { %s5763_s27 = scalar_lea.vmem %s5762_s28, 512  ;;  %p5764_p4 = scmp.lt.s32.totalorder %s6233_s25, %s5762_s28 }
  0xef   : > { %p5759_p1 = pnand %p5757_p12, %p5743_p8  ;;  %p5765_p13 = scmp.lt.s32.totalorder %s5763_s27, %s5756_s12 }
  0xf1   : > { %p5760_p10 = pneg %p5759_p1  ;;  %p5766_p0 = por %p5765_p13, %p5764_p4 }
  0xf3   : > { %p5767_p2 = pnand %p5766_p0, %p5760_p10 }
  0xf5   : > { %5770 = shalt.err (!%p5767_p2)
}
  0xf6   : > { %5443 = dma.hbm_to_vmem [thread:$0]  (!%p6237_p11), %s6231_s24, 256, %s6233_s25, %s6241_s3, %s6889_s10, %s6889_s10, %s6888_s26  }
  0xf7   : > { %p6896_p8 = scmp.ne.s32.totalorder %s6883_s20, 0 }
  0xf8   : > { %s6275_s11 = sand.u32 (!%p6896_p8), 1, %s5845_s30  }
  0xf9   : > { %517 = sbr.rel (%p6896_p8) target bundleno = 2942 (0xb7e), region = 76  ;;  %s4354_s13 = sshll.u32 (!%p6896_p8), %s6275_s11, 4 }
  0xfa   : > { %s520_s23 = scalar_lea.sflag (!%p6896_p8), [#allocation5], %s6275_s11  ;;  %s523_s12 = scalar_lea.vmem (!%p6896_p8), [#allocation4], %s4354_s13 }
 0x100   : > { %5816 = dma.done.wait (%p6212_p6), %s520_s23, 256  }
 0x101   : > { %5818 = vsyncadd (%p6212_p6), %s520_s23, 4294967040  ;;  %p6897_p4 = scmp.eq.s32.totalorder %s5970_s19, 0 }
 0x103   : > { %5820 = dma.done.wait (%p6897_p4), [#allocation8], 2816   ;;  %p6898_p10 = pmov %p6897_p4 }
 0x104   : > { %p6899_p11 = pmov %p6897_p4 }
 0x105   : > { %5822 = vsyncadd (%p6898_p10), [#allocation8], 4294964480 }
 0x106   : > { %5824 = dma.done.wait (%p6899_p11), [#allocation11], 5120   ;;  %p6900_p3 = pmov %p6897_p4 }
 0x108   : > { %5826 = vsyncadd (%p6900_p3), [#allocation11], 4294962176  ;;  %p6901_p5 = pmov %p6900_p3 }
 0x109   : > { %p6902_p7 = pmov %p6900_p3 }
 0x10a   : > { %5828 = dma.done.wait (%p6901_p5), [#allocation14], 5120  }
 0x10b   : > { %5830 = vsyncadd (%p6902_p7), [#allocation14], 4294962176  ;;  %p6903_p6 = pmov %p6900_p3 }
 0x10c   : > { %p6904_p9 = pmov %p6900_p3 }
 0x10d   : > { %5832 = dma.done.wait (%p6903_p6), [#allocation17], 208  }
 0x10e   : > { %5834 = vsyncadd (%p6904_p9), [#allocation17], 4294967088  ;;  %v600_v0 = vld [vmem:[%s523_s12] sm:$0xff]  ;;  %v603_v2 = vld [vmem:[#allocation7 + $0x8] sm:$0xff]  ;;  %vm643_vm0 = vcmask 130048   ;;  %s6905_s20 = sld [smem:[#allocation27_spill]] }
 0x10f   : > { %v602_v1 = vld [vmem:[#allocation7] sm:$0xff]  ;;  %611 = vxpose.xlu0.b32.start [1/2] (short) (narrow) %v600_v0, 64  ;;  %v601_v3 = vld [vmem:[%s523_s12 + $0x8] sm:$0xff]  ;;  %v790_v13 = vld [vmem:[#allocation9] sm:$0xff]  ;;  %vm773_vm1 = vcmask 261120   ;;  %vm5869_vm2 = vmmov 0  }
 0x110   : > { %v5167_v4 = vpack.c.bf16 %v603_v2, %v602_v1  ;;  %v791_v14 = vld [vmem:[#allocation9 + $0x8] sm:$0xff]  ;;  %v950_v15 = vld [vmem:[#allocation10] sm:$0xff]  ;;  %v792_v19 = vld [vmem:[#allocation9 + $0x10] sm:$0xff]  ;;  %vm1384_vm3 = vcmask 260096   ;;  %s6906_s22 = sld [smem:[#allocation30_spill]]  ;;  %vm2442_vm4 = vcmask 515072  }
 0x111   : > { %v5171_v16 = vpack.c.bf16 %v791_v14, %v790_v13  ;;  %v951_v17 = vld [vmem:[#allocation10 + $0x8] sm:$0xff]  ;;  %v793_v20 = vld [vmem:[#allocation9 + $0x18] sm:$0xff]  ;;  %v952_v21 = vld [vmem:[#allocation10 + $0x10] sm:$0xff]  ;;  %vm2214_vm5 = vcmask 259072   ;;  %vm2455_vm6 = vcmask 1046528   ;;  %vm5871_vm7 = vmmov 1  }
 0x112   : > { %5168 = vmatprep.subr.bf16.mxu0 %v5167_v4  ;;  %v5179_v18 = vpack.c.bf16 %v951_v17, %v950_v15  ;;  %v5175_v22 = vpack.c.bf16 %v793_v20, %v792_v19  ;;  %v953_v23 = vld [vmem:[#allocation10 + $0x18] sm:$0xff]  ;;  %v1236_v25 = vld [vmem:[#allocation13] sm:$0xff]  ;;  %v1237_v26 = vld [vmem:[#allocation13 + $0x8] sm:$0xff]  ;;  %s6909_s1 = sld [smem:[#allocation31_spill]]  ;;  %vm3169_vm9 = vcmask 252928   ;;  %vm2783_vm10 = vcmask 257024  }
 0x113   : > { %612 = vxpose.xlu0.b32.end [2/2] (short) (narrow) %v601_v3, 64  ;;  %5170 = vmatpush3.bf16.msra.mxu0 %v5167_v4  ;;  %v5183_v24 = vpack.c.bf16 %v953_v23, %v952_v21  ;;  %v5195_v27 = vpack.c.bf16 %v1237_v26, %v1236_v25  ;;  %v1091_v28 = vld [vmem:[#allocation12] sm:$0xff]  ;;  %v1092_v29 = vld [vmem:[#allocation12 + $0x8] sm:$0xff]  ;;  %v1238_v36 = vld [vmem:[#allocation13 + $0x10] sm:$0xff]  ;;  %v5870_v26 = vmov 0.0   ;;  %s6910_s24 = sld [smem:[#allocation32_spill]] }
 0x114   : > { %5172 = vmatprep.subr.bf16.mxu1 %v5171_v16  ;;  %5180 = vmatprep.subr.bf16.mxu0 %v5179_v18  ;;  %v5187_v30 = vpack.c.bf16 %v1092_v29, %v1091_v28  ;;  %v4364_v31 = vld [vmem:[%s6905_s20] ss:$0 sm:$0xff]  ;;  %v1239_v38 = vld [vmem:[#allocation13 + $0x18] sm:$0xff]  ;;  %v1402_v48 = vld [vmem:[#allocation15] sm:$0xff]  ;;  %vm4015_vm11 = vcmask 121856   ;;  %s6911_s28 = sld [smem:[#allocation29_spill]] }
 0x115   : > { %5174 = vmatpush3.bf16.msra.mxu1 %v5171_v16  ;;  %v1093_v39 = vld [vmem:[#allocation12 + $0x10] sm:$0xff]  ;;  %v1094_v40 = vld [vmem:[#allocation12 + $0x18] sm:$0xff]  ;;  %v5199_v45 = vpack.c.bf16 %v1239_v38, %v1238_v36  ;;  %v1403_v49 = vld [vmem:[#allocation15 + $0x8] sm:$0xff]  ;;  %v5868_v16 = vmov 0.0|0.0   ;;  %s4363_s27 = sshll.u32 %s6275_s11, 3  ;;  %s4499_s13 = sshll.u32 %s5970_s19, 7 }
 0x116   : > { %5176 = vmatprep.subr.bf16.mxu1 %v5175_v22  ;;  %v5191_v46 = vpack.c.bf16 %v1094_v40, %v1093_v39  ;;  %v5203_v50 = vpack.c.bf16 %v1403_v49, %v1402_v48  ;;  %v1404_v1 = vld [vmem:[#allocation15 + $0x10] sm:$0xff]  ;;  %v1405_v2 = vld [vmem:[#allocation15 + $0x18] sm:$0xff]  ;;  %v1756_v13 = vld [vmem:[#allocation10 + $0x20] sm:$0xff]  ;;  %s599_s23 = scalar_lea.vmem [#allocation19], %s4363_s27  ;;  %vm4177_vm12 = vcmask 64512   ;;  %s6912_s26 = sld [smem:[#allocation33_spill]] }
 0x117   : > { %v5207_v3 = vpack.c.bf16 %v1405_v2, %v1404_v1  ;;  %v1757_v14 = vld [vmem:[#allocation10 + $0x28] sm:$0xff]  ;;  %v1592_v17 = vld [vmem:[#allocation9 + $0x20] sm:$0xff]  ;;  %v1758_v20 = vld [vmem:[#allocation10 + $0x30] sm:$0xff]  ;;  %s4193_s12 = sshll.u32 %s599_s23, 4  ;;  %p6913_p1 = scmp.ne.s32.totalorder %s6893_s17, 0  ;;  %s6808_s12 = int_to_ptr.vmem [resolvable:$true] %s4193_s12 }
 0x118   : > { %v5220_v15 = vpack.c.bf16 %v1757_v14, %v1756_v13  ;;  %v1759_v21 = vld [vmem:[#allocation10 + $0x38] sm:$0xff]  ;;  %v1594_v23 = vld [vmem:[#allocation9 + $0x30] sm:$0xff]  ;;  %v2067_v28 = vld [vmem:[#allocation13 + $0x28] sm:$0xff]  ;;  %s5771_s25 = scalar_lea.vmem %s6808_s12, 128  ;;  %s5873_s19 = smov [#allocation19]  }
 0x119   : > { %5178 = vmatpush3.bf16.msra.mxu1 %v5175_v22  ;;  %v5223_v22 = vpack.c.bf16 %v1759_v21, %v1758_v20  ;;  %vm6629_vm8 = vmpackc.low %vm2455_vm6, %vm5871_vm7  ;;  %p5772_p12 = scmp.ne.s32.totalorder %s6808_s12, %s5771_s25  ;;  %s5775_s14 = sshll.u32 %s5873_s19, 4  ;;  %s5776_s14 = int_to_ptr.vmem [resolvable:$false] %s5775_s14 }
 0x11a   : > { %5188 = vmatprep.subr.bf16.mxu1 %v5187_v30  ;;  %p5778_p2 = scmp.lt.s32.totalorder %s6808_s12, %s5776_s14 }
 0x11b   : > { %p5773_p13 = pnand %p5772_p12, %p6913_p1 }
 0x11c   : > { %s6806_s10 = scalar_lea.hbm %s6912_s26, %s4499_s13 }
 0x11d   : > { %p5774_p0 = pneg %p5773_p13 }
 0x18f   : > { %v627_v5 = vpop.trf.xlu0 }
 0x190   : > { %4740 = vmatprep.mubr.msk.f32.mxu0 %vm643_vm0, %v627_v5 }
 0x193   : > { %v628_v6 = vpop.trf.xlu0 }
 0x194   : > { %4741 = vmatmul.mubr.msk.f32.vlgmr.msra.gmra.mrb[0].mxu0 %vm643_vm0, %v628_v6 }
 0x195   : > { %5182 = vmatpush3.bf16.msra.mxu0 %v5179_v18  ;;  %v1593_v18 = vld [vmem:[#allocation9 + $0x28] sm:$0xff] }
 0x196   : > { %5184 = vmatprep.subr.bf16.mxu0 %v5183_v24  ;;  %v5211_v19 = vpack.c.bf16 %v1593_v18, %v1592_v17 }
 0x197   : > { %v629_v7 = vpop.trf.xlu0 }
 0x198   : > { %4743 = vmatprep.mubr.msk.f32.mxu0 %vm643_vm0, %v629_v7 }
 0x199   : > { %5186 = vmatpush3.bf16.msra.mxu0 %v5183_v24  ;;  %v1595_v24 = vld [vmem:[#allocation9 + $0x38] sm:$0xff] }
 0x19a   : > { %5196 = vmatprep.subr.bf16.mxu0 %v5195_v27  ;;  %v5215_v25 = vpack.c.bf16 %v1595_v24, %v1594_v23 }
 0x19b   : > { %v630_v8 = vpop.trf.xlu0 }
 0x19c   : > { %4744 = vmatmul.mubr.msk.f32.gmra.mrb[2].mxu0 %vm643_vm0, %v630_v8 }
 0x19f   : > { %v631_v9 = vpop.trf.xlu0 }
 0x1a0   : > { %4746 = vmatprep.mubr.msk.f32.mxu0 %vm643_vm0, %v631_v9 }
 0x1a3   : > { %v632_v10 = vpop.trf.xlu0 }
 0x1a4   : > { %4747 = vmatmul.mubr.msk.f32.gmra.mrb[4].mxu0 %vm643_vm0, %v632_v10 }
 0x1a7   : > { %v633_v11 = vpop.trf.xlu0 }
 0x1a8   : > { %4749 = vmatprep.mubr.msk.f32.mxu0 %vm643_vm0, %v633_v11 }
 0x1ab   : > { %v634_v12 = vpop.trf.xlu0 }
 0x1ac   : > { %4750 = vmatmul.mubr.msk.f32.gmra.mrb[6].mxu0 %vm643_vm0, %v634_v12 }
 0x267   : > { %v4742_v32 = vpop.f32.mrb[0].mxu0 }
 0x268   : > { %v740_v33 = vadd.f32 %v4742_v32, %v4364_v31  ;;  %v734_v34 = vpop.f32.mrb[1].mxu0 }
 0x269   : > { %v735_v35 = vadd.f32 %v4364_v31, %v734_v34 }
 0x26a   : > { %775 = vst.msk [vmem:[#allocation2 + $0x8] sm:$0xff] %vm773_vm1, %v740_v33 }
 0x26b   : > { %774 = vst.msk [vmem:[#allocation2] sm:$0xff] %vm773_vm1, %v735_v35 }
 0x26f   : > { %v4745_v37 = vpop.f32.mrb[2].mxu0 }
 0x270   : > { %v750_v41 = vadd.f32 %v4745_v37, %v4364_v31  ;;  %v744_v42 = vpop.f32.mrb[3].mxu0 }
 0x271   : > { %v745_v43 = vadd.f32 %v4364_v31, %v744_v42  ;;  %v6320_v47 = vld [vmem:[#allocation2 + $0x8] sm:$0xff] }
 0x272   : > { %777 = vst.msk [vmem:[#allocation2 + $0x18] sm:$0xff] %vm773_vm1, %v750_v41  ;;  %v6313_v44 = vld [vmem:[#allocation2] sm:$0xff] }
 0x273   : > { %776 = vst.msk [vmem:[#allocation2 + $0x10] sm:$0xff] %vm773_vm1, %v745_v43  ;;  %4760 = vmatprep.mubr.msk.f32.mxu1 %vm773_vm1, %v6313_v44  ;;  %4780 = vmatprep.mubr.msk.f32.mxu0 %vm773_vm1, %v6313_v44  ;;  %v1394_v5 = vld [vmem:[#allocation2 + $0x1] sm:$0xff] }
 0x274   : > { %4761 = vmatmul.mubr.msk.f32.vlgmr.msra.gmra.mrb[0].mxu1 %vm773_vm1, %v6320_v47  ;;  %4781 = vmatmul.mubr.msk.f32.vlgmr.msra.gmra.mrb[8].mxu0 %vm773_vm1, %v6320_v47 }
 0x275   : > { %5190 = vmatpush3.bf16.msra.mxu1 %v5187_v30  ;;  %5198 = vmatpush3.bf16.msra.mxu0 %v5195_v27  ;;  %v2066_v27 = vld [vmem:[#allocation13 + $0x20] sm:$0xff] }
 0x276   : > { %5200 = vmatprep.subr.bf16.mxu0 %v5199_v45  ;;  %5192 = vmatprep.subr.bf16.mxu1 %v5191_v46  ;;  %v6402_v29 = vpack.c.bf16 %v2067_v28, %v2066_v27  ;;  %v4373_v30 = vld [vmem:[#allocation16] ss:$0 sm:$0xff] }
 0x277   : > { %v4748_v51 = vpop.f32.mrb[4].mxu0 }
 0x278   : > { %v760_v52 = vadd.f32 %v4748_v51, %v4364_v31  ;;  %v754_v53 = vpop.f32.mrb[5].mxu0 }
 0x279   : > { %v755_v54 = vadd.f32 %v4364_v31, %v754_v53  ;;  %5202 = vmatpush3.bf16.msra.mxu0 %v5199_v45  ;;  %5194 = vmatpush3.bf16.msra.mxu1 %v5191_v46  ;;  %v6334_v56 = vld [vmem:[#allocation2 + $0x18] sm:$0xff] }
 0x27a   : > { %779 = vst.msk [vmem:[#allocation2 + $0x28] sm:$0xff] %vm773_vm1, %v760_v52  ;;  %v6327_v55 = vld [vmem:[#allocation2 + $0x10] sm:$0xff]  ;;  %5204 = vmatprep.subr.bf16.mxu1 %v5203_v50  ;;  %5212 = vmatprep.subr.bf16.mxu0 %v5211_v19 }
 0x27b   : > { %778 = vst.msk [vmem:[#allocation2 + $0x20] sm:$0xff] %vm773_vm1, %v755_v54  ;;  %4763 = vmatprep.mubr.msk.f32.mxu1 %vm773_vm1, %v6327_v55  ;;  %4783 = vmatprep.mubr.msk.f32.mxu0 %vm773_vm1, %v6327_v55  ;;  %v1395_v6 = vld [vmem:[#allocation2 + $0x9] sm:$0xff]  ;;  %v1396_v7 = vld [vmem:[#allocation2 + $0x11] sm:$0xff] }
 0x27c   : > { %4764 = vmatmul.mubr.msk.f32.gmra.mrb[2].mxu1 %vm773_vm1, %v6334_v56  ;;  %4784 = vmatmul.mubr.msk.f32.gmra.mrb[10].mxu0 %vm773_vm1, %v6334_v56 }
 0x27f   : > { %v4751_v57 = vpop.f32.mrb[6].mxu0 }
 0x280   : > { %v770_v58 = vadd.f32 %v4751_v57, %v4364_v31  ;;  %v764_v59 = vpop.f32.mrb[7].mxu0 }
 0x281   : > { %v765_v60 = vadd.f32 %v4364_v31, %v764_v59  ;;  %v6348_v62 = vld [vmem:[#allocation2 + $0x28] sm:$0xff] }
 0x282   : > { %781 = vst.msk [vmem:[#allocation2 + $0x38] sm:$0xff] %vm773_vm1, %v770_v58  ;;  %v6341_v61 = vld [vmem:[#allocation2 + $0x20] sm:$0xff] }
 0x283   : > { %780 = vst.msk [vmem:[#allocation2 + $0x30] sm:$0xff] %vm773_vm1, %v765_v60  ;;  %4766 = vmatprep.mubr.msk.f32.mxu1 %vm773_vm1, %v6341_v61  ;;  %4786 = vmatprep.mubr.msk.f32.mxu0 %vm773_vm1, %v6341_v61  ;;  %v1397_v8 = vld [vmem:[#allocation2 + $0x19] sm:$0xff]  ;;  %v1398_v9 = vld [vmem:[#allocation2 + $0x21] sm:$0xff] }
 0x284   : > { %4767 = vmatmul.mubr.msk.f32.gmra.mrb[4].mxu1 %vm773_vm1, %v6348_v62  ;;  %4787 = vmatmul.mubr.msk.f32.gmra.mrb[12].mxu0 %vm773_vm1, %v6348_v62 }
 0x285   : > { %4814 = vmatprep.mubr.msk.f32.mxu0 %vm773_vm1, %v6313_v44 }
 0x288   : > { %4815 = vmatmul.mubr.msk.f32.vlgmr.msra.gmra.mrb[14].mxu0 %vm773_vm1, %v6320_v47 }
 0x289   : > { %4817 = vmatprep.mubr.msk.f32.mxu0 %vm773_vm1, %v6327_v55  ;;  %v6364_v0 = vld [vmem:[#allocation2 + $0x38] sm:$0xff]  ;;  %5214 = vmatpush3.bf16.msra.mxu0 %v5211_v19 }
 0x28a   : > { %v6360_v63 = vld [vmem:[#allocation2 + $0x30] sm:$0xff]  ;;  %v1235_v4 = vld [vmem:[#allocation2 + $0x38] sm:$0x7f]  ;;  %5216 = vmatprep.subr.bf16.mxu0 %v5215_v25 }
 0x28b   : > { %4769 = vmatprep.mubr.msk.f32.mxu1 %vm773_vm1, %v6360_v63  ;;  %v1399_v10 = vld [vmem:[#allocation2 + $0x29] sm:$0xff]  ;;  %v1400_v11 = vld [vmem:[#allocation2 + $0x31] sm:$0xff]  ;;  %v1401_v12 = vld [vmem:[#allocation2 + $0x39] sm:$0x7f] }
 0x28c   : > { %4770 = vmatmul.mubr.msk.f32.gmra.mrb[6].mxu1 %vm773_vm1, %v6364_v0  ;;  %4818 = vmatmul.mubr.msk.f32.gmra.mrb[16].mxu0 %vm773_vm1, %v6334_v56 }
 0x28d   : > { %4797 = vmatprep.mubr.msk.f32.mxu1 %vm773_vm1, %v6327_v55  ;;  %4820 = vmatprep.mubr.msk.f32.mxu0 %vm773_vm1, %v6341_v61 }
 0x28e   : > { %5218 = vmatpush3.bf16.msra.mxu0 %v5215_v25 }
 0x28f   : > { %5225 = vmatprep.subr.bf16.mxu0 %v5868_v16 }
 0x290   : > { %4798 = vmatmul.mubr.msk.f32.vlgmr.msra.gmra.mrb[8].mxu1 %vm773_vm1, %v6334_v56  ;;  %4821 = vmatmul.mubr.msk.f32.gmra.mrb[18].mxu0 %vm773_vm1, %v6348_v62 }
 0x291   : > { %4800 = vmatprep.mubr.msk.f32.mxu1 %vm773_vm1, %v6341_v61  ;;  %4823 = vmatprep.mubr.msk.f32.mxu0 %vm773_vm1, %v6360_v63 }
 0x292   : > { %5206 = vmatpush3.bf16.msra.mxu1 %v5203_v50 }
 0x293   : > { %5208 = vmatprep.subr.bf16.mxu1 %v5207_v3 }
 0x294   : > { %4801 = vmatmul.mubr.msk.f32.gmra.mrb[10].mxu1 %vm773_vm1, %v6348_v62  ;;  %4824 = vmatmul.mubr.msk.f32.gmra.mrb[20].mxu0 %vm773_vm1, %v1235_v4 }
 0x295   : > { %4803 = vmatprep.mubr.msk.f32.mxu1 %vm773_vm1, %v6360_v63 }
 0x296   : > { %5210 = vmatpush3.bf16.msra.mxu1 %v5207_v3 }
 0x297   : > { %5219 = vmatprep.subr.bf16.mxu1 %v5868_v16 }
 0x298   : > { %4804 = vmatmul.mubr.msk.f32.gmra.mrb[12].mxu1 %vm773_vm1, %v6364_v0 }
 0x299   : > { %4834 = vmatprep.mubr.msk.f32.mxu1 %vm773_vm1, %v1394_v5 }
 0x29c   : > { %4835 = vmatmul.mubr.msk.f32.vlgmr.msra.gmra.mrb[14].mxu1 %vm773_vm1, %v1395_v6 }
 0x29d   : > { %4837 = vmatprep.mubr.msk.f32.mxu1 %vm773_vm1, %v1396_v7  ;;  %5221 = vmatpush3.bf16.msra.mxu1 %v5220_v15 }
 0x29e   : > { %5222 = vmatprep.subr.bf16.mxu1 %v5868_v16 }
 0x2a0   : > { %4838 = vmatmul.mubr.msk.f32.gmra.mrb[16].mxu1 %vm773_vm1, %v1397_v8 }
 0x2a1   : > { %4840 = vmatprep.mubr.msk.f32.mxu1 %vm773_vm1, %v1398_v9  ;;  %5224 = vmatpush3.bf16.msra.mxu1 %v5223_v22 }
 0x2a2   : > { %5232 = vmatprep.subr.bf16.mxu1 %v6402_v29 }
 0x2a4   : > { %4841 = vmatmul.mubr.msk.f32.gmra.mrb[18].mxu1 %vm773_vm1, %v1399_v10 }
 0x2a5   : > { %4843 = vmatprep.mubr.msk.f32.mxu1 %vm773_vm1, %v1400_v11 }
 0x2a8   : > { %4844 = vmatmul.mubr.msk.f32.gmra.mrb[20].mxu1 %vm773_vm1, %v1401_v12 }
 0x2a9   : > { %4874 = vmatprep.mubr.msk.f32.mxu1 %vm5869_vm2, %v5870_v26 }
 0x347   : > { %v4762_v31 = vpop.f32.mrb[0].mxu1  ;;  %v4782_v32 = vpop.f32.mrb[8].mxu0 }
 0x348   : > { %v897_v33 = vadd.f32 %v4762_v31, %v4373_v30  ;;  %v891_v34 = vpop.f32.mrb[1].mxu1  ;;  %v1038_v35 = vpop.f32.mrb[9].mxu0 }
 0x349   : > { %v892_v36 = vadd.f32 %v4373_v30, %v891_v34 }
 0x34a   : > { %931 = vst.msk [vmem:[#allocation3 + $0x8] sm:$0xff] %vm773_vm1, %v897_v33 }
 0x34b   : > { %930 = vst.msk [vmem:[#allocation3] sm:$0xff] %vm773_vm1, %v892_v36 }
 0x34f   : > { %v4765_v37 = vpop.f32.mrb[2].mxu1  ;;  %v4785_v38 = vpop.f32.mrb[10].mxu0 }
 0x350   : > { %v907_v39 = vadd.f32 %v4765_v37, %v4373_v30  ;;  %v901_v40 = vpop.f32.mrb[3].mxu1  ;;  %v1048_v41 = vpop.f32.mrb[11].mxu0 }
 0x351   : > { %v902_v42 = vadd.f32 %v4373_v30, %v901_v40  ;;  %v1080_v9 = vld [vmem:[#allocation3 + $0x8] sm:$0xff] }
 0x352   : > { %933 = vst.msk [vmem:[#allocation3 + $0x18] sm:$0xff] %vm773_vm1, %v907_v39  ;;  %v1079_v13 = vld [vmem:[#allocation3] sm:$0xff] }
 0x353   : > { %932 = vst.msk [vmem:[#allocation3 + $0x10] sm:$0xff] %vm773_vm1, %v902_v42 }
 0x357   : > { %v4768_v43 = vpop.f32.mrb[4].mxu1  ;;  %v4788_v45 = vpop.f32.mrb[12].mxu0 }
 0x358   : > { %v917_v46 = vadd.f32 %v4768_v43, %v4373_v30  ;;  %v911_v48 = vpop.f32.mrb[5].mxu1  ;;  %v1058_v49 = vpop.f32.mrb[13].mxu0 }
 0x359   : > { %v939_v50 = vld [vmem:[#allocation3 + $0x18] sm:$0xff]  ;;  %v912_v51 = vadd.f32 %v4373_v30, %v911_v48 }
 0x35a   : > { %v1068_v52 = vadd.f32 %v4782_v32, %v939_v50  ;;  %v938_v53 = vld [vmem:[#allocation3 + $0x10] sm:$0xff]  ;;  %935 = vst.msk [vmem:[#allocation3 + $0x28] sm:$0xff] %vm773_vm1, %v917_v46 }
 0x35b   : > { %v1067_v54 = vadd.f32 %v1038_v35, %v938_v53  ;;  %934 = vst.msk [vmem:[#allocation3 + $0x20] sm:$0xff] %vm773_vm1, %v912_v51  ;;  %v4816_v57 = vpop.f32.mrb[14].mxu0 }
 0x35c   : > { %1074 = vst.msk [vmem:[#allocation3 + $0x18] sm:$0xff] %vm773_vm1, %v1068_v52  ;;  %v1330_v58 = vpop.f32.mrb[15].mxu0 }
 0x35d   : > { %1073 = vst.msk [vmem:[#allocation3 + $0x10] sm:$0xff] %vm773_vm1, %v1067_v54 }
 0x35f   : > { %v4771_v59 = vpop.f32.mrb[6].mxu1  ;;  %v6413_v60 = vpop.f32.mrb[16].mxu0 }
 0x360   : > { %v927_v1 = vadd.f32 %v4771_v59, %v4373_v30  ;;  %v921_v2 = vpop.f32.mrb[7].mxu1  ;;  %v1340_v3 = vpop.f32.mrb[17].mxu0 }
 0x361   : > { %v941_v4 = vld [vmem:[#allocation3 + $0x28] sm:$0xff]  ;;  %v922_v5 = vadd.f32 %v4373_v30, %v921_v2 }
 0x362   : > { %v1070_v6 = vadd.f32 %v4785_v38, %v941_v4  ;;  %v940_v7 = vld [vmem:[#allocation3 + $0x20] sm:$0xff]  ;;  %937 = vst.msk [vmem:[#allocation3 + $0x38] sm:$0xff] %vm773_vm1, %v927_v1 }
 0x363   : > { %v1069_v8 = vadd.f32 %v1048_v41, %v940_v7  ;;  %936 = vst.msk [vmem:[#allocation3 + $0x30] sm:$0xff] %vm773_vm1, %v922_v5  ;;  %v4799_v10 = vpop.f32.mrb[8].mxu1  ;;  %v4822_v11 = vpop.f32.mrb[18].mxu0  ;;  %v1082_v18 = vld [vmem:[#allocation3 + $0x18] sm:$0xff] }
 0x364   : > { %1076 = vst.msk [vmem:[#allocation3 + $0x28] sm:$0xff] %vm773_vm1, %v1070_v6  ;;  %v1209_v12 = vadd.f32 %v4799_v10, %v1080_v9  ;;  %v1179_v14 = vpop.f32.mrb[9].mxu1  ;;  %v1350_v15 = vpop.f32.mrb[19].mxu0  ;;  %v1081_v22 = vld [vmem:[#allocation3 + $0x10] sm:$0xff] }
 0x365   : > { %1075 = vst.msk [vmem:[#allocation3 + $0x20] sm:$0xff] %vm773_vm1, %v1069_v8  ;;  %v1208_v17 = vadd.f32 %v1179_v14, %v1079_v13 }
 0x366   : > { %1215 = vst.msk [vmem:[#allocation3 + $0x8] sm:$0xff] %vm773_vm1, %v1209_v12 }
 0x367   : > { %1214 = vst.msk [vmem:[#allocation3] sm:$0xff] %vm773_vm1, %v1208_v17  ;;  %v4802_v19 = vpop.f32.mrb[10].mxu1  ;;  %v4825_v20 = vpop.f32.mrb[20].mxu0 }
 0x368   : > { %v1211_v21 = vadd.f32 %v4802_v19, %v1082_v18  ;;  %v1189_v23 = vpop.f32.mrb[11].mxu1  ;;  %v1360_v24 = vpop.f32.mrb[21].mxu0 }
 0x369   : > { %v943_v25 = vld [vmem:[#allocation3 + $0x38] sm:$0xff]  ;;  %v1210_v27 = vadd.f32 %v1189_v23, %v1081_v22 }
 0x36a   : > { %v1072_v28 = vadd.f32 %v4788_v45, %v943_v25  ;;  %v942_v30 = vld [vmem:[#allocation3 + $0x30] sm:$0xff]  ;;  %1217 = vst.msk [vmem:[#allocation3 + $0x18] sm:$0xff] %vm773_vm1, %v1211_v21 }
 0x36b   : > { %v1071_v31 = vadd.f32 %v1058_v49, %v942_v30  ;;  %1216 = vst.msk [vmem:[#allocation3 + $0x10] sm:$0xff] %vm773_vm1, %v1210_v27  ;;  %v1084_v32 = vld [vmem:[#allocation3 + $0x28] sm:$0xff]  ;;  %v4805_v33 = vpop.f32.mrb[12].mxu1 }
 0x36c   : > { %1078 = vst.msk [vmem:[#allocation3 + $0x38] sm:$0xff] %vm773_vm1, %v1072_v28  ;;  %v1213_v34 = vadd.f32 %v4805_v33, %v1084_v32  ;;  %v1083_v35 = vld [vmem:[#allocation3 + $0x20] sm:$0xff]  ;;  %v1199_v36 = vpop.f32.mrb[13].mxu1 }
 0x36d   : > { %1077 = vst.msk [vmem:[#allocation3 + $0x30] sm:$0xff] %vm773_vm1, %v1071_v31  ;;  %v1212_v37 = vadd.f32 %v1199_v36, %v1083_v35 }
 0x36e   : > { %v1220_v38 = vld [vmem:[#allocation3 + $0x1] sm:$0xff]  ;;  %1219 = vst.msk [vmem:[#allocation3 + $0x28] sm:$0xff] %vm773_vm1, %v1213_v34 }
 0x36f   : > { %v1369_v39 = vadd.f32 %v1330_v58, %v1220_v38  ;;  %1218 = vst.msk [vmem:[#allocation3 + $0x20] sm:$0xff] %vm773_vm1, %v1212_v37  ;;  %v4836_v40 = vpop.f32.mrb[14].mxu1  ;;  %v2068_v37 = vld [vmem:[#allocation13 + $0x30] sm:$0xff]  ;;  %v2069_v38 = vld [vmem:[#allocation13 + $0x38] sm:$0xff] }
 0x370   : > { %v1496_v41 = vpop.f32.mrb[15].mxu1 }
 0x371   : > { %1377 = vst.msk [vmem:[#allocation3 + $0x1] sm:$0xff] %vm773_vm1, %v1369_v39 }
 0x372   : > { %v1221_v42 = vld [vmem:[#allocation3 + $0x9] sm:$0xff]  ;;  %v1222_v43 = vld [vmem:[#allocation3 + $0x11] sm:$0xff] }
 0x373   : > { %v1227_v45 = vld [vmem:[#allocation3 + $0x39] sm:$0x7f]  ;;  %v1370_v46 = vadd.f32 %v4816_v57, %v1221_v42  ;;  %v1371_v48 = vadd.f32 %v1340_v3, %v1222_v43  ;;  %v4839_v49 = vpop.f32.mrb[16].mxu1 }
 0x374   : > { %v1376_v50 = vadd.f32 %v4825_v20, %v1227_v45  ;;  %v1226_v51 = vld [vmem:[#allocation3 + $0x31] sm:$0xff]  ;;  %v1506_v52 = vpop.f32.mrb[17].mxu1 }
 0x375   : > { %1378 = vst.msk [vmem:[#allocation3 + $0x9] sm:$0xff] %vm773_vm1, %v1370_v46  ;;  %1379 = vst.msk [vmem:[#allocation3 + $0x11] sm:$0xff] %vm773_vm1, %v1371_v48  ;;  %v1375_v53 = vadd.f32 %v1360_v24, %v1226_v51  ;;  %v1225_v54 = vld [vmem:[#allocation3 + $0x29] sm:$0xff]  ;;  %v1911_v51 = vld [vmem:[#allocation12 + $0x28] sm:$0xff] }
 0x376   : > { %1385 = vst.msk [vmem:[#allocation3 + $0x39] sm:$0x7f] %vm1384_vm3, %v1376_v50  ;;  %v1374_v58 = vadd.f32 %v4822_v11, %v1225_v54  ;;  %v1223_v59 = vld [vmem:[#allocation3 + $0x19] sm:$0xff]  ;;  %v1224_v1 = vld [vmem:[#allocation3 + $0x21] sm:$0xff]  ;;  %v1910_v50 = vld [vmem:[#allocation12 + $0x20] sm:$0xff] }
 0x377   : > { %1383 = vst.msk [vmem:[#allocation3 + $0x31] sm:$0xff] %vm773_vm1, %v1375_v53  ;;  %v1372_v57 = vadd.f32 %v6413_v60, %v1223_v59  ;;  %v1373_v2 = vadd.f32 %v1350_v15, %v1224_v1  ;;  %v4842_v3 = vpop.f32.mrb[18].mxu1  ;;  %v2233_v54 = vld [vmem:[#allocation15 + $0x20] sm:$0xff] }
 0x378   : > { %1382 = vst.msk [vmem:[#allocation3 + $0x29] sm:$0xff] %vm773_vm1, %v1374_v58  ;;  %v1386_v4 = vld [vmem:[#allocation3] sm:$0xff]  ;;  %v1516_v5 = vpop.f32.mrb[19].mxu1  ;;  %v2234_v58 = vld [vmem:[#allocation15 + $0x28] sm:$0xff] }
 0x379   : > { %1380 = vst.msk [vmem:[#allocation3 + $0x19] sm:$0xff] %vm773_vm1, %v1372_v57  ;;  %1381 = vst.msk [vmem:[#allocation3 + $0x21] sm:$0xff] %vm773_vm1, %v1373_v2  ;;  %v1535_v6 = vadd.f32 %v1496_v41, %v1386_v4  ;;  %v5239_v57 = vpack.c.bf16 %v2234_v58, %v2233_v54 }
 0x37b   : > { %1543 = vst.msk [vmem:[#allocation3] sm:$0xff] %vm773_vm1, %v1535_v6  ;;  %v4845_v7 = vpop.f32.mrb[20].mxu1  ;;  %v2236_v6 = vld [vmem:[#allocation15 + $0x38] sm:$0xff] }
 0x37c   : > { %v1387_v8 = vld [vmem:[#allocation3 + $0x8] sm:$0xff]  ;;  %v1388_v9 = vld [vmem:[#allocation3 + $0x10] sm:$0xff]  ;;  %v1526_v10 = vpop.f32.mrb[21].mxu1 }
 0x37d   : > { %v1536_v11 = vadd.f32 %v4836_v40, %v1387_v8  ;;  %v1537_v12 = vadd.f32 %v1506_v52, %v1388_v9  ;;  %v5235_v52 = vpack.c.bf16 %v2069_v38, %v2068_v37 }
 0x37e   : > { %v1393_v60 = vld [vmem:[#allocation3 + $0x38] sm:$0x7f] }
 0x37f   : > { %1544 = vst.msk [vmem:[#allocation3 + $0x8] sm:$0xff] %vm773_vm1, %v1536_v11  ;;  %1545 = vst.msk [vmem:[#allocation3 + $0x10] sm:$0xff] %vm773_vm1, %v1537_v12  ;;  %v1542_v13 = vadd.f32 %v4845_v7, %v1393_v60  ;;  %v1392_v14 = vld [vmem:[#allocation3 + $0x30] sm:$0xff] }
 0x380   : > { %v1389_v15 = vld [vmem:[#allocation3 + $0x18] sm:$0xff]  ;;  %v1391_v17 = vld [vmem:[#allocation3 + $0x28] sm:$0xff]  ;;  %v1390_v18 = vld [vmem:[#allocation3 + $0x20] sm:$0xff]  ;;  %v1541_v19 = vadd.f32 %v1526_v10, %v1392_v14 }
 0x381   : > { %v1538_v20 = vadd.f32 %v4839_v49, %v1389_v15  ;;  %v1540_v21 = vadd.f32 %v4842_v3, %v1391_v17  ;;  %v1539_v22 = vadd.f32 %v1516_v5, %v1390_v18  ;;  %1550 = vst.msk [vmem:[#allocation3 + $0x38] sm:$0x7f] %vm1384_vm3, %v1542_v13  ;;  %v2235_v5 = vld [vmem:[#allocation15 + $0x30] sm:$0xff] }
 0x382   : > { %v1551_v23 = vld [vmem:[#allocation3] sm:$0xff]  ;;  %1549 = vst.msk [vmem:[#allocation3 + $0x30] sm:$0xff] %vm773_vm1, %v1541_v19  ;;  %v5243_v7 = vpack.c.bf16 %v2236_v6, %v2235_v5 }
 0x383   : > { %v1559_v24 = vmax.f32 %v1551_v23, 0.0  ;;  %1546 = vst.msk [vmem:[#allocation3 + $0x18] sm:$0xff] %vm773_vm1, %v1538_v20  ;;  %1548 = vst.msk [vmem:[#allocation3 + $0x28] sm:$0xff] %vm773_vm1, %v1540_v21  ;;  %v2438_v17 = vld [vmem:[%s6906_s22] sm:$0xff]  ;;  %v4410_v20 = vld [vmem:[#allocation16 + $0x1] ss:$0 sm:$0xff] }
 0x384   : > { %1547 = vst.msk [vmem:[#allocation3 + $0x20] sm:$0xff] %vm773_vm1, %v1539_v22 }
 0x385   : > { %v1567_v25 = vadd.f32 %v1559_v24, %v6313_v44 }
 0x386   : > { %v1552_v27 = vld [vmem:[#allocation3 + $0x8] sm:$0xff]  ;;  %v1553_v28 = vld [vmem:[#allocation3 + $0x10] sm:$0xff] }
 0x387   : > { %v1560_v30 = vmax.f32 %v1552_v27, 0.0  ;;  %1575 = vst.msk [vmem:[#allocation2] sm:$0xff] %vm773_vm1, %v1567_v25  ;;  %v1561_v31 = vmax.f32 %v1553_v28, 0.0 }
 0x388   : > { %v1558_v32 = vld [vmem:[#allocation3 + $0x38] sm:$0xff] }
 0x389   : > { %v1568_v33 = vadd.f32 %v1560_v30, %v6320_v47  ;;  %v1569_v34 = vadd.f32 %v1561_v31, %v6327_v55  ;;  %v1566_v35 = vmax.f32 %v1558_v32, 0.0  ;;  %v1557_v36 = vld [vmem:[#allocation3 + $0x30] sm:$0xff] }
 0x38a   : > { %v1554_v39 = vld [vmem:[#allocation3 + $0x18] sm:$0xff]  ;;  %v1556_v40 = vld [vmem:[#allocation3 + $0x28] sm:$0xff]  ;;  %v1565_v42 = vmax.f32 %v1557_v36, 0.0 }
 0x38b   : > { %v1555_v41 = vld [vmem:[#allocation3 + $0x20] sm:$0xff]  ;;  %1576 = vst.msk [vmem:[#allocation2 + $0x8] sm:$0xff] %vm773_vm1, %v1568_v33  ;;  %v1562_v44 = vmax.f32 %v1554_v39, 0.0  ;;  %1577 = vst.msk [vmem:[#allocation2 + $0x10] sm:$0xff] %vm773_vm1, %v1569_v34  ;;  %v1564_v43 = vmax.f32 %v1556_v40, 0.0  ;;  %v1574_v46 = vadd.f32 %v1566_v35, %v6364_v0  ;;  %v1913_v0 = vld [vmem:[#allocation12 + $0x38] sm:$0xff] }
 0x38c   : > { %v1563_v45 = vmax.f32 %v1555_v41, 0.0  ;;  %v1573_v47 = vadd.f32 %v1565_v42, %v6360_v63 }
 0x38d   : > { %v1570_v55 = vadd.f32 %v1562_v44, %v6334_v56  ;;  %v1572_v48 = vadd.f32 %v1564_v43, %v6348_v62  ;;  %1582 = vst.msk [vmem:[#allocation2 + $0x38] sm:$0xff] %vm773_vm1, %v1574_v46  ;;  %v5226_v56 = vpack.c.bf16 %v1911_v51, %v1910_v50 }
 0x38e   : > { %v1571_v49 = vadd.f32 %v1563_v45, %v6341_v61  ;;  %1581 = vst.msk [vmem:[#allocation2 + $0x30] sm:$0xff] %vm773_vm1, %v1573_v47  ;;  %v6457_v53 = vld [vmem:[#allocation2] sm:$0xff] }
 0x38f   : > { %1578 = vst.msk [vmem:[#allocation2 + $0x18] sm:$0xff] %vm773_vm1, %v1570_v55  ;;  %1580 = vst.msk [vmem:[#allocation2 + $0x28] sm:$0xff] %vm773_vm1, %v1572_v48  ;;  %4854 = vmatprep.mubr.msk.f32.mxu0 %vm773_vm1, %v6457_v53  ;;  %4875 = vmatmul.mubr.msk.f32.vlgmr.msra.gmra.mrb[22].mxu1 %vm773_vm1, %v6457_v53  ;;  %v1912_v61 = vld [vmem:[#allocation12 + $0x30] sm:$0xff] }
 0x390   : > { %1579 = vst.msk [vmem:[#allocation2 + $0x20] sm:$0xff] %vm773_vm1, %v1571_v49  ;;  %4877 = vmatprep.mubr.msk.f32.mxu1 %vm5869_vm2, %v5870_v26  ;;  %5234 = vmatpush3.bf16.msra.mxu1 %v6402_v29  ;;  %v5229_v29 = vpack.c.bf16 %v1913_v0, %v1912_v61 }
 0x391   : > { %5236 = vmatprep.subr.bf16.mxu1 %v5235_v52 }
 0x392   : > { %v6469_v62 = vld [vmem:[#allocation2 + $0x8] sm:$0xff]  ;;  %v6471_v63 = vld [vmem:[#allocation2 + $0x10] sm:$0xff] }
 0x393   : > { %4855 = vmatmul.mubr.msk.f32.vlgmr.msra.gmra.mrb[22].mxu0 %vm773_vm1, %v6469_v62  ;;  %4878 = vmatmul.mubr.msk.f32.gmra.mrb[24].mxu1 %vm773_vm1, %v6469_v62  ;;  %v2224_v9 = vld [vmem:[#allocation2 + $0x2] sm:$0xff]  ;;  %v2225_v10 = vld [vmem:[#allocation2 + $0xa] sm:$0xff] }
 0x394   : > { %4857 = vmatprep.mubr.msk.f32.mxu0 %vm773_vm1, %v6471_v63  ;;  %5227 = vmatpush3.bf16.msra.mxu0 %v5226_v56  ;;  %v6506_v4 = vld [vmem:[#allocation2 + $0x38] sm:$0xff] }
 0x395   : > { %4880 = vmatprep.mubr.msk.f32.mxu1 %vm5869_vm2, %v5870_v26  ;;  %5228 = vmatprep.subr.bf16.mxu0 %v5868_v16  ;;  %v6500_v3 = vld [vmem:[#allocation2 + $0x30] sm:$0xff]  ;;  %v2064_v8 = vld [vmem:[#allocation2 + $0x38] sm:$0x3f] }
 0x396   : > { %v6482_v59 = vld [vmem:[#allocation2 + $0x18] sm:$0xff]  ;;  %5238 = vmatpush3.bf16.msra.mxu1 %v5235_v52  ;;  %v6494_v2 = vld [vmem:[#allocation2 + $0x28] sm:$0xff] }
 0x397   : > { %v6484_v1 = vld [vmem:[#allocation2 + $0x20] sm:$0xff]  ;;  %4858 = vmatmul.mubr.msk.f32.gmra.mrb[24].mxu0 %vm773_vm1, %v6482_v59  ;;  %4881 = vmatmul.mubr.msk.f32.gmra.mrb[26].mxu1 %vm773_vm1, %v6471_v63  ;;  %v2226_v11 = vld [vmem:[#allocation2 + $0x12] sm:$0xff]  ;;  %v2229_v13 = vld [vmem:[#allocation2 + $0x2a] sm:$0xff] }
 0x398   : > { %4860 = vmatprep.mubr.msk.f32.mxu0 %vm773_vm1, %v6484_v1  ;;  %4883 = vmatprep.mubr.msk.f32.mxu1 %vm5869_vm2, %v5870_v26  ;;  %v2227_v12 = vld [vmem:[#allocation2 + $0x1a] sm:$0xff]  ;;  %v2228_v60 = vld [vmem:[#allocation2 + $0x22] sm:$0xff]  ;;  %v2230_v14 = vld [vmem:[#allocation2 + $0x32] sm:$0xff] }
 0x399   : > { %5230 = vmatpush3.bf16.msra.mxu0 %v5229_v29  ;;  %v2231_v15 = vld [vmem:[#allocation2 + $0x3a] sm:$0x3f] }
 0x39a   : > { %5240 = vmatprep.subr.bf16.mxu0 %v5239_v57 }
 0x39b   : > { %4861 = vmatmul.mubr.msk.f32.gmra.mrb[26].mxu0 %vm773_vm1, %v6494_v2  ;;  %4884 = vmatmul.mubr.msk.f32.gmra.mrb[28].mxu1 %vm773_vm1, %v6482_v59 }
 0x39c   : > { %4863 = vmatprep.mubr.msk.f32.mxu0 %vm773_vm1, %v6500_v3  ;;  %4886 = vmatprep.mubr.msk.f32.mxu1 %vm5869_vm2, %v5870_v26 }
 0x39f   : > { %4864 = vmatmul.mubr.msk.f32.gmra.mrb[28].mxu0 %vm773_vm1, %v6506_v4  ;;  %4887 = vmatmul.mubr.msk.f32.gmra.mrb[30].mxu1 %vm773_vm1, %v6484_v1 }
 0x3a0   : > { %4889 = vmatprep.mubr.msk.f32.mxu1 %vm5869_vm2, %v5870_v26  ;;  %4903 = vmatprep.mubr.msk.f32.mxu0 %vm5869_vm2, %v5870_v26 }
 0x3a3   : > { %4890 = vmatmul.mubr.msk.f32.gmra.mrb[32].mxu1 %vm773_vm1, %v6494_v2  ;;  %4904 = vmatmul.mubr.msk.f32.vlgmr.msra.gmra.mrb[30].mxu0 %vm773_vm1, %v6469_v62 }
 0x3a4   : > { %4892 = vmatprep.mubr.msk.f32.mxu1 %vm5869_vm2, %v5870_v26  ;;  %4906 = vmatprep.mubr.msk.f32.mxu0 %vm5869_vm2, %v5870_v26 }
 0x3a5   : > { %5242 = vmatpush3.bf16.msra.mxu0 %v5239_v57 }
 0x3a6   : > { %5244 = vmatprep.subr.bf16.mxu0 %v5243_v7 }
 0x3a7   : > { %4893 = vmatmul.mubr.msk.f32.gmra.mrb[34].mxu1 %vm773_vm1, %v6500_v3  ;;  %4907 = vmatmul.mubr.msk.f32.gmra.mrb[32].mxu0 %vm773_vm1, %v6471_v63 }
 0x3a8   : > { %4932 = vmatprep.mubr.msk.f32.mxu1 %vm773_vm1, %v6457_v53  ;;  %4909 = vmatprep.mubr.msk.f32.mxu0 %vm5869_vm2, %v5870_v26 }
 0x3a9   : > { %5246 = vmatpush3.bf16.msra.mxu0 %v5243_v7 }
 0x3ab   : > { %4910 = vmatmul.mubr.msk.f32.gmra.mrb[34].mxu0 %vm773_vm1, %v6482_v59  ;;  %4933 = vmatmul.mubr.msk.f32.vlgmr.msra.gmra.mrb[36].mxu1 %vm773_vm1, %v6469_v62 }
 0x3ac   : > { %4935 = vmatprep.mubr.msk.f32.mxu1 %vm773_vm1, %v6471_v63  ;;  %4912 = vmatprep.mubr.msk.f32.mxu0 %vm5869_vm2, %v5870_v26 }
 0x3af   : > { %4913 = vmatmul.mubr.msk.f32.gmra.mrb[36].mxu0 %vm773_vm1, %v6484_v1  ;;  %4936 = vmatmul.mubr.msk.f32.gmra.mrb[38].mxu1 %vm773_vm1, %v6482_v59 }
 0x3b0   : > { %4938 = vmatprep.mubr.msk.f32.mxu1 %vm773_vm1, %v6484_v1  ;;  %4915 = vmatprep.mubr.msk.f32.mxu0 %vm5869_vm2, %v5870_v26 }
 0x3b3   : > { %4916 = vmatmul.mubr.msk.f32.gmra.mrb[38].mxu0 %vm773_vm1, %v6494_v2  ;;  %4939 = vmatmul.mubr.msk.f32.gmra.mrb[40].mxu1 %vm773_vm1, %v6494_v2 }
 0x3b4   : > { %4941 = vmatprep.mubr.msk.f32.mxu1 %vm773_vm1, %v6500_v3  ;;  %4918 = vmatprep.mubr.msk.f32.mxu0 %vm5869_vm2, %v5870_v26 }
 0x3b7   : > { %4919 = vmatmul.mubr.msk.f32.gmra.mrb[40].mxu0 %vm773_vm1, %v6500_v3  ;;  %4942 = vmatmul.mubr.msk.f32.gmra.mrb[42].mxu1 %vm773_vm1, %v2064_v8 }
 0x3b8   : > { %4921 = vmatprep.mubr.msk.f32.mxu0 %vm5869_vm2, %v5870_v26  ;;  %4980 = vmatprep.mubr.msk.f32.mxu1 %vm2442_vm4, %v2438_v17 }
 0x3bb   : > { %4922 = vmatmul.mubr.msk.f32.gmra.mrb[42].mxu0 %vm773_vm1, %v6506_v4 }
 0x3bc   : > { %4952 = vmatprep.mubr.msk.f32.mxu0 %vm773_vm1, %v2224_v9 }
 0x3bf   : > { %4953 = vmatmul.mubr.msk.f32.vlgmr.msra.gmra.mrb[44].mxu0 %vm773_vm1, %v2225_v10 }
 0x3c0   : > { %4955 = vmatprep.mubr.msk.f32.mxu0 %vm773_vm1, %v2226_v11 }
 0x3c3   : > { %4956 = vmatmul.mubr.msk.f32.gmra.mrb[46].mxu0 %vm773_vm1, %v2227_v12 }
 0x3c4   : > { %4958 = vmatprep.mubr.msk.f32.mxu0 %vm773_vm1, %v2228_v60 }
 0x3c7   : > { %4959 = vmatmul.mubr.msk.f32.gmra.mrb[48].mxu0 %vm773_vm1, %v2229_v13 }
 0x3c8   : > { %4961 = vmatprep.mubr.msk.f32.mxu0 %vm773_vm1, %v2230_v14 }
 0x3cb   : > { %4962 = vmatmul.mubr.msk.f32.gmra.mrb[50].mxu0 %vm773_vm1, %v2231_v15 }
 0x462   : > { %v1847_v18 = vpop.f32.mrb[22].mxu1 }
 0x463   : > { %v4876_v19 = vpop.f32.mrb[23].mxu1 }
 0x466   : > { %v4856_v21 = vpop.f32.mrb[22].mxu0  ;;  %v1852_v22 = vpop.f32.mrb[24].mxu1 }
 0x467   : > { %v1700_v23 = vadd.f32 %v4856_v21, %v4410_v20  ;;  %v1694_v24 = vpop.f32.mrb[23].mxu0  ;;  %v4879_v25 = vpop.f32.mrb[25].mxu1 }
 0x468   : > { %v1695_v27 = vadd.f32 %v4410_v20, %v1694_v24 }
 0x469   : > { %1734 = vst.msk [vmem:[#allocation3 + $0x8] sm:$0xff] %vm773_vm1, %v1700_v23 }
 0x46a   : > { %1733 = vst.msk [vmem:[#allocation3] sm:$0xff] %vm773_vm1, %v1695_v27  ;;  %v4859_v28 = vpop.f32.mrb[24].mxu0  ;;  %v1857_v30 = vpop.f32.mrb[26].mxu1 }
 0x46b   : > { %v1710_v31 = vadd.f32 %v4859_v28, %v4410_v20  ;;  %v1704_v32 = vpop.f32.mrb[25].mxu0  ;;  %v4882_v33 = vpop.f32.mrb[27].mxu1 }
 0x46c   : > { %v1705_v34 = vadd.f32 %v4410_v20, %v1704_v32 }
 0x46d   : > { %1736 = vst.msk [vmem:[#allocation3 + $0x18] sm:$0xff] %vm773_vm1, %v1710_v31 }
 0x46e   : > { %1735 = vst.msk [vmem:[#allocation3 + $0x10] sm:$0xff] %vm773_vm1, %v1705_v34  ;;  %v4862_v35 = vpop.f32.mrb[26].mxu0  ;;  %v1862_v36 = vpop.f32.mrb[28].mxu1 }
 0x46f   : > { %v1720_v37 = vadd.f32 %v4862_v35, %v4410_v20  ;;  %v1714_v38 = vpop.f32.mrb[27].mxu0  ;;  %v4885_v39 = vpop.f32.mrb[29].mxu1 }
 0x470   : > { %v1715_v40 = vadd.f32 %v4410_v20, %v1714_v38  ;;  %v1741_v41 = vld [vmem:[#allocation3 + $0x8] sm:$0xff] }
 0x471   : > { %1738 = vst.msk [vmem:[#allocation3 + $0x28] sm:$0xff] %vm773_vm1, %v1720_v37  ;;  %v1881_v42 = vadd.f32 %v1847_v18, %v1741_v41  ;;  %v1895_v52 = vld [vmem:[#allocation3] sm:$0xff] }
 0x472   : > { %1737 = vst.msk [vmem:[#allocation3 + $0x20] sm:$0xff] %vm773_vm1, %v1715_v40  ;;  %v4865_v44 = vpop.f32.mrb[28].mxu0  ;;  %v1867_v43 = vpop.f32.mrb[30].mxu1 }
 0x473   : > { %v1730_v45 = vadd.f32 %v4865_v44, %v4410_v20  ;;  %v1724_v46 = vpop.f32.mrb[29].mxu0  ;;  %v4888_v47 = vpop.f32.mrb[31].mxu1  ;;  %1888 = vst.msk [vmem:[#allocation3 + $0x8] sm:$0xff] %vm773_vm1, %v1881_v42 }
 0x474   : > { %v1743_v55 = vld [vmem:[#allocation3 + $0x18] sm:$0xff]  ;;  %v1725_v48 = vadd.f32 %v4410_v20, %v1724_v46 }
 0x475   : > { %v1883_v49 = vadd.f32 %v1857_v30, %v1743_v55  ;;  %1740 = vst.msk [vmem:[#allocation3 + $0x38] sm:$0xff] %vm773_vm1, %v1730_v45  ;;  %v1742_v50 = vld [vmem:[#allocation3 + $0x10] sm:$0xff] }
 0x476   : > { %1739 = vst.msk [vmem:[#allocation3 + $0x30] sm:$0xff] %vm773_vm1, %v1725_v48  ;;  %v1872_v51 = vpop.f32.mrb[32].mxu1  ;;  %v2001_v56 = vpop.f32.mrb[30].mxu0  ;;  %v1882_v61 = vadd.f32 %v1852_v22, %v1742_v50 }
 0x477   : > { %1890 = vst.msk [vmem:[#allocation3 + $0x18] sm:$0xff] %vm773_vm1, %v1883_v49  ;;  %v2035_v0 = vadd.f32 %v2001_v56, %v1895_v52  ;;  %v4891_v54 = vpop.f32.mrb[33].mxu1  ;;  %v4905_v58 = vpop.f32.mrb[31].mxu0 }
 0x478   : > { %v1745_v29 = vld [vmem:[#allocation3 + $0x28] sm:$0xff]  ;;  %1889 = vst.msk [vmem:[#allocation3 + $0x10] sm:$0xff] %vm773_vm1, %v1882_v61 }
 0x479   : > { %v1885_v57 = vadd.f32 %v1867_v43, %v1745_v29  ;;  %2042 = vst.msk [vmem:[#allocation3] sm:$0xff] %vm773_vm1, %v2035_v0  ;;  %v1744_v5 = vld [vmem:[#allocation3 + $0x20] sm:$0xff] }
 0x47a   : > { %v1877_v6 = vpop.f32.mrb[34].mxu1  ;;  %v1896_v7 = vld [vmem:[#allocation3 + $0x8] sm:$0xff]  ;;  %v2006_v8 = vpop.f32.mrb[32].mxu0  ;;  %v1884_v9 = vadd.f32 %v1862_v36, %v1744_v5 }
 0x47b   : > { %1892 = vst.msk [vmem:[#allocation3 + $0x28] sm:$0xff] %vm773_vm1, %v1885_v57  ;;  %v2036_v10 = vadd.f32 %v2006_v8, %v1896_v7  ;;  %v4894_v11 = vpop.f32.mrb[35].mxu1  ;;  %v4908_v12 = vpop.f32.mrb[33].mxu0 }
 0x47c   : > { %v1747_v60 = vld [vmem:[#allocation3 + $0x38] sm:$0xff]  ;;  %1891 = vst.msk [vmem:[#allocation3 + $0x20] sm:$0xff] %vm773_vm1, %v1884_v9 }
 0x47d   : > { %v1746_v13 = vld [vmem:[#allocation3 + $0x30] sm:$0xff]  ;;  %v1887_v14 = vadd.f32 %v1877_v6, %v1747_v60  ;;  %2043 = vst.msk [vmem:[#allocation3 + $0x8] sm:$0xff] %vm773_vm1, %v2036_v10 }
 0x47e   : > { %v1886_v15 = vadd.f32 %v1872_v51, %v1746_v13  ;;  %v2011_v17 = vpop.f32.mrb[34].mxu0  ;;  %v4934_v18 = vpop.f32.mrb[36].mxu1  ;;  %v1898_v23 = vld [vmem:[#allocation3 + $0x18] sm:$0xff] }
 0x47f   : > { %1894 = vst.msk [vmem:[#allocation3 + $0x38] sm:$0xff] %vm773_vm1, %v1887_v14  ;;  %v1897_v19 = vld [vmem:[#allocation3 + $0x10] sm:$0xff]  ;;  %v4911_v20 = vpop.f32.mrb[35].mxu0  ;;  %v2160_v21 = vpop.f32.mrb[37].mxu1 }
 0x480   : > { %1893 = vst.msk [vmem:[#allocation3 + $0x30] sm:$0xff] %vm773_vm1, %v1886_v15  ;;  %v2037_v22 = vadd.f32 %v2011_v17, %v1897_v19 }
 0x482   : > { %2044 = vst.msk [vmem:[#allocation3 + $0x10] sm:$0xff] %vm773_vm1, %v2037_v22  ;;  %v2016_v24 = vpop.f32.mrb[36].mxu0  ;;  %v4937_v25 = vpop.f32.mrb[38].mxu1  ;;  %v1900_v41 = vld [vmem:[#allocation3 + $0x28] sm:$0xff] }
 0x483   : > { %v2038_v27 = vadd.f32 %v2016_v24, %v1898_v23  ;;  %v4914_v28 = vpop.f32.mrb[37].mxu0  ;;  %v2170_v30 = vpop.f32.mrb[39].mxu1  ;;  %v1899_v33 = vld [vmem:[#allocation3 + $0x20] sm:$0xff] }
 0x484   : > { %v2049_v31 = vld [vmem:[#allocation3 + $0x2] sm:$0xff] }
 0x485   : > { %v2199_v32 = vadd.f32 %v2160_v21, %v2049_v31  ;;  %2045 = vst.msk [vmem:[#allocation3 + $0x18] sm:$0xff] %vm773_vm1, %v2038_v27 }
 0x486   : > { %v2021_v34 = vpop.f32.mrb[38].mxu0  ;;  %v4940_v35 = vpop.f32.mrb[40].mxu1  ;;  %v2056_v44 = vld [vmem:[#allocation3 + $0x3a] sm:$0x3f] }
 0x487   : > { %2207 = vst.msk [vmem:[#allocation3 + $0x2] sm:$0xff] %vm773_vm1, %v2199_v32  ;;  %v2039_v36 = vadd.f32 %v2021_v34, %v1899_v33  ;;  %v4917_v37 = vpop.f32.mrb[39].mxu0  ;;  %v2180_v38 = vpop.f32.mrb[41].mxu1  ;;  %v1901_v50 = vld [vmem:[#allocation3 + $0x30] sm:$0xff] }
 0x489   : > { %v2050_v39 = vld [vmem:[#allocation3 + $0xa] sm:$0xff]  ;;  %2046 = vst.msk [vmem:[#allocation3 + $0x20] sm:$0xff] %vm773_vm1, %v2039_v36 }
 0x48a   : > { %v2200_v40 = vadd.f32 %v4934_v18, %v2050_v39  ;;  %v2026_v42 = vpop.f32.mrb[40].mxu0  ;;  %v4943_v43 = vpop.f32.mrb[42].mxu1 }
 0x48b   : > { %v2040_v45 = vadd.f32 %v2026_v42, %v1900_v41  ;;  %v2206_v46 = vadd.f32 %v4943_v43, %v2056_v44  ;;  %v4920_v47 = vpop.f32.mrb[41].mxu0  ;;  %v2190_v55 = vpop.f32.mrb[43].mxu1 }
 0x48c   : > { %2208 = vst.msk [vmem:[#allocation3 + $0xa] sm:$0xff] %vm773_vm1, %v2200_v40  ;;  %v2051_v48 = vld [vmem:[#allocation3 + $0x12] sm:$0xff] }
 0x48d   : > { %v2201_v49 = vadd.f32 %v2170_v30, %v2051_v48  ;;  %2047 = vst.msk [vmem:[#allocation3 + $0x28] sm:$0xff] %vm773_vm1, %v2040_v45 }
 0x48e   : > { %2215 = vst.msk [vmem:[#allocation3 + $0x3a] sm:$0x3f] %vm2214_vm5, %v2206_v46  ;;  %v2031_v51 = vpop.f32.mrb[42].mxu0  ;;  %v2216_v29 = vld [vmem:[#allocation3] sm:$0xff] }
 0x48f   : > { %2209 = vst.msk [vmem:[#allocation3 + $0x12] sm:$0xff] %vm773_vm1, %v2201_v49  ;;  %v2041_v52 = vadd.f32 %v2031_v51, %v1901_v50  ;;  %v4923_v56 = vpop.f32.mrb[43].mxu0 }
 0x490   : > { %v2052_v61 = vld [vmem:[#allocation3 + $0x1a] sm:$0xff] }
 0x491   : > { %v2202_v0 = vadd.f32 %v4937_v25, %v2052_v61  ;;  %2048 = vst.msk [vmem:[#allocation3 + $0x30] sm:$0xff] %vm773_vm1, %v2041_v52 }
 0x492   : > { %v4954_v54 = vpop.f32.mrb[44].mxu0 }
 0x493   : > { %2210 = vst.msk [vmem:[#allocation3 + $0x1a] sm:$0xff] %vm773_vm1, %v2202_v0  ;;  %v2217_v58 = vld [vmem:[#allocation3 + $0x8] sm:$0xff]  ;;  %v2327_v57 = vpop.f32.mrb[45].mxu0 }
 0x494   : > { %v2053_v5 = vld [vmem:[#allocation3 + $0x22] sm:$0xff]  ;;  %v2367_v6 = vadd.f32 %v4954_v54, %v2217_v58  ;;  %v2366_v7 = vadd.f32 %v2327_v57, %v2216_v29 }
 0x495   : > { %v2203_v8 = vadd.f32 %v2180_v38, %v2053_v5 }
 0x496   : > { %2375 = vst.msk [vmem:[#allocation3 + $0x8] sm:$0xff] %vm773_vm1, %v2367_v6  ;;  %2374 = vst.msk [vmem:[#allocation3] sm:$0xff] %vm773_vm1, %v2366_v7  ;;  %v4957_v9 = vpop.f32.mrb[46].mxu0  ;;  %v2218_v10 = vld [vmem:[#allocation3 + $0x10] sm:$0xff] }
 0x497   : > { %2211 = vst.msk [vmem:[#allocation3 + $0x22] sm:$0xff] %vm773_vm1, %v2203_v8  ;;  %v2337_v11 = vpop.f32.mrb[47].mxu0 }
 0x498   : > { %v2054_v12 = vld [vmem:[#allocation3 + $0x2a] sm:$0xff]  ;;  %v2055_v60 = vld [vmem:[#allocation3 + $0x32] sm:$0xff]  ;;  %v2368_v13 = vadd.f32 %v2337_v11, %v2218_v10 }
 0x499   : > { %v2204_v14 = vadd.f32 %v4940_v35, %v2054_v12  ;;  %v2205_v15 = vadd.f32 %v2190_v55, %v2055_v60 }
 0x49a   : > { %v2219_v17 = vld [vmem:[#allocation3 + $0x18] sm:$0xff]  ;;  %2376 = vst.msk [vmem:[#allocation3 + $0x10] sm:$0xff] %vm773_vm1, %v2368_v13  ;;  %v4960_v18 = vpop.f32.mrb[48].mxu0 }
 0x49b   : > { %2212 = vst.msk [vmem:[#allocation3 + $0x2a] sm:$0xff] %vm773_vm1, %v2204_v14  ;;  %2213 = vst.msk [vmem:[#allocation3 + $0x32] sm:$0xff] %vm773_vm1, %v2205_v15  ;;  %v2369_v19 = vadd.f32 %v4957_v9, %v2219_v17  ;;  %v2347_v20 = vpop.f32.mrb[49].mxu0 }
 0x49d   : > { %v2383_v21 = vld [vmem:[#allocation3 + $0x8] sm:$0xff]  ;;  %v2382_v22 = vld [vmem:[#allocation3] sm:$0xff]  ;;  %2377 = vst.msk [vmem:[#allocation3 + $0x18] sm:$0xff] %vm773_vm1, %v2369_v19 }
 0x49e   : > { %v2391_v23 = vmax.f32 %v2383_v21, 0.0  ;;  %v2390_v24 = vmax.f32 %v2382_v22, 0.0  ;;  %v2220_v25 = vld [vmem:[#allocation3 + $0x20] sm:$0xff]  ;;  %v4963_v27 = vpop.f32.mrb[50].mxu0  ;;  %v2439_v22 = vld [vmem:[%s6906_s22 + $0x8] sm:$0xff] }
 0x49f   : > { %v2370_v28 = vadd.f32 %v2347_v20, %v2220_v25  ;;  %v2357_v30 = vpop.f32.mrb[51].mxu0  ;;  %v2553_v25 = vld [vmem:[#allocation9 + $0x40] sm:$0xff] }
 0x4a0   : > { %v2399_v31 = vadd.f32 %v2391_v23, %v6469_v62  ;;  %v2398_v32 = vadd.f32 %v2390_v24, %v6457_v53  ;;  %v2440_v23 = vld [vmem:[%s6906_s22 + $0x10] sm:$0xff]  ;;  %v2441_v24 = vld [vmem:[%s6906_s22 + $0x18] sm:$0xff] }
 0x4a1   : > { %v2384_v33 = vld [vmem:[#allocation3 + $0x10] sm:$0xff]  ;;  %2378 = vst.msk [vmem:[#allocation3 + $0x20] sm:$0xff] %vm773_vm1, %v2370_v28 }
 0x4a2   : > { %2407 = vst.msk [vmem:[#allocation2 + $0x8] sm:$0xff] %vm773_vm1, %v2399_v31  ;;  %2406 = vst.msk [vmem:[#allocation2] sm:$0xff] %vm773_vm1, %v2398_v32  ;;  %v2392_v34 = vmax.f32 %v2384_v33, 0.0  ;;  %v2221_v35 = vld [vmem:[#allocation3 + $0x28] sm:$0xff]  ;;  %v2223_v36 = vld [vmem:[#allocation3 + $0x38] sm:$0x3f] }
 0x4a3   : > { %v2222_v37 = vld [vmem:[#allocation3 + $0x30] sm:$0xff]  ;;  %v2371_v38 = vadd.f32 %v4960_v18, %v2221_v35  ;;  %v2373_v39 = vadd.f32 %v4963_v27, %v2223_v36  ;;  %v2554_v27 = vld [vmem:[#allocation9 + $0x48] sm:$0xff]  ;;  %v2555_v33 = vld [vmem:[#allocation9 + $0x50] sm:$0xff] }
 0x4a4   : > { %v2372_v40 = vadd.f32 %v2357_v30, %v2222_v37  ;;  %v2385_v41 = vld [vmem:[#allocation3 + $0x18] sm:$0xff]  ;;  %v2400_v42 = vadd.f32 %v2392_v34, %v6471_v63  ;;  %v2675_v28 = vld [vmem:[#allocation10 + $0x40] sm:$0xff]  ;;  %v5265_v30 = vpack.c.bf16 %v2554_v27, %v2553_v25  ;;  %v2556_v34 = vld [vmem:[#allocation9 + $0x58] sm:$0xff] }
 0x4a5   : > { %v2393_v62 = vmax.f32 %v2385_v41, 0.0  ;;  %2379 = vst.msk [vmem:[#allocation3 + $0x28] sm:$0xff] %vm773_vm1, %v2371_v38  ;;  %v2676_v31 = vld [vmem:[#allocation10 + $0x48] sm:$0xff]  ;;  %v2677_v35 = vld [vmem:[#allocation10 + $0x50] sm:$0xff]  ;;  %v5269_v36 = vpack.c.bf16 %v2556_v34, %v2555_v33  ;;  %v2678_v37 = vld [vmem:[#allocation10 + $0x58] sm:$0xff] }
 0x4a6   : > { %2381 = vst.msk [vmem:[#allocation3 + $0x38] sm:$0x3f] %vm2214_vm5, %v2373_v39  ;;  %v5273_v32 = vpack.c.bf16 %v2676_v31, %v2675_v28  ;;  %v5277_v38 = vpack.c.bf16 %v2678_v37, %v2677_v35  ;;  %v2794_v39 = vld [vmem:[#allocation12 + $0x40] sm:$0xff] }
 0x4a7   : > { %2380 = vst.msk [vmem:[#allocation3 + $0x30] sm:$0xff] %vm773_vm1, %v2372_v40  ;;  %2408 = vst.msk [vmem:[#allocation2 + $0x10] sm:$0xff] %vm773_vm1, %v2400_v42  ;;  %v2401_v53 = vadd.f32 %v2393_v62, %v6482_v59  ;;  %v2795_v40 = vld [vmem:[#allocation12 + $0x48] sm:$0xff]  ;;  %v2912_v41 = vld [vmem:[#allocation13 + $0x40] sm:$0xff] }
 0x4a8   : > { %v2386_v44 = vld [vmem:[#allocation3 + $0x20] sm:$0xff]  ;;  %5274 = vmatprep.subr.bf16.mxu0 %v5273_v32  ;;  %v5281_v42 = vpack.c.bf16 %v2795_v40, %v2794_v39  ;;  %v2913_v62 = vld [vmem:[#allocation13 + $0x48] sm:$0xff] }
 0x4a9   : > { %2409 = vst.msk [vmem:[#allocation2 + $0x18] sm:$0xff] %vm773_vm1, %v2401_v53  ;;  %v2394_v43 = vmax.f32 %v2386_v44, 0.0  ;;  %v2414_v46 = vld [vmem:[#allocation2] sm:$0xff]  ;;  %v2415_v52 = vld [vmem:[#allocation2 + $0x8] sm:$0xff]  ;;  %5276 = vmatpush3.bf16.msra.mxu0 %v5273_v32  ;;  %v5289_v53 = vpack.c.bf16 %v2913_v62, %v2912_v41 }
 0x4aa   : > { %v2422_v47 = vld [vmem:[#allocation2 + $0x1] sm:$0xff]  ;;  %5278 = vmatprep.subr.bf16.mxu0 %v5277_v38 }
 0x4ab   : > { %v2402_v45 = vadd.f32 %v2394_v43, %v6484_v1  ;;  %v2430_v61 = vmax.f32 %v2414_v46, %v2422_v47  ;;  %v2796_v47 = vld [vmem:[#allocation12 + $0x50] sm:$0xff] }
 0x4ac   : > { %v2387_v63 = vld [vmem:[#allocation3 + $0x28] sm:$0xff] }
 0x4ad   : > { %v2389_v55 = vld [vmem:[#allocation3 + $0x38] sm:$0xff]  ;;  %v2395_v49 = vmax.f32 %v2387_v63, 0.0  ;;  %2410 = vst.msk [vmem:[#allocation2 + $0x20] sm:$0xff] %vm773_vm1, %v2402_v45  ;;  %5280 = vmatpush3.bf16.msra.mxu0 %v5277_v38  ;;  %v2797_v63 = vld [vmem:[#allocation12 + $0x58] sm:$0xff] }
 0x4ae   : > { %v2388_v48 = vld [vmem:[#allocation3 + $0x30] sm:$0xff]  ;;  %v2397_v50 = vmax.f32 %v2389_v55, 0.0  ;;  %5290 = vmatprep.subr.bf16.mxu0 %v5289_v53  ;;  %v2914_v55 = vld [vmem:[#allocation13 + $0x50] sm:$0xff] }
 0x4af   : > { %v2396_v51 = vmax.f32 %v2388_v48, 0.0  ;;  %v2423_v56 = vld [vmem:[#allocation2 + $0x9] sm:$0xff]  ;;  %v2403_v0 = vadd.f32 %v2395_v49, %v6494_v2 }
 0x4b0   : > { %v2431_v59 = vmax.f32 %v2415_v52, %v2423_v56  ;;  %v2405_v54 = vadd.f32 %v2397_v50, %v6506_v4  ;;  %v2424_v29 = vld [vmem:[#allocation2 + $0x11] sm:$0xff]  ;;  %v2915_v48 = vld [vmem:[#allocation13 + $0x58] sm:$0xff]  ;;  %v5285_v50 = vpack.c.bf16 %v2797_v63, %v2796_v47 }
 0x4b1   : > { %v2404_v1 = vadd.f32 %v2396_v51, %v6500_v3  ;;  %2411 = vst.msk [vmem:[#allocation2 + $0x28] sm:$0xff] %vm773_vm1, %v2403_v0  ;;  %v2416_v57 = vld [vmem:[#allocation2 + $0x10] sm:$0xff]  ;;  %v2417_v5 = vld [vmem:[#allocation2 + $0x18] sm:$0xff]  ;;  %v5293_v51 = vpack.c.bf16 %v2915_v48, %v2914_v55 }
 0x4b2   : > { %v5247_v58 = vpack.c.bf16 %v2431_v59, %v2430_v61  ;;  %2413 = vst.msk [vmem:[#allocation2 + $0x38] sm:$0xff] %vm773_vm1, %v2405_v54  ;;  %v2432_v7 = vmax.f32 %v2416_v57, %v2424_v29  ;;  %v3030_v56 = vld [vmem:[#allocation15 + $0x40] sm:$0xff]  ;;  %v3031_v61 = vld [vmem:[#allocation15 + $0x48] sm:$0xff]  ;;  %v3032_v29 = vld [vmem:[#allocation15 + $0x50] sm:$0xff] }
 0x4b3   : > { %2412 = vst.msk [vmem:[#allocation2 + $0x30] sm:$0xff] %vm773_vm1, %v2404_v1  ;;  %v5297_v1 = vpack.c.bf16 %v3031_v61, %v3030_v56  ;;  %v3033_v57 = vld [vmem:[#allocation15 + $0x58] sm:$0xff] }
 0x4b4   : > { %5248 = vmatprep.subr.bf16.mxu1 %v5247_v58  ;;  %v2425_v6 = vld [vmem:[#allocation2 + $0x19] sm:$0xff] }
 0x4b5   : > { %5250 = vmatpush3.bf16.msra.mxu1 %v5247_v58  ;;  %v2433_v8 = vmax.f32 %v2417_v5, %v2425_v6  ;;  %v2418_v9 = vld [vmem:[#allocation2 + $0x20] sm:$0xff]  ;;  %v5301_v6 = vpack.c.bf16 %v3033_v57, %v3032_v29 }
 0x4b7   : > { %v5251_v2 = vpack.c.bf16 %v2433_v8, %v2432_v7 }
 0x4b8   : > { %v2419_v4 = vld [vmem:[#allocation2 + $0x28] sm:$0xff] }
 0x4b9   : > { %v2426_v10 = vld [vmem:[#allocation2 + $0x21] sm:$0xff]  ;;  %5252 = vmatprep.subr.bf16.mxu1 %v5251_v2  ;;  %v2421_v13 = vld [vmem:[#allocation2 + $0x38] sm:$0x7f] }
 0x4ba   : > { %v2427_v3 = vld [vmem:[#allocation2 + $0x29] sm:$0xff]  ;;  %v2434_v11 = vmax.f32 %v2418_v9, %v2426_v10  ;;  %v2428_v14 = vld [vmem:[#allocation2 + $0x31] sm:$0xff]  ;;  %5254 = vmatpush3.bf16.msra.mxu1 %v5251_v2  ;;  %v2429_v15 = vld [vmem:[#allocation2 + $0x39] sm:$0x7f] }
 0x4bb   : > { %v2435_v12 = vmax.f32 %v2419_v4, %v2427_v3  ;;  %v2420_v60 = vld [vmem:[#allocation2 + $0x30] sm:$0xff]  ;;  %v2437_v19 = vmax.f32 %v2421_v13, %v2429_v15  ;;  %v3167_v4 = vld [vmem:[%s6909_s1] sm:$0xff] }
 0x4bc   : > { %v2436_v17 = vmax.f32 %v2420_v60, %v2428_v14  ;;  %v4454_v10 = vld [vmem:[#allocation16 + $0x2] ss:$0 sm:$0xff] }
 0x4bd   : > { %v5255_v18 = vpack.c.bf16 %v2435_v12, %v2434_v11 }
 0x4be   : > { %v5259_v21 = vpack.c.bf16 %v2437_v19, %v2436_v17 }
 0x4bf   : > { %5256 = vmatprep.subr.bf16.mxu1 %v5255_v18 }
 0x4c0   : > { %5258 = vmatpush3.bf16.msra.mxu1 %v5255_v18 }
 0x4c1   : > { %5261 = vmatprep.subr.msk.bf16.mxu1 %vm6629_vm8, %v5259_v21 }
 0x4c4   : > { %5264 = vmatpush3.bf16.msk.msra.mxu1 %vm6629_vm8, %v5259_v21 }
 0x4c5   : > { %5266 = vmatprep.subr.bf16.mxu1 %v5265_v30 }
 0x4c7   : > { %4981 = vmatmul.mubr.msk.f32.vlgmr.msra.gmra.mrb[44].mxu1 %vm2442_vm4, %v2439_v22 }
 0x4c8   : > { %4983 = vmatprep.mubr.msk.f32.mxu1 %vm2442_vm4, %v2440_v23  ;;  %5268 = vmatpush3.bf16.msra.mxu1 %v5265_v30 }
 0x4c9   : > { %5270 = vmatprep.subr.bf16.mxu1 %v5269_v36 }
 0x4cb   : > { %4984 = vmatmul.mubr.msk.f32.gmra.mrb[46].mxu1 %vm2442_vm4, %v2441_v24 }
 0x4cc   : > { %5272 = vmatpush3.bf16.msra.mxu1 %v5269_v36 }
 0x4cd   : > { %5282 = vmatprep.subr.bf16.mxu1 %v5281_v42 }
 0x59a   : > { %v4982_v44 = vpop.f32.mrb[44].mxu1 }
 0x59b   : > { %2545 = vst.msk [vmem:[#allocation2 + $0x8] sm:$0xff] %vm773_vm1, %v4982_v44  ;;  %v2525_v43 = vpop.f32.mrb[45].mxu1 }
 0x59c   : > { %2544 = vst.msk [vmem:[#allocation2] sm:$0xff] %vm773_vm1, %v2525_v43 }
 0x59e   : > { %v4985_v45 = vpop.f32.mrb[46].mxu1 }
 0x59f   : > { %2547 = vst.msk [vmem:[#allocation2 + $0x18] sm:$0xff] %vm773_vm1, %v4985_v45  ;;  %v2535_v46 = vpop.f32.mrb[47].mxu1 }
 0x5a0   : > { %2546 = vst.msk [vmem:[#allocation2 + $0x10] sm:$0xff] %vm773_vm1, %v2535_v46 }
 0x5a2   : > { %v6659_v52 = vld [vmem:[#allocation2 + $0x8] sm:$0xff] }
 0x5a3   : > { %v6653_v49 = vld [vmem:[#allocation2] sm:$0xff] }
 0x5a4   : > { %4994 = vmatprep.mubr.msk.f32.mxu1 %vm773_vm1, %v6653_v49  ;;  %5008 = vmatprep.mubr.msk.f32.mxu0 %vm773_vm1, %v6653_v49  ;;  %v2789_v58 = vld [vmem:[#allocation2 + $0x4] sm:$0xff] }
 0x5a5   : > { %4995 = vmatmul.mubr.msk.f32.vlgmr.msra.gmra.mrb[48].mxu1 %vm773_vm1, %v6659_v52  ;;  %5009 = vmatmul.mubr.msk.f32.vlgmr.msra.gmra.mrb[52].mxu0 %vm773_vm1, %v6659_v52 }
 0x5a6   : > { %5284 = vmatpush3.bf16.msra.mxu1 %v5281_v42  ;;  %5292 = vmatpush3.bf16.msra.mxu0 %v5289_v53  ;;  %v6671_v0 = vld [vmem:[#allocation2 + $0x18] sm:$0xff] }
 0x5a7   : > { %v6665_v59 = vld [vmem:[#allocation2 + $0x10] sm:$0xff]  ;;  %5286 = vmatprep.subr.bf16.mxu1 %v5285_v50  ;;  %5294 = vmatprep.subr.bf16.mxu0 %v5293_v51  ;;  %v2673_v54 = vld [vmem:[#allocation2 + $0x18] sm:$0xf]  ;;  %v2792_v8 = vld [vmem:[#allocation2 + $0x1c] sm:$0xf] }
 0x5a8   : > { %4997 = vmatprep.mubr.msk.f32.mxu1 %vm773_vm1, %v6665_v59  ;;  %5011 = vmatprep.mubr.msk.f32.mxu0 %vm773_vm1, %v6665_v59  ;;  %v2790_v5 = vld [vmem:[#allocation2 + $0xc] sm:$0xff]  ;;  %v2791_v7 = vld [vmem:[#allocation2 + $0x14] sm:$0xff]  ;;  %v3028_v9 = vld [vmem:[#allocation2 + $0x1c] sm:$0xf] }
 0x5a9   : > { %4998 = vmatmul.mubr.msk.f32.gmra.mrb[50].mxu1 %vm773_vm1, %v6671_v0  ;;  %5012 = vmatmul.mubr.msk.f32.gmra.mrb[54].mxu0 %vm773_vm1, %v2673_v54  ;;  %v2910_v2 = vld [vmem:[#allocation2 + $0x18] sm:$0xf] }
 0x5aa   : > { %5288 = vmatpush3.bf16.msra.mxu1 %v5285_v50  ;;  %5022 = vmatprep.mubr.msk.f32.mxu1 %vm773_vm1, %v2789_v58 }
 0x5ab   : > { %5296 = vmatpush3.bf16.msra.mxu0 %v5293_v51  ;;  %5036 = vmatprep.mubr.msk.f32.mxu0 %vm773_vm1, %v6653_v49 }
 0x5ac   : > { %5298 = vmatprep.subr.bf16.mxu1 %v5297_v1 }
 0x5ad   : > { %5023 = vmatmul.mubr.msk.f32.vlgmr.msra.gmra.mrb[52].mxu1 %vm773_vm1, %v2790_v5 }
 0x5ae   : > { %5037 = vmatmul.mubr.msk.f32.vlgmr.msra.gmra.mrb[56].mxu0 %vm773_vm1, %v6659_v52  ;;  %5025 = vmatprep.mubr.msk.f32.mxu1 %vm773_vm1, %v2791_v7 }
 0x5af   : > { %5039 = vmatprep.mubr.msk.f32.mxu0 %vm773_vm1, %v6665_v59  ;;  %5300 = vmatpush3.bf16.msra.mxu1 %v5297_v1 }
 0x5b0   : > { %5302 = vmatprep.subr.bf16.mxu1 %v5301_v6 }
 0x5b1   : > { %5026 = vmatmul.mubr.msk.f32.gmra.mrb[54].mxu1 %vm773_vm1, %v2792_v8 }
 0x5b2   : > { %5040 = vmatmul.mubr.msk.f32.gmra.mrb[58].mxu0 %vm773_vm1, %v2910_v2  ;;  %5050 = vmatprep.mubr.msk.f32.mxu1 %vm773_vm1, %v2789_v58 }
 0x5b3   : > { %5304 = vmatpush3.bf16.msra.mxu1 %v5301_v6  ;;  %5064 = vmatprep.mubr.msk.f32.mxu0 %vm3169_vm9, %v3167_v4 }
 0x5b6   : > { %5051 = vmatmul.mubr.msk.f32.vlgmr.msra.gmra.mrb[56].mxu1 %vm773_vm1, %v2790_v5 }
 0x5b7   : > { %5053 = vmatprep.mubr.msk.f32.mxu1 %vm773_vm1, %v2791_v7 }
 0x5ba   : > { %5054 = vmatmul.mubr.msk.f32.gmra.mrb[58].mxu1 %vm773_vm1, %v3028_v9 }
 0x678   : > { %v4996_v3 = vpop.f32.mrb[48].mxu1  ;;  %v5010_v11 = vpop.f32.mrb[52].mxu0 }
 0x679   : > { %v2649_v12 = vadd.f32 %v4996_v3, %v4454_v10  ;;  %v2643_v60 = vpop.f32.mrb[49].mxu1  ;;  %v2757_v13 = vpop.f32.mrb[53].mxu0 }
 0x67a   : > { %v2644_v14 = vadd.f32 %v4454_v10, %v2643_v60 }
 0x67b   : > { %2663 = vst.msk [vmem:[#allocation3 + $0x8] sm:$0xff] %vm773_vm1, %v2649_v12 }
 0x67c   : > { %2662 = vst.msk [vmem:[#allocation3] sm:$0xff] %vm773_vm1, %v2644_v14  ;;  %v4999_v15 = vpop.f32.mrb[50].mxu1  ;;  %v5013_v17 = vpop.f32.mrb[54].mxu0 }
 0x67d   : > { %v2659_v18 = vadd.f32 %v4999_v15, %v4454_v10  ;;  %v2653_v19 = vpop.f32.mrb[51].mxu1  ;;  %v2767_v21 = vpop.f32.mrb[55].mxu0 }
 0x67e   : > { %v2654_v22 = vadd.f32 %v4454_v10, %v2653_v19 }
 0x67f   : > { %2665 = vst.msk [vmem:[#allocation3 + $0x18] sm:$0xff] %vm773_vm1, %v2659_v18 }
 0x680   : > { %2664 = vst.msk [vmem:[#allocation3 + $0x10] sm:$0xff] %vm773_vm1, %v2654_v22  ;;  %v5024_v23 = vpop.f32.mrb[52].mxu1 }
 0x681   : > { %v5038_v24 = vpop.f32.mrb[56].mxu0  ;;  %v2876_v25 = vpop.f32.mrb[53].mxu1 }
 0x682   : > { %v2994_v27 = vpop.f32.mrb[57].mxu0 }
 0x683   : > { %v2666_v28 = vld [vmem:[#allocation3 + $0x4] sm:$0xff] }
 0x684   : > { %v2776_v30 = vadd.f32 %v2757_v13, %v2666_v28  ;;  %v5027_v31 = vpop.f32.mrb[54].mxu1 }
 0x685   : > { %v5041_v32 = vpop.f32.mrb[58].mxu0  ;;  %v2886_v33 = vpop.f32.mrb[55].mxu1 }
 0x686   : > { %2780 = vst.msk [vmem:[#allocation3 + $0x4] sm:$0xff] %vm773_vm1, %v2776_v30  ;;  %v2669_v34 = vld [vmem:[#allocation3 + $0x1c] sm:$0xf]  ;;  %v3004_v35 = vpop.f32.mrb[59].mxu0 }
 0x687   : > { %v2779_v36 = vadd.f32 %v5013_v17, %v2669_v34  ;;  %v2668_v37 = vld [vmem:[#allocation3 + $0x14] sm:$0xff]  ;;  %v2667_v38 = vld [vmem:[#allocation3 + $0xc] sm:$0xff] }
 0x688   : > { %v2778_v39 = vadd.f32 %v2767_v21, %v2668_v37  ;;  %v2777_v40 = vadd.f32 %v5010_v11, %v2667_v38  ;;  %v3168_v34 = vld [vmem:[%s6909_s1 + $0x8] sm:$0xff]  ;;  %v3359_v37 = vld [vmem:[#allocation10 + $0x60] sm:$0xff] }
 0x689   : > { %2784 = vst.msk [vmem:[#allocation3 + $0x1c] sm:$0xf] %vm2783_vm10, %v2779_v36  ;;  %v5052_v41 = vpop.f32.mrb[56].mxu1  ;;  %v3260_v36 = vld [vmem:[#allocation9 + $0x68] sm:$0xff] }
 0x68a   : > { %2782 = vst.msk [vmem:[#allocation3 + $0x14] sm:$0xff] %vm773_vm1, %v2778_v39  ;;  %2781 = vst.msk [vmem:[#allocation3 + $0xc] sm:$0xff] %vm773_vm1, %v2777_v40  ;;  %v3112_v42 = vpop.f32.mrb[57].mxu1  ;;  %v3360_v39 = vld [vmem:[#allocation10 + $0x68] sm:$0xff] }
 0x68b   : > { %v5323_v40 = vpack.c.bf16 %v3360_v39, %v3359_v37 }
 0x68d   : > { %v2785_v62 = vld [vmem:[#allocation3] sm:$0xff]  ;;  %v5055_v53 = vpop.f32.mrb[58].mxu1 }
 0x68e   : > { %v2895_v44 = vadd.f32 %v2876_v25, %v2785_v62  ;;  %v3122_v43 = vpop.f32.mrb[59].mxu1  ;;  %v3361_v62 = vld [vmem:[#allocation10 + $0x70] sm:$0xff] }
 0x690   : > { %2899 = vst.msk [vmem:[#allocation3] sm:$0xff] %vm773_vm1, %v2895_v44  ;;  %v2906_v45 = vld [vmem:[#allocation3 + $0x1c] sm:$0xf]  ;;  %v3362_v44 = vld [vmem:[#allocation10 + $0x78] sm:$0xff] }
 0x691   : > { %v2786_v46 = vld [vmem:[#allocation3 + $0x8] sm:$0xff]  ;;  %v2788_v47 = vld [vmem:[#allocation3 + $0x18] sm:$0xf]  ;;  %v3016_v63 = vadd.f32 %v5041_v32, %v2906_v45  ;;  %v2787_v55 = vld [vmem:[#allocation3 + $0x10] sm:$0xff] }
 0x692   : > { %v2896_v48 = vadd.f32 %v5024_v23, %v2786_v46  ;;  %v2898_v50 = vadd.f32 %v5027_v31, %v2788_v47  ;;  %v2897_v51 = vadd.f32 %v2886_v33, %v2787_v55  ;;  %v3453_v45 = vld [vmem:[#allocation12 + $0x60] sm:$0xff]  ;;  %v3454_v46 = vld [vmem:[#allocation12 + $0x68] sm:$0xff] }
 0x693   : > { %3020 = vst.msk [vmem:[#allocation3 + $0x1c] sm:$0xf] %vm2783_vm10, %v3016_v63  ;;  %v5331_v47 = vpack.c.bf16 %v3454_v46, %v3453_v45 }
 0x694   : > { %2900 = vst.msk [vmem:[#allocation3 + $0x8] sm:$0xff] %vm773_vm1, %v2896_v48  ;;  %2901 = vst.msk [vmem:[#allocation3 + $0x10] sm:$0xff] %vm773_vm1, %v2897_v51  ;;  %v3545_v48 = vld [vmem:[#allocation13 + $0x60] sm:$0xff]  ;;  %v3455_v51 = vld [vmem:[#allocation12 + $0x70] sm:$0xff] }
 0x695   : > { %2902 = vst.msk [vmem:[#allocation3 + $0x18] sm:$0xf] %vm2783_vm10, %v2898_v50  ;;  %v3546_v50 = vld [vmem:[#allocation13 + $0x68] sm:$0xff] }
 0x69b   : > { %v2903_v56 = vld [vmem:[#allocation3 + $0x4] sm:$0xff]  ;;  %v2904_v54 = vld [vmem:[#allocation3 + $0xc] sm:$0xff] }
 0x69c   : > { %v2905_v61 = vld [vmem:[#allocation3 + $0x14] sm:$0xff]  ;;  %v3013_v1 = vadd.f32 %v2994_v27, %v2903_v56  ;;  %v3014_v29 = vadd.f32 %v5038_v24, %v2904_v54  ;;  %v3456_v56 = vld [vmem:[#allocation12 + $0x78] sm:$0xff] }
 0x69d   : > { %v3015_v58 = vadd.f32 %v3004_v35, %v2905_v61  ;;  %v3259_v35 = vld [vmem:[#allocation9 + $0x60] sm:$0xff]  ;;  %v5340_v61 = vpack.c.bf16 %v3546_v50, %v3545_v48 }
 0x69e   : > { %3017 = vst.msk [vmem:[#allocation3 + $0x4] sm:$0xff] %vm773_vm1, %v3013_v1  ;;  %3018 = vst.msk [vmem:[#allocation3 + $0xc] sm:$0xff] %vm773_vm1, %v3014_v29  ;;  %v5315_v38 = vpack.c.bf16 %v3260_v36, %v3259_v35  ;;  %v5335_v1 = vpack.c.bf16 %v3456_v56, %v3455_v51  ;;  %v3548_v29 = vld [vmem:[#allocation13 + $0x78] sm:$0xff] }
 0x69f   : > { %3019 = vst.msk [vmem:[#allocation3 + $0x14] sm:$0xff] %vm773_vm1, %v3015_v58  ;;  %v3547_v58 = vld [vmem:[#allocation13 + $0x70] sm:$0xff] }
 0x6a0   : > { %5316 = vmatprep.subr.bf16.mxu1 %v5315_v38 }
 0x6a1   : > { %5318 = vmatpush3.bf16.msra.mxu1 %v5315_v38 }
 0x6a5   : > { %v3022_v57 = vld [vmem:[#allocation3 + $0x8] sm:$0xff]  ;;  %v3021_v5 = vld [vmem:[#allocation3] sm:$0xff] }
 0x6a6   : > { %v3024_v6 = vld [vmem:[#allocation3 + $0x18] sm:$0xf]  ;;  %v3132_v7 = vadd.f32 %v5052_v41, %v3022_v57  ;;  %v3131_v8 = vadd.f32 %v3112_v42, %v3021_v5  ;;  %v3023_v9 = vld [vmem:[#allocation3 + $0x10] sm:$0xff]  ;;  %v3261_v41 = vld [vmem:[#allocation9 + $0x70] sm:$0xff] }
 0x6a7   : > { %v3134_v2 = vadd.f32 %v5055_v53, %v3024_v6  ;;  %v3133_v4 = vadd.f32 %v3122_v43, %v3023_v9  ;;  %v3262_v42 = vld [vmem:[#allocation9 + $0x78] sm:$0xff]  ;;  %v5327_v43 = vpack.c.bf16 %v3362_v44, %v3361_v62 }
 0x6a8   : > { %3136 = vst.msk [vmem:[#allocation3 + $0x8] sm:$0xff] %vm773_vm1, %v3132_v7  ;;  %3135 = vst.msk [vmem:[#allocation3] sm:$0xff] %vm773_vm1, %v3131_v8  ;;  %v5319_v53 = vpack.c.bf16 %v3262_v42, %v3261_v41  ;;  %v5343_v7 = vpack.c.bf16 %v3548_v29, %v3547_v58  ;;  %v3627_v8 = vld [vmem:[#allocation15 + $0x60] sm:$0xff] }
 0x6a9   : > { %3138 = vst.msk [vmem:[#allocation3 + $0x18] sm:$0xf] %vm2783_vm10, %v3134_v2  ;;  %v3628_v2 = vld [vmem:[#allocation15 + $0x68] sm:$0xff] }
 0x6aa   : > { %3137 = vst.msk [vmem:[#allocation3 + $0x10] sm:$0xff] %vm773_vm1, %v3133_v4  ;;  %5320 = vmatprep.subr.bf16.mxu1 %v5319_v53  ;;  %v5346_v9 = vpack.c.bf16 %v3628_v2, %v3627_v8  ;;  %v3629_v4 = vld [vmem:[#allocation15 + $0x70] sm:$0xff] }
 0x6ab   : > { %5322 = vmatpush3.bf16.msra.mxu1 %v5319_v53 }
 0x6ac   : > { %5332 = vmatprep.subr.bf16.mxu1 %v5331_v47 }
 0x6af   : > { %v3140_v10 = vld [vmem:[#allocation3 + $0x8] sm:$0xff]  ;;  %v3139_v3 = vld [vmem:[#allocation3] sm:$0xff] }
 0x6b0   : > { %v3142_v11 = vld [vmem:[#allocation3 + $0x18] sm:$0xff]  ;;  %v3144_v12 = vmax.f32 %v3140_v10, 0.0  ;;  %v3143_v60 = vmax.f32 %v3139_v3, 0.0  ;;  %v3630_v10 = vld [vmem:[#allocation15 + $0x78] sm:$0xff] }
 0x6b1   : > { %v3146_v13 = vmax.f32 %v3142_v11, 0.0  ;;  %v3141_v14 = vld [vmem:[#allocation3 + $0x10] sm:$0xff]  ;;  %v5349_v11 = vpack.c.bf16 %v3630_v10, %v3629_v4 }
 0x6b2   : > { %v3145_v15 = vmax.f32 %v3141_v14, 0.0  ;;  %v3148_v17 = vadd.f32 %v3144_v12, %v6659_v52  ;;  %v3147_v18 = vadd.f32 %v3143_v60, %v6653_v49  ;;  %v3717_v12 = vld [vmem:[#allocation9 + $0x80] sm:$0xff]  ;;  %v3718_v60 = vld [vmem:[#allocation9 + $0x88] sm:$0xff] }
 0x6b3   : > { %v3150_v19 = vadd.f32 %v3146_v13, %v6671_v0  ;;  %v5351_v13 = vpack.c.bf16 %v3718_v60, %v3717_v12  ;;  %v3817_v14 = vld [vmem:[#allocation10 + $0x80] sm:$0xff] }
 0x6b4   : > { %v3149_v21 = vadd.f32 %v3145_v15, %v6665_v59  ;;  %3152 = vst.msk [vmem:[#allocation2 + $0x8] sm:$0xff] %vm773_vm1, %v3148_v17  ;;  %3151 = vst.msk [vmem:[#allocation2] sm:$0xff] %vm773_vm1, %v3147_v18  ;;  %v3818_v15 = vld [vmem:[#allocation10 + $0x88] sm:$0xff]  ;;  %v3719_v18 = vld [vmem:[#allocation9 + $0x90] sm:$0xff] }
 0x6b5   : > { %3154 = vst.msk [vmem:[#allocation2 + $0x18] sm:$0xff] %vm773_vm1, %v3150_v19  ;;  %v5359_v17 = vpack.c.bf16 %v3818_v15, %v3817_v14  ;;  %v3720_v19 = vld [vmem:[#allocation9 + $0x98] sm:$0xff] }
 0x6b6   : > { %3153 = vst.msk [vmem:[#allocation2 + $0x10] sm:$0xff] %vm773_vm1, %v3149_v21  ;;  %v3819_v21 = vld [vmem:[#allocation10 + $0x90] sm:$0xff] }
 0x6bb   : > { %v3155_v22 = vld [vmem:[#allocation2] sm:$0xff]  ;;  %v3156_v23 = vld [vmem:[#allocation2 + $0x8] sm:$0xff] }
 0x6bc   : > { %v3159_v24 = vld [vmem:[#allocation2 + $0x1] sm:$0xff]  ;;  %v3158_v28 = vld [vmem:[#allocation2 + $0x18] sm:$0x7f] }
 0x6bd   : > { %v3160_v25 = vld [vmem:[#allocation2 + $0x9] sm:$0xff]  ;;  %v3163_v27 = vmax.f32 %v3155_v22, %v3159_v24  ;;  %v3161_v30 = vld [vmem:[#allocation2 + $0x11] sm:$0xff]  ;;  %v3162_v0 = vld [vmem:[#allocation2 + $0x19] sm:$0x7f]  ;;  %v5355_v22 = vpack.c.bf16 %v3720_v19, %v3719_v18 }
 0x6be   : > { %v3157_v52 = vld [vmem:[#allocation2 + $0x10] sm:$0xff]  ;;  %v3164_v49 = vmax.f32 %v3156_v23, %v3160_v25  ;;  %v3166_v59 = vmax.f32 %v3158_v28, %v3162_v0  ;;  %v3820_v23 = vld [vmem:[#allocation10 + $0x98] sm:$0xff] }
 0x6bf   : > { %v3165_v31 = vmax.f32 %v3157_v52, %v3161_v30  ;;  %v5363_v24 = vpack.c.bf16 %v3820_v23, %v3819_v21  ;;  %v3911_v25 = vld [vmem:[#allocation12 + $0x80] sm:$0xff] }
 0x6c0   : > { %v5305_v32 = vpack.c.bf16 %v3164_v49, %v3163_v27  ;;  %v3912_v27 = vld [vmem:[#allocation12 + $0x88] sm:$0xff]  ;;  %v4478_v28 = vld [vmem:[#allocation16 + $0x3] ss:$0 sm:$0xff] }
 0x6c1   : > { %v5309_v33 = vpack.c.bf16 %v3166_v59, %v3165_v31  ;;  %v5367_v52 = vpack.c.bf16 %v3912_v27, %v3911_v25 }
 0x6c2   : > { %5306 = vmatprep.subr.bf16.mxu0 %v5305_v32 }
 0x6c3   : > { %5308 = vmatpush3.bf16.msra.mxu0 %v5305_v32 }
 0x6c4   : > { %5311 = vmatprep.subr.msk.bf16.mxu0 %vm6629_vm8, %v5309_v33 }
 0x6c7   : > { %5314 = vmatpush3.bf16.msk.msra.mxu0 %vm6629_vm8, %v5309_v33 }
 0x6c8   : > { %5324 = vmatprep.subr.bf16.mxu0 %v5323_v40 }
 0x6ca   : > { %5065 = vmatmul.mubr.msk.f32.vlgmr.msra.gmra.mrb[60].mxu0 %vm3169_vm9, %v3168_v34 }
 0x6cb   : > { %5326 = vmatpush3.bf16.msra.mxu0 %v5323_v40 }
 0x6cc   : > { %5328 = vmatprep.subr.bf16.mxu0 %v5327_v43 }
 0x6cf   : > { %5330 = vmatpush3.bf16.msra.mxu0 %v5327_v43 }
 0x6d0   : > { %5339 = vmatprep.subr.bf16.mxu0 %v5868_v16 }
 0x79d   : > { %v5066_v63 = vpop.f32.mrb[60].mxu0 }
 0x79e   : > { %3255 = vst.msk [vmem:[#allocation2 + $0x8] sm:$0xff] %vm773_vm1, %v5066_v63  ;;  %v3245_v55 = vpop.f32.mrb[61].mxu0 }
 0x79f   : > { %3254 = vst.msk [vmem:[#allocation2] sm:$0xff] %vm773_vm1, %v3245_v55 }
 0x7a5   : > { %v6740_v57 = vld [vmem:[#allocation2 + $0x8] sm:$0xff] }
 0x7a6   : > { %v6734_v54 = vld [vmem:[#allocation2] sm:$0xff]  ;;  %v3357_v5 = vld [vmem:[#allocation2 + $0x8] sm:$0x3f] }
 0x7a7   : > { %5075 = vmatprep.mubr.msk.f32.mxu1 %vm773_vm1, %v6734_v54  ;;  %5086 = vmatprep.mubr.msk.f32.mxu0 %vm773_vm1, %v6734_v54  ;;  %v3450_v6 = vld [vmem:[#allocation2 + $0x2] sm:$0xff]  ;;  %v3451_v3 = vld [vmem:[#allocation2 + $0xa] sm:$0x3f] }
 0x7a8   : > { %5076 = vmatmul.mubr.msk.f32.vlgmr.msra.gmra.mrb[60].mxu1 %vm773_vm1, %v6740_v57  ;;  %5087 = vmatmul.mubr.msk.f32.vlgmr.msra.gmra.mrb[62].mxu0 %vm773_vm1, %v3357_v5 }
 0x7a9   : > { %5334 = vmatpush3.bf16.msra.mxu1 %v5331_v47  ;;  %5341 = vmatpush3.bf16.msra.mxu0 %v5340_v61  ;;  %v3913_v61 = vld [vmem:[#allocation12 + $0x90] sm:$0xff] }
 0x7aa   : > { %5097 = vmatprep.mubr.msk.f32.mxu1 %vm773_vm1, %v3450_v6  ;;  %5336 = vmatprep.subr.bf16.mxu1 %v5335_v1 }
 0x7ab   : > { %5342 = vmatprep.subr.bf16.mxu0 %v5868_v16  ;;  %5108 = vmatprep.mubr.msk.f32.mxu0 %vm5869_vm2, %v5870_v26 }
 0x7ad   : > { %5338 = vmatpush3.bf16.msra.mxu1 %v5335_v1  ;;  %5344 = vmatpush3.bf16.msra.mxu0 %v5343_v7  ;;  %v3914_v1 = vld [vmem:[#allocation12 + $0x98] sm:$0xff]  ;;  %v4487_v7 = vld [vmem:[#allocation16 + $0x4] ss:$0 sm:$0xff] }
 0x7ae   : > { %5345 = vmatprep.subr.bf16.mxu1 %v5868_v16  ;;  %5352 = vmatprep.subr.bf16.mxu0 %v5351_v13  ;;  %v5371_v6 = vpack.c.bf16 %v3914_v1, %v3913_v61 }
 0x7b0   : > { %5098 = vmatmul.mubr.msk.f32.vlgmr.msra.gmra.mrb[62].mxu1 %vm773_vm1, %v3451_v3  ;;  %5109 = vmatmul.mubr.msk.f32.vlgmr.msra.gmra.mrb[64].mxu0 %vm773_vm1, %v6734_v54 }
 0x7b1   : > { %5347 = vmatpush3.bf16.msra.mxu1 %v5346_v9  ;;  %5119 = vmatprep.mubr.msk.f32.mxu1 %vm5869_vm2, %v5870_v26 }
 0x7b2   : > { %5348 = vmatprep.subr.bf16.mxu1 %v5868_v16  ;;  %5354 = vmatpush3.bf16.msra.mxu0 %v5351_v13 }
 0x7b3   : > { %5356 = vmatprep.subr.bf16.mxu0 %v5355_v22 }
 0x7b5   : > { %5350 = vmatpush3.bf16.msra.mxu1 %v5349_v11 }
 0x7b6   : > { %5360 = vmatprep.subr.bf16.mxu1 %v5359_v17  ;;  %5358 = vmatpush3.bf16.msra.mxu0 %v5355_v22 }
 0x7b7   : > { %5368 = vmatprep.subr.bf16.mxu0 %v5367_v52 }
 0x7b8   : > { %5120 = vmatmul.mubr.msk.f32.vlgmr.msra.gmra.mrb[64].mxu1 %vm773_vm1, %v6740_v57 }
 0x7b9   : > { %5362 = vmatpush3.bf16.msra.mxu1 %v5359_v17 }
 0x7ba   : > { %5364 = vmatprep.subr.bf16.mxu1 %v5363_v24 }
 0x7bd   : > { %5366 = vmatpush3.bf16.msra.mxu1 %v5363_v24 }
 0x7be   : > { %5375 = vmatprep.subr.bf16.mxu1 %v5868_v16 }
 0x87b   : > { %v5077_v49 = vpop.f32.mrb[60].mxu1  ;;  %v5088_v30 = vpop.f32.mrb[62].mxu0 }
 0x87c   : > { %v3349_v0 = vadd.f32 %v5077_v49, %v4478_v28  ;;  %v3343_v31 = vpop.f32.mrb[61].mxu1  ;;  %v3435_v59 = vpop.f32.mrb[63].mxu0 }
 0x87d   : > { %v3344_v32 = vadd.f32 %v4478_v28, %v3343_v31 }
 0x87e   : > { %3353 = vst.msk [vmem:[#allocation3 + $0x8] sm:$0xff] %vm773_vm1, %v3349_v0 }
 0x87f   : > { %3352 = vst.msk [vmem:[#allocation3] sm:$0xff] %vm773_vm1, %v3344_v32  ;;  %v4014_v32 = vld [vmem:[%s6910_s24] sm:$0xff]  ;;  %s4180_s24 = scalar_lea.sflag [#allocation6], %s6275_s11 }
 0x883   : > { %v5099_v33 = vpop.f32.mrb[62].mxu1  ;;  %v3618_v34 = vpop.f32.mrb[64].mxu0 }
 0x884   : > { %v3529_v35 = vpop.f32.mrb[63].mxu1  ;;  %v5110_v36 = vpop.f32.mrb[65].mxu0 }
 0x885   : > { %v3355_v37 = vld [vmem:[#allocation3 + $0xa] sm:$0x3f] }
 0x886   : > { %v3445_v38 = vadd.f32 %v5088_v30, %v3355_v37  ;;  %v3354_v39 = vld [vmem:[#allocation3 + $0x2] sm:$0xff]  ;;  %v4093_v37 = vld [vmem:[#allocation18] sm:$0xff] }
 0x887   : > { %v3444_v16 = vadd.f32 %v3435_v59, %v3354_v39 }
 0x888   : > { %3447 = vst.msk [vmem:[#allocation3 + $0xa] sm:$0x3f] %vm2214_vm5, %v3445_v38 }
 0x889   : > { %3446 = vst.msk [vmem:[#allocation3 + $0x2] sm:$0xff] %vm773_vm1, %v3444_v16 }
 0x88b   : > { %v3700_v40 = vpop.f32.mrb[64].mxu1 }
 0x88c   : > { %v5121_v41 = vpop.f32.mrb[65].mxu1 }
 0x890   : > { %v3449_v42 = vld [vmem:[#allocation3 + $0x8] sm:$0x3f]  ;;  %v3448_v62 = vld [vmem:[#allocation3] sm:$0xff] }
 0x891   : > { %v3539_v53 = vadd.f32 %v5099_v33, %v3449_v42  ;;  %v3538_v44 = vadd.f32 %v3529_v35, %v3448_v62  ;;  %v4095_v33 = vld [vmem:[%s6911_s28] sm:$0xff]  ;;  %s5777_s28 = scalar_lea.vmem %s5776_s14, 256 }
 0x892   : > { %p5779_p8 = scmp.lt.s32.totalorder %s5777_s28, %s5771_s25 }
 0x893   : > { %3541 = vst.msk [vmem:[#allocation3 + $0x8] sm:$0x3f] %vm2214_vm5, %v3539_v53 }
 0x894   : > { %3540 = vst.msk [vmem:[#allocation3] sm:$0xff] %vm773_vm1, %v3538_v44  ;;  %p5780_p4 = por %p5779_p8, %p5778_p2 }
 0x896   : > { %p5781_p10 = pnand %p5780_p4, %p5774_p0 }
 0x89a   : > { %v3542_v43 = vld [vmem:[#allocation3 + $0x8] sm:$0xff] }
 0x89b   : > { %v3624_v45 = vld [vmem:[#allocation3] sm:$0xff]  ;;  %v3622_v46 = vadd.f32 %v3618_v34, %v3542_v43  ;;  %v5872_v34 = vmov 0  }
 0x89c   : > { %v3704_v47 = vadd.f32 %v3700_v40, %v3624_v45  ;;  %5515 = vset.pattern.permute.xlu1 %v5872_v34  ;;  %5516 = vset.pattern.permute.xlu0 %v5872_v34 }
 0x89d   : > { %3623 = vst.msk [vmem:[#allocation3 + $0x8] sm:$0xff] %vm773_vm1, %v3622_v46  ;;  %4098 = vperm.xlu1 %5515, %v4095_v33  }
 0x89e   : > { %3705 = vst.msk [vmem:[#allocation3] sm:$0xff] %vm773_vm1, %v3704_v47 }
 0x8a4   : > { %v3707_v63 = vld [vmem:[#allocation3 + $0x8] sm:$0xff] }
 0x8a5   : > { %v3706_v55 = vld [vmem:[#allocation3] sm:$0xff]  ;;  %v3709_v48 = vmax.f32 %v3707_v63, 0.0 }
 0x8a6   : > { %v3708_v50 = vmax.f32 %v3706_v55, 0.0 }
 0x8a7   : > { %v3711_v51 = vadd.f32 %v3709_v48, %v6740_v57 }
 0x8a8   : > { %v3710_v56 = vadd.f32 %v3708_v50, %v6734_v54 }
 0x8a9   : > { %3713 = vst.msk [vmem:[#allocation2 + $0x8] sm:$0xff] %vm773_vm1, %v3711_v51 }
 0x8aa   : > { %3712 = vst.msk [vmem:[#allocation2] sm:$0xff] %vm773_vm1, %v3710_v56 }
 0x8b0   : > { %v3715_v29 = vld [vmem:[#allocation2 + $0x8] sm:$0xff] }
 0x8b1   : > { %v3714_v58 = vld [vmem:[#allocation2] sm:$0xff]  ;;  %v3815_v5 = vld [vmem:[#allocation2 + $0x8] sm:$0x7f] }
 0x8b2   : > { %5130 = vmatprep.mubr.msk.f32.mxu0 %vm773_vm1, %v3714_v58  ;;  %5141 = vmatprep.mubr.msk.f32.mxu1 %vm773_vm1, %v3714_v58  ;;  %v3908_v57 = vld [vmem:[#allocation2 + $0x1] sm:$0xff]  ;;  %v3909_v54 = vld [vmem:[#allocation2 + $0x9] sm:$0x7f] }
 0x8b3   : > { %5131 = vmatmul.mubr.msk.f32.vlgmr.msra.gmra.mrb[66].mxu0 %vm773_vm1, %v3715_v29  ;;  %5142 = vmatmul.mubr.msk.f32.vlgmr.msra.gmra.mrb[66].mxu1 %vm773_vm1, %v3815_v5 }
 0x8b4   : > { %5370 = vmatpush3.bf16.msra.mxu0 %v5367_v52  ;;  %5152 = vmatprep.mubr.msk.f32.mxu0 %vm773_vm1, %v3908_v57 }
 0x8b5   : > { %5372 = vmatprep.subr.bf16.mxu0 %v5371_v6  ;;  %5159 = vmatprep.mubr.msk.f32.mxu1 %vm5869_vm2, %v5870_v26 }
 0x8b8   : > { %5374 = vmatpush3.bf16.msra.mxu0 %v5371_v6 }
 0x8b9   : > { %5162 = vmatprep.subr.mxu0 %v5870_v26 }
 0x8bb   : > { %5153 = vmatmul.mubr.msk.f32.vlgmr.msra.gmra.mrb[68].mxu0 %vm773_vm1, %v3909_v54 }
 0x8bc   : > { %5164 = vmatprep.mubr.msk.f32.mxu0 %vm5869_vm2, %v5870_v26 }
 0x91c   : > { %v4099_v38 = vpop.permute.xlu1 %4098 }
 0x986   : > { %v5132_v8 = vpop.f32.mrb[66].mxu0  ;;  %v5143_v2 = vpop.f32.mrb[66].mxu1 }
 0x987   : > { %v3807_v9 = vadd.f32 %v5132_v8, %v4487_v7  ;;  %v3801_v4 = vpop.f32.mrb[67].mxu0  ;;  %v3893_v10 = vpop.f32.mrb[67].mxu1 }
 0x988   : > { %v3802_v3 = vadd.f32 %v4487_v7, %v3801_v4 }
 0x989   : > { %3811 = vst.msk [vmem:[#allocation3 + $0x8] sm:$0xff] %vm773_vm1, %v3807_v9 }
 0x98a   : > { %3810 = vst.msk [vmem:[#allocation3] sm:$0xff] %vm773_vm1, %v3802_v3 }
 0x98e   : > { %v5154_v11 = vpop.f32.mrb[68].mxu0 }
 0x98f   : > { %v3987_v12 = vpop.f32.mrb[69].mxu0 }
 0x990   : > { %v3813_v60 = vld [vmem:[#allocation3 + $0x9] sm:$0x7f] }
 0x991   : > { %v3903_v13 = vadd.f32 %v5143_v2, %v3813_v60  ;;  %v3812_v14 = vld [vmem:[#allocation3 + $0x1] sm:$0xff] }
 0x992   : > { %v3902_v15 = vadd.f32 %v3893_v10, %v3812_v14 }
 0x993   : > { %3905 = vst.msk [vmem:[#allocation3 + $0x9] sm:$0x7f] %vm1384_vm3, %v3903_v13 }
 0x994   : > { %3904 = vst.msk [vmem:[#allocation3 + $0x1] sm:$0xff] %vm773_vm1, %v3902_v15 }
 0x99b   : > { %v3907_v26 = vld [vmem:[#allocation3 + $0x8] sm:$0x7f]  ;;  %v3906_v17 = vld [vmem:[#allocation3] sm:$0xff] }
 0x99c   : > { %v3997_v18 = vadd.f32 %v5154_v11, %v3907_v26  ;;  %v3996_v19 = vadd.f32 %v3987_v12, %v3906_v17 }
 0x99e   : > { %3999 = vst.msk [vmem:[#allocation3 + $0x8] sm:$0x7f] %vm1384_vm3, %v3997_v18 }
 0x99f   : > { %3998 = vst.msk [vmem:[#allocation3] sm:$0xff] %vm773_vm1, %v3996_v19 }
 0x9a5   : > { %v4001_v21 = vld [vmem:[#allocation3 + $0x8] sm:$0xff] }
 0x9a6   : > { %v4000_v22 = vld [vmem:[#allocation3] sm:$0xff]  ;;  %v4003_v23 = vmax.f32 %v4001_v21, 0.0 }
 0x9a7   : > { %v4002_v24 = vmax.f32 %v4000_v22, 0.0 }
 0x9a8   : > { %v4005_v25 = vadd.f32 %v4003_v23, %v3715_v29 }
 0x9a9   : > { %v4004_v27 = vadd.f32 %v4002_v24, %v3714_v58 }
 0x9aa   : > { %4007 = vst.msk [vmem:[#allocation2 + $0x8] sm:$0xff] %vm773_vm1, %v4005_v25 }
 0x9ab   : > { %4006 = vst.msk [vmem:[#allocation2] sm:$0xff] %vm773_vm1, %v4004_v27 }
 0x9b1   : > { %v4009_v28 = vld [vmem:[#allocation2 + $0x8] sm:$0x7f] }
 0x9b2   : > { %v4008_v52 = vld [vmem:[#allocation2] sm:$0xff]  ;;  %v4011_v30 = vld [vmem:[#allocation2 + $0x9] sm:$0x7f] }
 0x9b3   : > { %v4010_v49 = vld [vmem:[#allocation2 + $0x1] sm:$0xff]  ;;  %v4013_v31 = vmax.f32 %v4009_v28, %v4011_v30 }
 0x9b4   : > { %v4012_v0 = vmax.f32 %v4008_v52, %v4010_v49 }
 0x9b6   : > { %v5376_v59 = vpack.c.bf16 %v4013_v31, %v4012_v0 }
 0x9b8   : > { %5378 = vmatpush3.bf16.msk.msra.mxu1 %vm6629_vm8, %v5376_v59 }
 0x9bb   : > { %5160 = vmatmul.mubr.msk.f32.vlgmr.msra.gmra.mrb[68].mxu1 %vm4015_vm11, %v4014_v32 }
 0xa8e   : > { %v4088_v35 = vpop.f32.mrb[68].mxu1 }
 0xa8f   : > { %4092 = vst.msk [vmem:[#allocation2] sm:$0xff] %vm773_vm1, %v4088_v35  ;;  %v5161_v20 = vpop.f32.mrb[69].mxu1 }
 0xa96   : > { %v4094_v36 = vld [vmem:[#allocation2] sm:$0xff] }
 0xa97   : > { %5163 = vmatpush3.xpose.msk.msra.mxu0 %vm773_vm1, %v4094_v36 }
 0xa9a   : > { %5165 = vmatmul.mubr.msk.f32.vlgmr.msra.gmra.mrb[70].mxu0 %vm773_vm1, %v4093_v37 }
 0xb6d   : > { %v4173_v39 = vpop.f32.mrb[70].mxu0 }
 0xb6e   : > { %v4174_v16 = vadd.f32 %v4173_v39, %v4099_v38  ;;  %v5166_v40 = vpop.f32.mrb[71].mxu0 }
 0xb70   : > { %4178 = vst.msk [vmem:[%s599_s23] sm:$0xff] %vm4177_vm12, %v4174_v16 }
 0xb71   : > { %5784 = shalt.err (!%p5781_p10)
}
 0xb72   : > { %s5785_s11 = scalar_lea.hbm %s6806_s10, 128  ;;  %s5789_s23 = scalar_lea.hbm %s6912_s26, 256 }
 0xb73   : > { %p5786_p11 = scmp.ne.s32.totalorder %s6806_s10, %s5785_s11  ;;  %p5790_p7 = scmp.lt.u32.totalorder %s6806_s10, %s6912_s26 }
 0xb74   : > { %p5791_p6 = scmp.lt.u32.totalorder %s5789_s23, %s5785_s11  ;;  %p5793_p12 = scmp.lt.u32.totalorder %s5785_s11, %s6806_s10 }
 0xb75   : > { %p5787_p3 = pnand %p5786_p11, %p6913_p1 }
 0xb76   : > { %p5792_p9 = por %p5791_p6, %p5790_p7 }
 0xb77   : > { %p5788_p5 = pneg %p5787_p3 }
 0xb78   : > { %p5794_p13 = por %p5793_p12, %p5792_p9 }
 0xb7a   : > { %p5795_p0 = pnand %p5794_p13, %p5788_p5 }
 0xb7c   : > { %5798 = shalt.err (!%p5795_p0)
}
 0xb7d   : > { %5413 = dma.vmem_to_hbm [thread:$0]  (%p6913_p1), %s6808_s12, 128, %s6806_s10, %s4180_s24  }
 0xb7e PF: > { %s4205_s25 = sand.u32 1, %s5841_s29   ;;  %p6914_p2 = scmp.ne.s32.totalorder %s6894_s2, 0 }
 0xb7f   : > { %p6915_p8 = scmp.ge.s32.totalorder %s5853_s16, 2  ;;  %s4206_s19 = scalar_lea.sflag [#allocation6], %s4205_s25 }
 0xb81   : > { %p5445_p4 = pnand %p6915_p8, %p6914_p2 }
 0xb83   : > { %5836 = dma.done.wait (!%p5445_p4), %s4206_s19, 128  }
 0xb84   : > { %5838 = vsyncadd (!%p5445_p4), %s4206_s19, 4294967168  ;;  %p31_p10 = scmp.ge.s32.totalorder %s6193_s21, 4   ;;  %s6916_s29 = smov %s5845_s30 }
 0xb85   : > { %s6917_s30 = smov %s5849_s15  ;;  %s6918_s15 = smov %s6204_s18 }
 0xb86   : > { %s6919_s16 = smov %s6193_s21  ;;  %33 = sbr.rel (!%p31_p10) target bundleno = 18 (0x12), region = 175 }
 0xb8d   :  { %4211 = vsyncpa [#allocation5], 1 }
 0xb8e   :  { %4213 = vsyncpa [#allocation5 + $0x1], 1 }
 0xb8f   :  { %4214 = vsyncpa [#allocation8], 1 }
 0xb90   :  { %4215 = vsyncpa [#allocation11], 1 }
 0xb91   :  { %4216 = vsyncpa [#allocation14], 1 }
 0xb92   :  { %4217 = vsyncpa [#allocation17], 1 }
 0xb93   :  { %4218 = vsyncpa [#allocation6], 1 }
 0xb94   :  { %4220 = vsyncpa [#allocation6 + $0x1], 1 }

</bundles_post_ra>
